<compile_context>
chip_gen: v5e
topology: v5e:2x2
jax: 0.10.0
libtpu: 0.0.40
codegen_flags: <defaults>
</compile_context>

<pallas_src>
import jax
import jax.numpy as jnp
from jax import lax
from jax.experimental import pallas as pl
from jax.experimental.pallas import tpu as pltpu


def _matmul_bias_relu_kernel(p_ref, w_ref, b_ref, o_ref):
    """One sample: out = relu(W @ patches + b), voxels on the lane axis.

    p_ref: (1, CK, M)    im2col patches for this sample (CK = Cin*27, M = D*H*W)
    w_ref: (Cout, CK)    conv weights flattened, resident across grid steps
    b_ref: (Cout, 1)     bias
    o_ref: (1, Cout, M)  output, M (multiple of 128) on the lane axis
    """
    y = jnp.dot(w_ref[...], p_ref[0], preferred_element_type=jnp.float32)
    y = y + b_ref[...]                       # (Cout, M) + (Cout, 1) broadcast
    o_ref[0] = jnp.maximum(y, 0.0).astype(o_ref.dtype)


def _extract_patches(x):
    """NCDHW -> (N, Cin*27, D*H*W) patches for a 3x3x3 / padding=1 conv."""
    N, C, D, H, W = x.shape
    xp = jnp.pad(x, ((0, 0), (0, 0), (1, 1), (1, 1), (1, 1)))
    slabs = [xp[:, :, kd:kd + D, kh:kh + H, kw:kw + W]
             for kd in range(3) for kh in range(3) for kw in range(3)]
    p = jnp.stack(slabs, axis=2)             # (N, C, 27, D, H, W)
    return p.reshape(N, C * 27, D * H * W)   # j = ci*27 + (kd*9 + kh*3 + kw)


def conv3d_relu_stage(x, weight, bias):
    """Conv3d(kernel=3, padding=1) + ReLU on NCDHW input via a Pallas matmul.

    x      : (N, Cin, D, H, W)  float32
    weight : (Cout, Cin, 3, 3, 3)  (PyTorch Conv3d layout, OIDHW)
    bias   : (Cout,)
    returns: (N, Cout, D, H, W)
    """
    N, Cin, D, H, W = x.shape
    Cout = weight.shape[0]
    M = D * H * W
    CK = Cin * 27

    patches = _extract_patches(x)                  # (N, CK, M)
    w2d = weight.reshape(Cout, CK)                 # column order matches patches
    b2d = bias.reshape(Cout, 1)

    out = pl.pallas_call(
        _matmul_bias_relu_kernel,
        out_shape=jax.ShapeDtypeStruct((N, Cout, M), x.dtype),
        grid_spec=pltpu.PrefetchScalarGridSpec(
            num_scalar_prefetch=0,
            grid=(N,),
            in_specs=[
                pl.BlockSpec((1, CK, M), lambda n: (n, 0, 0)),
                pl.BlockSpec((Cout, CK), lambda n: (0, 0)),   # resident weights
                pl.BlockSpec((Cout, 1), lambda n: (0, 0)),    # resident bias
            ],
            out_specs=pl.BlockSpec((1, Cout, M), lambda n: (n, 0, 0)),
        ),
        compiler_params=pltpu.CompilerParams(
            dimension_semantics=("parallel",),
            vmem_limit_bytes=32 * 1024 * 1024,
        ),
    )(patches, w2d, b2d)

    # Free reshape: (N, Cout, D*H*W) is already the contiguous NCDHW layout.
    return out.reshape(N, Cout, D, H, W)


def conv_block(x, weights, biases):
    """ConvBlock forward: [Conv3d(3, pad=1) + ReLU] per stage (norm='none')."""
    y = x
    for w, b in zip(weights, biases):
        y = conv3d_relu_stage(y, w, b)
    return y


def _reference(x, weights, biases):
    """Pure-JAX reference of the same ConvBlock forward."""
    y = x
    for w, b in zip(weights, biases):
        y = lax.conv_general_dilated(
            y, w,
            window_strides=(1, 1, 1),
            padding=((1, 1), (1, 1), (1, 1)),
            dimension_numbers=("NCDHW", "OIDHW", "NCDHW"))
        y = jnp.maximum(y + b[None, :, None, None, None], 0.0)
    return y


if __name__ == "__main__":
    key = jax.random.PRNGKey(0)
    k_x, k_w1, k_b1, k_w2, k_b2 = jax.random.split(key, 5)

    # Module config: ConvBlock(n_stages=2, n_filters_in=4, n_filters_out=8,
    # normalization='none') -> [Conv3d(4,8,3,pad=1)+ReLU, Conv3d(8,8,3,pad=1)+ReLU]
    N, Cin, Cout, S = 2, 4, 8, 16

    x = jax.random.normal(k_x, (N, Cin, S, S, S), dtype=jnp.float32)
    w1 = 0.1 * jax.random.normal(k_w1, (Cout, Cin, 3, 3, 3), dtype=jnp.float32)
    b1 = 0.1 * jax.random.normal(k_b1, (Cout,), dtype=jnp.float32)
    w2 = 0.1 * jax.random.normal(k_w2, (Cout, Cout, 3, 3, 3), dtype=jnp.float32)
    b2 = 0.1 * jax.random.normal(k_b2, (Cout,), dtype=jnp.float32)

    weights = (w1, w2)
    biases = (b1, b2)

    out = jax.jit(conv_block)(x, weights, biases)
    out = jax.block_until_ready(out)

    ref = _reference(x, weights, biases)
    assert out.shape == (N, Cout, S, S, S)
    max_err = float(jnp.max(jnp.abs(out - ref)))
    assert jnp.allclose(out, ref, atol=1e-3, rtol=1e-3), max_err

    print("KERNEL_OK")
</pallas_src>

<mosaic_0001>
module attributes {stable_mosaic.version = 11 : i64} {
  func.func @_matmul_bias_relu_kernel(%arg0: i32, %arg1: memref<1x108x4096xf32, #tpu.memory_space<vmem>>, %arg2: memref<8x108xf32, #tpu.memory_space<vmem>>, %arg3: memref<8x1xf32, #tpu.memory_space<vmem>>, %arg4: memref<1x8x4096xf32, #tpu.memory_space<vmem>>) attributes {dimension_semantics = [#tpu.dimension_semantics<parallel>], iteration_bounds = array<i64: 2>, scalar_prefetch = 0 : i64, scratch_operands = 0 : i64, tpu.core_type = #tpu.core_type<tc>, window_params = [{transform_indices = @transform_0, window_bounds = array<i64: 1, 108, 4096>}, {pipeline_mode = #tpu.pipeline_mode<synchronous>, transform_indices = @transform_1, window_bounds = array<i64: 8, 108>}, {pipeline_mode = #tpu.pipeline_mode<synchronous>, transform_indices = @transform_2, window_bounds = array<i64: 8, 1>}, {transform_indices = @transform_3, window_bounds = array<i64: 1, 8, 4096>}]} {
    %c0 = arith.constant 0 : index
    %c0_0 = arith.constant 0 : index
    %0 = vector.load %arg2[%c0, %c0_0] : memref<8x108xf32, #tpu.memory_space<vmem>>, vector<8x108xf32>
    %c0_1 = arith.constant 0 : index
    %c0_2 = arith.constant 0 : index
    %c0_3 = arith.constant 0 : index
    %1 = vector.load %arg1[%c0_1, %c0_2, %c0_3] : memref<1x108x4096xf32, #tpu.memory_space<vmem>>, vector<1x108x4096xf32>
    %2 = vector.shape_cast %1 : vector<1x108x4096xf32> to vector<108x4096xf32>
    %cst = arith.constant dense<0.000000e+00> : vector<8x4096xf32>
    %3 = tpu.matmul %0, %2, %cst {dimension_numbers = #tpu.dot_dimension_numbers<[1], [0], [0], [1], [0, 0, 1, 1], [], []>} : vector<8x108xf32>, vector<108x4096xf32>, vector<8x4096xf32> -> vector<8x4096xf32>
    %c0_4 = arith.constant 0 : index
    %c0_5 = arith.constant 0 : index
    %4 = vector.load %arg3[%c0_4, %c0_5] : memref<8x1xf32, #tpu.memory_space<vmem>>, vector<8x1xf32>
    %5 = vector.broadcast %4 : vector<8x1xf32> to vector<8x4096xf32>
    %6 = arith.addf %3, %5 : vector<8x4096xf32>
    %cst_6 = arith.constant 0.000000e+00 : f32
    %7 = vector.broadcast %cst_6 : f32 to vector<8x4096xf32>
    %8 = arith.maximumf %6, %7 : vector<8x4096xf32>
    %c0_7 = arith.constant 0 : index
    %c0_8 = arith.constant 0 : index
    %c0_9 = arith.constant 0 : index
    %9 = vector.load %arg4[%c0_7, %c0_8, %c0_9] : memref<1x8x4096xf32, #tpu.memory_space<vmem>>, vector<1x8x4096xf32>
    %10 = vector.shape_cast %9 : vector<1x8x4096xf32> to vector<8x4096xf32>
    %11 = vector.shape_cast %8 : vector<8x4096xf32> to vector<1x8x4096xf32>
    tpu.vector_store %arg4[%c0_7, %c0_8, %c0_9], %11 {strides = array<i32>} : memref<1x8x4096xf32, #tpu.memory_space<vmem>>, vector<1x8x4096xf32>,
    return
  }
  func.func @transform_0(%arg0: i32) -> (i32, i32, i32) {
    %c0_i32 = arith.constant 0 : i32
    %c0_i32_0 = arith.constant 0 : i32
    %c0_i32_1 = arith.constant 0 : i32
    return %arg0, %c0_i32, %c0_i32_0 : i32, i32, i32
  }
  func.func @transform_1(%arg0: i32) -> (i32, i32) {
    %c0_i32 = arith.constant 0 : i32
    %c0_i32_0 = arith.constant 0 : i32
    %c0_i32_1 = arith.constant 0 : i32
    return %c0_i32, %c0_i32_0 : i32, i32
  }
  func.func @transform_2(%arg0: i32) -> (i32, i32) {
    %c0_i32 = arith.constant 0 : i32
    %c0_i32_0 = arith.constant 0 : i32
    %c0_i32_1 = arith.constant 0 : i32
    return %c0_i32, %c0_i32_0 : i32, i32
  }
  func.func @transform_3(%arg0: i32) -> (i32, i32, i32) {
    %c0_i32 = arith.constant 0 : i32
    %c0_i32_0 = arith.constant 0 : i32
    %c0_i32_1 = arith.constant 0 : i32
    return %arg0, %c0_i32, %c0_i32_0 : i32, i32, i32
  }
}

module attributes {stable_mosaic.version = 11 : i64} {
  func.func @_matmul_bias_relu_kernel(%arg0: i32, %arg1: memref<1x216x4096xf32, #tpu.memory_space<vmem>>, %arg2: memref<8x216xf32, #tpu.memory_space<vmem>>, %arg3: memref<8x1xf32, #tpu.memory_space<vmem>>, %arg4: memref<1x8x4096xf32, #tpu.memory_space<vmem>>) attributes {dimension_semantics = [#tpu.dimension_semantics<parallel>], iteration_bounds = array<i64: 2>, scalar_prefetch = 0 : i64, scratch_operands = 0 : i64, tpu.core_type = #tpu.core_type<tc>, window_params = [{transform_indices = @transform_0, window_bounds = array<i64: 1, 216, 4096>}, {pipeline_mode = #tpu.pipeline_mode<synchronous>, transform_indices = @transform_1, window_bounds = array<i64: 8, 216>}, {pipeline_mode = #tpu.pipeline_mode<synchronous>, transform_indices = @transform_2, window_bounds = array<i64: 8, 1>}, {transform_indices = @transform_3, window_bounds = array<i64: 1, 8, 4096>}]} {
    %c0 = arith.constant 0 : index
    %c0_0 = arith.constant 0 : index
    %0 = vector.load %arg2[%c0, %c0_0] : memref<8x216xf32, #tpu.memory_space<vmem>>, vector<8x216xf32>
    %c0_1 = arith.constant 0 : index
    %c0_2 = arith.constant 0 : index
    %c0_3 = arith.constant 0 : index
    %1 = vector.load %arg1[%c0_1, %c0_2, %c0_3] : memref<1x216x4096xf32, #tpu.memory_space<vmem>>, vector<1x216x4096xf32>
    %2 = vector.shape_cast %1 : vector<1x216x4096xf32> to vector<216x4096xf32>
    %cst = arith.constant dense<0.000000e+00> : vector<8x4096xf32>
    %3 = tpu.matmul %0, %2, %cst {dimension_numbers = #tpu.dot_dimension_numbers<[1], [0], [0], [1], [0, 0, 1, 1], [], []>} : vector<8x216xf32>, vector<216x4096xf32>, vector<8x4096xf32> -> vector<8x4096xf32>
    %c0_4 = arith.constant 0 : index
    %c0_5 = arith.constant 0 : index
    %4 = vector.load %arg3[%c0_4, %c0_5] : memref<8x1xf32, #tpu.memory_space<vmem>>, vector<8x1xf32>
    %5 = vector.broadcast %4 : vector<8x1xf32> to vector<8x4096xf32>
    %6 = arith.addf %3, %5 : vector<8x4096xf32>
    %cst_6 = arith.constant 0.000000e+00 : f32
    %7 = vector.broadcast %cst_6 : f32 to vector<8x4096xf32>
    %8 = arith.maximumf %6, %7 : vector<8x4096xf32>
    %c0_7 = arith.constant 0 : index
    %c0_8 = arith.constant 0 : index
    %c0_9 = arith.constant 0 : index
    %9 = vector.load %arg4[%c0_7, %c0_8, %c0_9] : memref<1x8x4096xf32, #tpu.memory_space<vmem>>, vector<1x8x4096xf32>
    %10 = vector.shape_cast %9 : vector<1x8x4096xf32> to vector<8x4096xf32>
    %11 = vector.shape_cast %8 : vector<8x4096xf32> to vector<1x8x4096xf32>
    tpu.vector_store %arg4[%c0_7, %c0_8, %c0_9], %11 {strides = array<i32>} : memref<1x8x4096xf32, #tpu.memory_space<vmem>>, vector<1x8x4096xf32>,
    return
  }
  func.func @transform_0(%arg0: i32) -> (i32, i32, i32) {
    %c0_i32 = arith.constant 0 : i32
    %c0_i32_0 = arith.constant 0 : i32
    %c0_i32_1 = arith.constant 0 : i32
    return %arg0, %c0_i32, %c0_i32_0 : i32, i32, i32
  }
  func.func @transform_1(%arg0: i32) -> (i32, i32) {
    %c0_i32 = arith.constant 0 : i32
    %c0_i32_0 = arith.constant 0 : i32
    %c0_i32_1 = arith.constant 0 : i32
    return %c0_i32, %c0_i32_0 : i32, i32
  }
  func.func @transform_2(%arg0: i32) -> (i32, i32) {
    %c0_i32 = arith.constant 0 : i32
    %c0_i32_0 = arith.constant 0 : i32
    %c0_i32_1 = arith.constant 0 : i32
    return %c0_i32, %c0_i32_0 : i32, i32
  }
  func.func @transform_3(%arg0: i32) -> (i32, i32, i32) {
    %c0_i32 = arith.constant 0 : i32
    %c0_i32_0 = arith.constant 0 : i32
    %c0_i32_1 = arith.constant 0 : i32
    return %arg0, %c0_i32, %c0_i32_0 : i32, i32, i32
  }
}

</mosaic_0001>

<bundles_post_ra>
// kernel: conv_block.2
= control target key start
LH: loop header
LB: loop body
LE: loop exit
PB: predicated region body
PF: predicated region fallthrough
CT: control target
= control target key end

     0   :  { %s1602_s12 = smov 0   ;;  %s2250_s0 = inlined_call_operand.vmem [shape: f32[2,108,4096], index: 0, kind: input, shape index: {}]   ;;  %s2251_s1 = inlined_call_operand.vmem [shape: f32[8,108], index: 1, kind: input, shape index: {}]   ;;  %s2252_s2 = inlined_call_operand.vmem [shape: f32[8,1], index: 2, kind: input, shape index: {}]   ;;  %s2253_s3 = inlined_call_operand.vmem [shape: f32[2,8,4096], index: 3, kind: output, shape index: {}]  }
   0x1 LB: > { %s1486_s13 = sadd.s32 4294967295, %s1579_s12   ;;  %p1490_p0 = scmp.ge.s32.totalorder %s1579_s12, 1  ;;  %s1579_s12 = sphi %s1602_s12, %s13_s12  }
   0x2   : > { %p137_p1 = scmp.lt.s32.totalorder %s1579_s12, 3 }
   0x4   : > { %p138_p2 = pnand %p1490_p0, %p137_p1 }
   0x5   : > { %p161_p3 = scmp.lt.s32.totalorder (!%p138_p2), %s1486_s13, 1 }
   0x6   : > { %141 = sbr.rel (%p138_p2) target bundleno = 392 (0x188), region = 32 }
   0xb   : > { %s2255_s13 = smov (!%p161_p3, %s1486_s13), 1  ;;  %vm630_vm0 = vcmask 1043456   ;;  %vm626_vm1 = vcmask 883712  }
   0xc   : > { %s1561_s14 = smul.u32 3584, %s2255_s13  ;;  %s1560_s22 = sshll.u32 %s2255_s13, 8 }
   0xd   : > { %s2067_s25 = scalar_lea.vmem %s2253_s3, %s1560_s22 }
   0xe   : > { %s1616_s17 = scalar_lea.vmem %s2250_s0, %s1561_s14 }
   0xf   : > { %v590_v0 = vld [vmem:[%s1616_s17 + $0xd10] sm:$0xf]  ;;  %v591_v1 = vld [vmem:[%s1616_s17 + $0xd18] sm:$0xf]  ;;  %v588_v6 = vld [vmem:[%s1616_s17 + $0xd00] sm:$0xf] }
  0x10   : > { %v558_v2 = vld [vmem:[%s1616_s17 + $0xc10] sm:$0xff]  ;;  %1498 = vmatpush.msk.msra.mxu2 %vm630_vm0, %v590_v0  ;;  %1500 = vmatpush.msk.msra.mxu3 %vm630_vm0, %v591_v1  ;;  %v559_v3 = vld [vmem:[%s1616_s17 + $0xc18] sm:$0xff]  ;;  %v589_v7 = vld [vmem:[%s1616_s17 + $0xd08] sm:$0xf] }
  0x11   : > { %v526_v4 = vld [vmem:[%s1616_s17 + $0xb10] sm:$0xff]  ;;  %v527_v5 = vld [vmem:[%s1616_s17 + $0xb18] sm:$0xff]  ;;  %v556_v8 = vld [vmem:[%s1616_s17 + $0xc00] sm:$0xff]  ;;  %1494 = vmatpush.msk.msra.mxu0 %vm630_vm0, %v588_v6  ;;  %1496 = vmatpush.msk.msra.mxu1 %vm630_vm0, %v589_v7 }
  0x12   : > { %770 = vmatpush.msra.mxu2 %v558_v2  ;;  %790 = vmatpush.msra.mxu3 %v559_v3  ;;  %v557_v9 = vld [vmem:[%s1616_s17 + $0xc08] sm:$0xff]  ;;  %v494_v10 = vld [vmem:[%s1616_s17 + $0xa10] sm:$0xff]  ;;  %v495_v11 = vld [vmem:[%s1616_s17 + $0xa18] sm:$0xff] }
  0x13   : > { %v524_v12 = vld [vmem:[%s1616_s17 + $0xb00] sm:$0xff]  ;;  %v525_v13 = vld [vmem:[%s1616_s17 + $0xb08] sm:$0xff]  ;;  %730 = vmatpush.msra.mxu0 %v556_v8  ;;  %750 = vmatpush.msra.mxu1 %v557_v9  ;;  %v462_v14 = vld [vmem:[%s1616_s17 + $0x910] sm:$0xff] }
  0x14   : > { %771 = vmatpush.msra.mxu2 %v526_v4  ;;  %791 = vmatpush.msra.mxu3 %v527_v5  ;;  %v463_v15 = vld [vmem:[%s1616_s17 + $0x918] sm:$0xff]  ;;  %v492_v16 = vld [vmem:[%s1616_s17 + $0xa00] sm:$0xff]  ;;  %v493_v17 = vld [vmem:[%s1616_s17 + $0xa08] sm:$0xff] }
  0x15   : > { %731 = vmatpush.msra.mxu0 %v524_v12  ;;  %751 = vmatpush.msra.mxu1 %v525_v13  ;;  %v430_v18 = vld [vmem:[%s1616_s17 + $0x810] sm:$0xff]  ;;  %v431_v19 = vld [vmem:[%s1616_s17 + $0x818] sm:$0xff]  ;;  %v460_v20 = vld [vmem:[%s1616_s17 + $0x900] sm:$0xff] }
  0x16   : > { %772 = vmatpush.msra.mxu2 %v494_v10  ;;  %792 = vmatpush.msra.mxu3 %v495_v11  ;;  %v461_v21 = vld [vmem:[%s1616_s17 + $0x908] sm:$0xff]  ;;  %v398_v22 = vld [vmem:[%s1616_s17 + $0x710] sm:$0xff]  ;;  %v399_v23 = vld [vmem:[%s1616_s17 + $0x718] sm:$0xff] }
  0x17   : > { %732 = vmatpush.msra.mxu0 %v492_v16  ;;  %752 = vmatpush.msra.mxu1 %v493_v17  ;;  %v428_v24 = vld [vmem:[%s1616_s17 + $0x800] sm:$0xff]  ;;  %v429_v25 = vld [vmem:[%s1616_s17 + $0x808] sm:$0xff]  ;;  %v366_v26 = vld [vmem:[%s1616_s17 + $0x610] sm:$0xff] }
  0x18   : > { %773 = vmatpush.msra.mxu2 %v462_v14  ;;  %793 = vmatpush.msra.mxu3 %v463_v15  ;;  %v367_v27 = vld [vmem:[%s1616_s17 + $0x618] sm:$0xff]  ;;  %v396_v28 = vld [vmem:[%s1616_s17 + $0x700] sm:$0xff]  ;;  %v397_v29 = vld [vmem:[%s1616_s17 + $0x708] sm:$0xff] }
  0x19   : > { %733 = vmatpush.msra.mxu0 %v460_v20  ;;  %753 = vmatpush.msra.mxu1 %v461_v21  ;;  %v334_v30 = vld [vmem:[%s1616_s17 + $0x510] sm:$0xff]  ;;  %v335_v31 = vld [vmem:[%s1616_s17 + $0x518] sm:$0xff]  ;;  %v364_v32 = vld [vmem:[%s1616_s17 + $0x600] sm:$0xff] }
  0x1a   : > { %774 = vmatpush.msra.mxu2 %v430_v18  ;;  %794 = vmatpush.msra.mxu3 %v431_v19  ;;  %v365_v33 = vld [vmem:[%s1616_s17 + $0x608] sm:$0xff]  ;;  %v302_v34 = vld [vmem:[%s1616_s17 + $0x410] sm:$0xff]  ;;  %v303_v35 = vld [vmem:[%s1616_s17 + $0x418] sm:$0xff] }
  0x1b   : > { %734 = vmatpush.msra.mxu0 %v428_v24  ;;  %754 = vmatpush.msra.mxu1 %v429_v25  ;;  %v332_v36 = vld [vmem:[%s1616_s17 + $0x500] sm:$0xff]  ;;  %v333_v37 = vld [vmem:[%s1616_s17 + $0x508] sm:$0xff]  ;;  %v270_v38 = vld [vmem:[%s1616_s17 + $0x310] sm:$0xff] }
  0x1c   : > { %775 = vmatpush.msra.mxu2 %v398_v22  ;;  %795 = vmatpush.msra.mxu3 %v399_v23  ;;  %v271_v39 = vld [vmem:[%s1616_s17 + $0x318] sm:$0xff]  ;;  %v300_v40 = vld [vmem:[%s1616_s17 + $0x400] sm:$0xff]  ;;  %v301_v41 = vld [vmem:[%s1616_s17 + $0x408] sm:$0xff] }
  0x1d   : > { %735 = vmatpush.msra.mxu0 %v396_v28  ;;  %755 = vmatpush.msra.mxu1 %v397_v29  ;;  %v238_v42 = vld [vmem:[%s1616_s17 + $0x210] sm:$0xff]  ;;  %v239_v43 = vld [vmem:[%s1616_s17 + $0x218] sm:$0xff]  ;;  %v268_v44 = vld [vmem:[%s1616_s17 + $0x300] sm:$0xff] }
  0x1e   : > { %776 = vmatpush.msra.mxu2 %v366_v26  ;;  %796 = vmatpush.msra.mxu3 %v367_v27  ;;  %v269_v45 = vld [vmem:[%s1616_s17 + $0x308] sm:$0xff]  ;;  %v206_v46 = vld [vmem:[%s1616_s17 + $0x110] sm:$0xff]  ;;  %v207_v47 = vld [vmem:[%s1616_s17 + $0x118] sm:$0xff] }
  0x1f   : > { %736 = vmatpush.msra.mxu0 %v364_v32  ;;  %756 = vmatpush.msra.mxu1 %v365_v33  ;;  %v236_v48 = vld [vmem:[%s1616_s17 + $0x200] sm:$0xff]  ;;  %v237_v49 = vld [vmem:[%s1616_s17 + $0x208] sm:$0xff]  ;;  %v174_v50 = vld [vmem:[%s1616_s17 + $0x10] sm:$0xff] }
  0x20   : > { %777 = vmatpush.msra.mxu2 %v334_v30  ;;  %797 = vmatpush.msra.mxu3 %v335_v31  ;;  %v175_v51 = vld [vmem:[%s1616_s17 + $0x18] sm:$0xff]  ;;  %v594_v52 = vld [vmem:[%s1616_s17 + $0xd30] sm:$0xf]  ;;  %v204_v54 = vld [vmem:[%s1616_s17 + $0x100] sm:$0xff] }
  0x21   : > { %737 = vmatpush.msra.mxu0 %v332_v36  ;;  %757 = vmatpush.msra.mxu1 %v333_v37  ;;  %v595_v53 = vld [vmem:[%s1616_s17 + $0xd38] sm:$0xf]  ;;  %v205_v55 = vld [vmem:[%s1616_s17 + $0x108] sm:$0xff]  ;;  %v562_v56 = vld [vmem:[%s1616_s17 + $0xc30] sm:$0xff] }
  0x22   : > { %778 = vmatpush.msra.mxu2 %v302_v34  ;;  %798 = vmatpush.msra.mxu3 %v303_v35  ;;  %v563_v57 = vld [vmem:[%s1616_s17 + $0xc38] sm:$0xff]  ;;  %v172_v58 = vld [vmem:[%s1616_s17] sm:$0xff]  ;;  %v173_v59 = vld [vmem:[%s1616_s17 + $0x8] sm:$0xff] }
  0x23   : > { %738 = vmatpush.msra.mxu0 %v300_v40  ;;  %758 = vmatpush.msra.mxu1 %v301_v41  ;;  %v530_v60 = vld [vmem:[%s1616_s17 + $0xb30] sm:$0xff]  ;;  %v531_v61 = vld [vmem:[%s1616_s17 + $0xb38] sm:$0xff]  ;;  %v592_v62 = vld [vmem:[%s1616_s17 + $0xd20] sm:$0xf] }
  0x24   : > { %779 = vmatpush.msra.mxu2 %v270_v38  ;;  %799 = vmatpush.msra.mxu3 %v271_v39  ;;  %v593_v63 = vld [vmem:[%s1616_s17 + $0xd28] sm:$0xf]  ;;  %v498_v0 = vld [vmem:[%s1616_s17 + $0xa30] sm:$0xff]  ;;  %v499_v1 = vld [vmem:[%s1616_s17 + $0xa38] sm:$0xff] }
  0x25   : > { %739 = vmatpush.msra.mxu0 %v268_v44  ;;  %759 = vmatpush.msra.mxu1 %v269_v45  ;;  %v560_v2 = vld [vmem:[%s1616_s17 + $0xc20] sm:$0xff]  ;;  %v561_v3 = vld [vmem:[%s1616_s17 + $0xc28] sm:$0xff]  ;;  %v466_v4 = vld [vmem:[%s1616_s17 + $0x930] sm:$0xff] }
  0x26   : > { %780 = vmatpush.msra.mxu2 %v238_v42  ;;  %800 = vmatpush.msra.mxu3 %v239_v43  ;;  %v467_v5 = vld [vmem:[%s1616_s17 + $0x938] sm:$0xff]  ;;  %v528_v6 = vld [vmem:[%s1616_s17 + $0xb20] sm:$0xff]  ;;  %v529_v7 = vld [vmem:[%s1616_s17 + $0xb28] sm:$0xff] }
  0x27   : > { %740 = vmatpush.msra.mxu0 %v236_v48  ;;  %760 = vmatpush.msra.mxu1 %v237_v49  ;;  %v434_v8 = vld [vmem:[%s1616_s17 + $0x830] sm:$0xff]  ;;  %v435_v9 = vld [vmem:[%s1616_s17 + $0x838] sm:$0xff]  ;;  %v496_v10 = vld [vmem:[%s1616_s17 + $0xa20] sm:$0xff] }
  0x28   : > { %781 = vmatpush.msra.mxu2 %v206_v46  ;;  %801 = vmatpush.msra.mxu3 %v207_v47  ;;  %v497_v11 = vld [vmem:[%s1616_s17 + $0xa28] sm:$0xff]  ;;  %v402_v12 = vld [vmem:[%s1616_s17 + $0x730] sm:$0xff]  ;;  %v403_v13 = vld [vmem:[%s1616_s17 + $0x738] sm:$0xff] }
  0x29   : > { %741 = vmatpush.msra.mxu0 %v204_v54  ;;  %761 = vmatpush.msra.mxu1 %v205_v55  ;;  %v464_v14 = vld [vmem:[%s1616_s17 + $0x920] sm:$0xff]  ;;  %v465_v15 = vld [vmem:[%s1616_s17 + $0x928] sm:$0xff]  ;;  %v370_v16 = vld [vmem:[%s1616_s17 + $0x630] sm:$0xff] }
  0x2a   : > { %782 = vmatpush.msra.mxu2 %v174_v50  ;;  %802 = vmatpush.msra.mxu3 %v175_v51  ;;  %v371_v17 = vld [vmem:[%s1616_s17 + $0x638] sm:$0xff]  ;;  %v432_v18 = vld [vmem:[%s1616_s17 + $0x820] sm:$0xff]  ;;  %v433_v19 = vld [vmem:[%s1616_s17 + $0x828] sm:$0xff] }
  0x2b   : > { %742 = vmatpush.msra.mxu0 %v172_v58  ;;  %762 = vmatpush.msra.mxu1 %v173_v59  ;;  %v338_v20 = vld [vmem:[%s1616_s17 + $0x530] sm:$0xff]  ;;  %v339_v21 = vld [vmem:[%s1616_s17 + $0x538] sm:$0xff]  ;;  %v400_v22 = vld [vmem:[%s1616_s17 + $0x720] sm:$0xff] }
  0x2c   : > { %1506 = vmatpush.msk.msrb.mxu2 %vm630_vm0, %v594_v52  ;;  %1508 = vmatpush.msk.msrb.mxu3 %vm630_vm0, %v595_v53  ;;  %v401_v23 = vld [vmem:[%s1616_s17 + $0x728] sm:$0xff]  ;;  %v306_v24 = vld [vmem:[%s1616_s17 + $0x430] sm:$0xff]  ;;  %v307_v25 = vld [vmem:[%s1616_s17 + $0x438] sm:$0xff] }
  0x2d   : > { %1502 = vmatpush.msk.msrb.mxu0 %vm630_vm0, %v592_v62  ;;  %1504 = vmatpush.msk.msrb.mxu1 %vm630_vm0, %v593_v63  ;;  %v368_v26 = vld [vmem:[%s1616_s17 + $0x620] sm:$0xff]  ;;  %v369_v27 = vld [vmem:[%s1616_s17 + $0x628] sm:$0xff]  ;;  %v274_v28 = vld [vmem:[%s1616_s17 + $0x330] sm:$0xff] }
  0x2e   : > { %850 = vmatpush.msrb.mxu2 %v562_v56  ;;  %870 = vmatpush.msrb.mxu3 %v563_v57  ;;  %v275_v29 = vld [vmem:[%s1616_s17 + $0x338] sm:$0xff]  ;;  %v336_v30 = vld [vmem:[%s1616_s17 + $0x520] sm:$0xff]  ;;  %v337_v31 = vld [vmem:[%s1616_s17 + $0x528] sm:$0xff] }
  0x2f   : > { %810 = vmatpush.msrb.mxu0 %v560_v2  ;;  %830 = vmatpush.msrb.mxu1 %v561_v3  ;;  %v242_v32 = vld [vmem:[%s1616_s17 + $0x230] sm:$0xff]  ;;  %v243_v33 = vld [vmem:[%s1616_s17 + $0x238] sm:$0xff]  ;;  %v304_v34 = vld [vmem:[%s1616_s17 + $0x420] sm:$0xff] }
  0x30   : > { %851 = vmatpush.msrb.mxu2 %v530_v60  ;;  %871 = vmatpush.msrb.mxu3 %v531_v61  ;;  %v305_v35 = vld [vmem:[%s1616_s17 + $0x428] sm:$0xff]  ;;  %v210_v36 = vld [vmem:[%s1616_s17 + $0x130] sm:$0xff]  ;;  %v211_v37 = vld [vmem:[%s1616_s17 + $0x138] sm:$0xff] }
  0x31   : > { %811 = vmatpush.msrb.mxu0 %v528_v6  ;;  %831 = vmatpush.msrb.mxu1 %v529_v7  ;;  %v272_v38 = vld [vmem:[%s1616_s17 + $0x320] sm:$0xff]  ;;  %v273_v39 = vld [vmem:[%s1616_s17 + $0x328] sm:$0xff]  ;;  %v178_v40 = vld [vmem:[%s1616_s17 + $0x30] sm:$0xff] }
  0x32   : > { %852 = vmatpush.msrb.mxu2 %v498_v0  ;;  %872 = vmatpush.msrb.mxu3 %v499_v1  ;;  %v179_v41 = vld [vmem:[%s1616_s17 + $0x38] sm:$0xff]  ;;  %v1735_v42 = vld [vmem:[%s2251_s1] sm:$0xff]  ;;  %v598_v43 = vld [vmem:[%s1616_s17 + $0xd50] sm:$0xf] }
  0x33   : > { %812 = vmatpush.msrb.mxu0 %v496_v10  ;;  %832 = vmatpush.msrb.mxu1 %v497_v11  ;;  %v599_v44 = vld [vmem:[%s1616_s17 + $0xd58] sm:$0xf]  ;;  %v240_v45 = vld [vmem:[%s1616_s17 + $0x220] sm:$0xff]  ;;  %v241_v46 = vld [vmem:[%s1616_s17 + $0x228] sm:$0xff] }
  0x34   : > { %853 = vmatpush.msrb.mxu2 %v466_v4  ;;  %873 = vmatpush.msrb.mxu3 %v467_v5  ;;  %v566_v47 = vld [vmem:[%s1616_s17 + $0xc50] sm:$0xff]  ;;  %v567_v48 = vld [vmem:[%s1616_s17 + $0xc58] sm:$0xff]  ;;  %v208_v49 = vld [vmem:[%s1616_s17 + $0x120] sm:$0xff] }
  0x35   : > { %813 = vmatpush.msrb.mxu0 %v464_v14  ;;  %833 = vmatpush.msrb.mxu1 %v465_v15  ;;  %v209_v50 = vld [vmem:[%s1616_s17 + $0x128] sm:$0xff]  ;;  %v534_v51 = vld [vmem:[%s1616_s17 + $0xb50] sm:$0xff]  ;;  %v535_v52 = vld [vmem:[%s1616_s17 + $0xb58] sm:$0xff] }
  0x36   : > { %854 = vmatpush.msrb.mxu2 %v434_v8  ;;  %874 = vmatpush.msrb.mxu3 %v435_v9  ;;  %v176_v53 = vld [vmem:[%s1616_s17 + $0x20] sm:$0xff]  ;;  %v177_v54 = vld [vmem:[%s1616_s17 + $0x28] sm:$0xff]  ;;  %v502_v57 = vld [vmem:[%s1616_s17 + $0xa50] sm:$0xff] }
  0x37   : > { %814 = vmatpush.msrb.mxu0 %v432_v18  ;;  %834 = vmatpush.msrb.mxu1 %v433_v19  ;;  %v596_v55 = vld [vmem:[%s1616_s17 + $0xd40] sm:$0xf]  ;;  %v597_v56 = vld [vmem:[%s1616_s17 + $0xd48] sm:$0xf]  ;;  %v503_v58 = vld [vmem:[%s1616_s17 + $0xa58] sm:$0xff] }
  0x38   : > { %855 = vmatpush.msrb.mxu2 %v402_v12  ;;  %875 = vmatpush.msrb.mxu3 %v403_v13  ;;  %v564_v59 = vld [vmem:[%s1616_s17 + $0xc40] sm:$0xff]  ;;  %v565_v60 = vld [vmem:[%s1616_s17 + $0xc48] sm:$0xff]  ;;  %v470_v61 = vld [vmem:[%s1616_s17 + $0x950] sm:$0xff] }
  0x39   : > { %815 = vmatpush.msrb.mxu0 %v400_v22  ;;  %835 = vmatpush.msrb.mxu1 %v401_v23  ;;  %v471_v62 = vld [vmem:[%s1616_s17 + $0x958] sm:$0xff]  ;;  %v532_v63 = vld [vmem:[%s1616_s17 + $0xb40] sm:$0xff]  ;;  %v533_v0 = vld [vmem:[%s1616_s17 + $0xb48] sm:$0xff] }
  0x3a   : > { %856 = vmatpush.msrb.mxu2 %v370_v16  ;;  %876 = vmatpush.msrb.mxu3 %v371_v17  ;;  %v438_v1 = vld [vmem:[%s1616_s17 + $0x850] sm:$0xff]  ;;  %v439_v2 = vld [vmem:[%s1616_s17 + $0x858] sm:$0xff]  ;;  %v500_v3 = vld [vmem:[%s1616_s17 + $0xa40] sm:$0xff]  ;;  %v1581_v16 = vmov 0  }
  0x3b   : > { %816 = vmatpush.msrb.mxu0 %v368_v26  ;;  %836 = vmatpush.msrb.mxu1 %v369_v27  ;;  %v501_v4 = vld [vmem:[%s1616_s17 + $0xa48] sm:$0xff]  ;;  %v406_v5 = vld [vmem:[%s1616_s17 + $0x750] sm:$0xff]  ;;  %v407_v6 = vld [vmem:[%s1616_s17 + $0x758] sm:$0xff] }
  0x3c   : > { %857 = vmatpush.msrb.mxu2 %v338_v20  ;;  %877 = vmatpush.msrb.mxu3 %v339_v21  ;;  %v468_v7 = vld [vmem:[%s1616_s17 + $0x940] sm:$0xff]  ;;  %v469_v8 = vld [vmem:[%s1616_s17 + $0x948] sm:$0xff]  ;;  %v374_v9 = vld [vmem:[%s1616_s17 + $0x650] sm:$0xff] }
  0x3d   : > { %817 = vmatpush.msrb.mxu0 %v336_v30  ;;  %837 = vmatpush.msrb.mxu1 %v337_v31  ;;  %v375_v10 = vld [vmem:[%s1616_s17 + $0x658] sm:$0xff]  ;;  %v436_v11 = vld [vmem:[%s1616_s17 + $0x840] sm:$0xff]  ;;  %v437_v12 = vld [vmem:[%s1616_s17 + $0x848] sm:$0xff] }
  0x3e   : > { %858 = vmatpush.msrb.mxu2 %v306_v24  ;;  %878 = vmatpush.msrb.mxu3 %v307_v25  ;;  %v342_v13 = vld [vmem:[%s1616_s17 + $0x550] sm:$0xff]  ;;  %v343_v14 = vld [vmem:[%s1616_s17 + $0x558] sm:$0xff]  ;;  %v620_v15 = vld [vmem:[%s2252_s2] sm:$0xff] }
  0x3f   : > { %818 = vmatpush.msrb.mxu0 %v304_v34  ;;  %838 = vmatpush.msrb.mxu1 %v305_v35  ;;  %v404_v17 = vld [vmem:[%s1616_s17 + $0x740] sm:$0xff]  ;;  %v405_v18 = vld [vmem:[%s1616_s17 + $0x748] sm:$0xff]  ;;  %v310_v19 = vld [vmem:[%s1616_s17 + $0x450] sm:$0xff] }
  0x40   : > { %859 = vmatpush.msrb.mxu2 %v274_v28  ;;  %879 = vmatpush.msrb.mxu3 %v275_v29  ;;  %v311_v20 = vld [vmem:[%s1616_s17 + $0x458] sm:$0xff]  ;;  %v372_v21 = vld [vmem:[%s1616_s17 + $0x640] sm:$0xff]  ;;  %v373_v22 = vld [vmem:[%s1616_s17 + $0x648] sm:$0xff] }
  0x41   : > { %819 = vmatpush.msrb.mxu0 %v272_v38  ;;  %839 = vmatpush.msrb.mxu1 %v273_v39  ;;  %v278_v23 = vld [vmem:[%s1616_s17 + $0x350] sm:$0xff]  ;;  %v279_v24 = vld [vmem:[%s1616_s17 + $0x358] sm:$0xff]  ;;  %v340_v25 = vld [vmem:[%s1616_s17 + $0x540] sm:$0xff] }
  0x42   : > { %860 = vmatpush.msrb.mxu2 %v242_v32  ;;  %880 = vmatpush.msrb.mxu3 %v243_v33  ;;  %v341_v26 = vld [vmem:[%s1616_s17 + $0x548] sm:$0xff]  ;;  %v246_v27 = vld [vmem:[%s1616_s17 + $0x250] sm:$0xff]  ;;  %v247_v28 = vld [vmem:[%s1616_s17 + $0x258] sm:$0xff] }
  0x43   : > { %1499 = vmatmul.msk.f32.vlgmr.msra.gmra.mxu2 %vm626_vm1, %v1735_v42  ;;  %1501 = vmatmul.msk.f32.vlgmr.msra.gmra.mxu3 %vm626_vm1, %v1735_v42  ;;  %v308_v29 = vld [vmem:[%s1616_s17 + $0x440] sm:$0xff]  ;;  %v309_v30 = vld [vmem:[%s1616_s17 + $0x448] sm:$0xff]  ;;  %v214_v31 = vld [vmem:[%s1616_s17 + $0x150] sm:$0xff] }
  0x44   : > { %861 = vmatpush.msrb.mxu2 %v210_v36  ;;  %881 = vmatpush.msrb.mxu3 %v211_v37  ;;  %v215_v32 = vld [vmem:[%s1616_s17 + $0x158] sm:$0xff]  ;;  %v276_v33 = vld [vmem:[%s1616_s17 + $0x340] sm:$0xff]  ;;  %v277_v34 = vld [vmem:[%s1616_s17 + $0x348] sm:$0xff] }
  0x45   : > { %820 = vmatpush.msrb.mxu0 %v240_v45  ;;  %840 = vmatpush.msrb.mxu1 %v241_v46  ;;  %v182_v35 = vld [vmem:[%s1616_s17 + $0x50] sm:$0xff]  ;;  %v183_v36 = vld [vmem:[%s1616_s17 + $0x58] sm:$0xff]  ;;  %v244_v39 = vld [vmem:[%s1616_s17 + $0x240] sm:$0xff] }
  0x46   : > { %862 = vmatpush.msrb.mxu2 %v178_v40  ;;  %882 = vmatpush.msrb.mxu3 %v179_v41  ;;  %v602_v37 = vld [vmem:[%s1616_s17 + $0xd70] sm:$0xf]  ;;  %v603_v38 = vld [vmem:[%s1616_s17 + $0xd78] sm:$0xf]  ;;  %v245_v40 = vld [vmem:[%s1616_s17 + $0x248] sm:$0xff] }
  0x47   : > { %821 = vmatpush.msrb.mxu0 %v208_v49  ;;  %841 = vmatpush.msrb.mxu1 %v209_v50  ;;  %v570_v41 = vld [vmem:[%s1616_s17 + $0xc70] sm:$0xff]  ;;  %v213_v45 = vld [vmem:[%s1616_s17 + $0x148] sm:$0xff]  ;;  %v600_v50 = vld [vmem:[%s1616_s17 + $0xd60] sm:$0xf] }
  0x48   : > { %1514 = vmatpush.msk.msra.mxu2 %vm630_vm0, %v598_v43  ;;  %1516 = vmatpush.msk.msra.mxu3 %vm630_vm0, %v599_v44  ;;  %v571_v43 = vld [vmem:[%s1616_s17 + $0xc78] sm:$0xff]  ;;  %v212_v44 = vld [vmem:[%s1616_s17 + $0x140] sm:$0xff]  ;;  %v538_v46 = vld [vmem:[%s1616_s17 + $0xb70] sm:$0xff] }
  0x49   : > { %822 = vmatpush.msrb.mxu0 %v176_v53  ;;  %842 = vmatpush.msrb.mxu1 %v177_v54  ;;  %v181_v49 = vld [vmem:[%s1616_s17 + $0x48] sm:$0xff]  ;;  %v507_v53 = vld [vmem:[%s1616_s17 + $0xa78] sm:$0xff]  ;;  %v568_v54 = vld [vmem:[%s1616_s17 + $0xc60] sm:$0xff] }
  0x4a   : > { %930 = vmatpush.msra.mxu2 %v566_v47  ;;  %950 = vmatpush.msra.mxu3 %v567_v48  ;;  %v539_v47 = vld [vmem:[%s1616_s17 + $0xb78] sm:$0xff]  ;;  %v180_v48 = vld [vmem:[%s1616_s17 + $0x40] sm:$0xff] }
  0x4b   : > { %1495 = vmatmul.msk.f32.vlgmr.msra.gmra.mxu0 %vm626_vm1, %v1735_v42  ;;  %1497 = vmatmul.msk.f32.vlgmr.msra.gmra.mxu1 %vm626_vm1, %v1735_v42 }
  0x4c   : > { %931 = vmatpush.msra.mxu2 %v534_v51  ;;  %951 = vmatpush.msra.mxu3 %v535_v52  ;;  %v601_v51 = vld [vmem:[%s1616_s17 + $0xd68] sm:$0xf]  ;;  %v506_v52 = vld [vmem:[%s1616_s17 + $0xa70] sm:$0xff] }
  0x4d   : > { %1510 = vmatpush.msk.msra.mxu0 %vm630_vm0, %v596_v55  ;;  %1512 = vmatpush.msk.msra.mxu1 %vm630_vm0, %v597_v56  ;;  %v569_v55 = vld [vmem:[%s1616_s17 + $0xc68] sm:$0xff]  ;;  %v474_v56 = vld [vmem:[%s1616_s17 + $0x970] sm:$0xff] }
  0x4e   : > { %932 = vmatpush.msra.mxu2 %v502_v57  ;;  %952 = vmatpush.msra.mxu3 %v503_v58  ;;  %v475_v57 = vld [vmem:[%s1616_s17 + $0x978] sm:$0xff]  ;;  %v536_v58 = vld [vmem:[%s1616_s17 + $0xb60] sm:$0xff] }
  0x4f   : > { %890 = vmatpush.msra.mxu0 %v564_v59  ;;  %910 = vmatpush.msra.mxu1 %v565_v60  ;;  %v537_v59 = vld [vmem:[%s1616_s17 + $0xb68] sm:$0xff]  ;;  %v442_v60 = vld [vmem:[%s1616_s17 + $0x870] sm:$0xff] }
  0x50   : > { %933 = vmatpush.msra.mxu2 %v470_v61  ;;  %953 = vmatpush.msra.mxu3 %v471_v62  ;;  %v443_v61 = vld [vmem:[%s1616_s17 + $0x878] sm:$0xff]  ;;  %v504_v62 = vld [vmem:[%s1616_s17 + $0xa60] sm:$0xff] }
  0x51   : > { %891 = vmatpush.msra.mxu0 %v532_v63  ;;  %911 = vmatpush.msra.mxu1 %v533_v0  ;;  %v505_v63 = vld [vmem:[%s1616_s17 + $0xa68] sm:$0xff]  ;;  %v410_v0 = vld [vmem:[%s1616_s17 + $0x770] sm:$0xff] }
  0x52   : > { %934 = vmatpush.msra.mxu2 %v438_v1  ;;  %954 = vmatpush.msra.mxu3 %v439_v2  ;;  %v411_v1 = vld [vmem:[%s1616_s17 + $0x778] sm:$0xff]  ;;  %v472_v2 = vld [vmem:[%s1616_s17 + $0x960] sm:$0xff] }
  0x53   : > { %892 = vmatpush.msra.mxu0 %v500_v3  ;;  %912 = vmatpush.msra.mxu1 %v501_v4  ;;  %v473_v3 = vld [vmem:[%s1616_s17 + $0x968] sm:$0xff]  ;;  %v378_v4 = vld [vmem:[%s1616_s17 + $0x670] sm:$0xff] }
  0x54   : > { %935 = vmatpush.msra.mxu2 %v406_v5  ;;  %955 = vmatpush.msra.mxu3 %v407_v6  ;;  %v379_v5 = vld [vmem:[%s1616_s17 + $0x678] sm:$0xff]  ;;  %v440_v6 = vld [vmem:[%s1616_s17 + $0x860] sm:$0xff] }
  0x55   : > { %893 = vmatpush.msra.mxu0 %v468_v7  ;;  %913 = vmatpush.msra.mxu1 %v469_v8  ;;  %v441_v7 = vld [vmem:[%s1616_s17 + $0x868] sm:$0xff]  ;;  %v346_v8 = vld [vmem:[%s1616_s17 + $0x570] sm:$0xff] }
  0x56   : > { %936 = vmatpush.msra.mxu2 %v374_v9  ;;  %956 = vmatpush.msra.mxu3 %v375_v10  ;;  %v347_v9 = vld [vmem:[%s1616_s17 + $0x578] sm:$0xff]  ;;  %v408_v10 = vld [vmem:[%s1616_s17 + $0x760] sm:$0xff] }
  0x57   : > { %1571 = vset.pattern.permute.xlu0 %v1581_v16  ;;  %894 = vmatpush.msra.mxu0 %v436_v11  ;;  %v409_v11 = vld [vmem:[%s1616_s17 + $0x768] sm:$0xff]  ;;  %v282_v16 = vld [vmem:[%s1616_s17 + $0x370] sm:$0xff] }
  0x58   : > { %914 = vmatpush.msra.mxu1 %v437_v12  ;;  %937 = vmatpush.msra.mxu2 %v342_v13  ;;  %v314_v12 = vld [vmem:[%s1616_s17 + $0x470] sm:$0xff]  ;;  %v315_v13 = vld [vmem:[%s1616_s17 + $0x478] sm:$0xff] }
  0x59   : > { %957 = vmatpush.msra.mxu3 %v343_v14  ;;  %623 = vperm.xlu0 %1571, %v620_v15   ;;  %v376_v14 = vld [vmem:[%s1616_s17 + $0x660] sm:$0xff]  ;;  %v377_v15 = vld [vmem:[%s1616_s17 + $0x668] sm:$0xff] }
  0x5a   : > { %895 = vmatpush.msra.mxu0 %v404_v17  ;;  %915 = vmatpush.msra.mxu1 %v405_v18  ;;  %v283_v17 = vld [vmem:[%s1616_s17 + $0x378] sm:$0xff]  ;;  %v344_v18 = vld [vmem:[%s1616_s17 + $0x560] sm:$0xff] }
  0x5b   : > { %938 = vmatpush.msra.mxu2 %v310_v19  ;;  %958 = vmatpush.msra.mxu3 %v311_v20  ;;  %v345_v19 = vld [vmem:[%s1616_s17 + $0x568] sm:$0xff]  ;;  %v250_v20 = vld [vmem:[%s1616_s17 + $0x270] sm:$0xff] }
  0x5c   : > { %896 = vmatpush.msra.mxu0 %v372_v21  ;;  %916 = vmatpush.msra.mxu1 %v373_v22  ;;  %v251_v21 = vld [vmem:[%s1616_s17 + $0x278] sm:$0xff]  ;;  %v312_v22 = vld [vmem:[%s1616_s17 + $0x460] sm:$0xff] }
  0x5d   : > { %939 = vmatpush.msra.mxu2 %v278_v23  ;;  %959 = vmatpush.msra.mxu3 %v279_v24  ;;  %v313_v23 = vld [vmem:[%s1616_s17 + $0x468] sm:$0xff]  ;;  %v218_v24 = vld [vmem:[%s1616_s17 + $0x170] sm:$0xff] }
  0x5e   : > { %897 = vmatpush.msra.mxu0 %v340_v25  ;;  %917 = vmatpush.msra.mxu1 %v341_v26  ;;  %v219_v25 = vld [vmem:[%s1616_s17 + $0x178] sm:$0xff]  ;;  %v280_v26 = vld [vmem:[%s1616_s17 + $0x360] sm:$0xff] }
  0x5f   : > { %940 = vmatpush.msra.mxu2 %v246_v27  ;;  %960 = vmatpush.msra.mxu3 %v247_v28  ;;  %v281_v27 = vld [vmem:[%s1616_s17 + $0x368] sm:$0xff]  ;;  %v186_v28 = vld [vmem:[%s1616_s17 + $0x70] sm:$0xff] }
  0x60   : > { %898 = vmatpush.msra.mxu0 %v308_v29  ;;  %918 = vmatpush.msra.mxu1 %v309_v30  ;;  %v187_v29 = vld [vmem:[%s1616_s17 + $0x78] sm:$0xff]  ;;  %v606_v30 = vld [vmem:[%s1616_s17 + $0xd90] sm:$0xf] }
  0x61   : > { %941 = vmatpush.msra.mxu2 %v214_v31  ;;  %961 = vmatpush.msra.mxu3 %v215_v32  ;;  %v607_v31 = vld [vmem:[%s1616_s17 + $0xd98] sm:$0xf]  ;;  %v248_v32 = vld [vmem:[%s1616_s17 + $0x260] sm:$0xff] }
  0x62   : > { %899 = vmatpush.msra.mxu0 %v276_v33  ;;  %919 = vmatpush.msra.mxu1 %v277_v34  ;;  %v249_v33 = vld [vmem:[%s1616_s17 + $0x268] sm:$0xff]  ;;  %v574_v34 = vld [vmem:[%s1616_s17 + $0xc90] sm:$0xff] }
  0x63   : > { %942 = vmatpush.msra.mxu2 %v182_v35  ;;  %962 = vmatpush.msra.mxu3 %v183_v36  ;;  %v575_v35 = vld [vmem:[%s1616_s17 + $0xc98] sm:$0xff]  ;;  %v216_v36 = vld [vmem:[%s1616_s17 + $0x160] sm:$0xff] }
  0x64   : > { %1507 = vmatmul.msk.f32.vlgmr.msrb.gmra.mxu2 %vm626_vm1, %v1735_v42  ;;  %1509 = vmatmul.msk.f32.vlgmr.msrb.gmra.mxu3 %vm626_vm1, %v1735_v42 }
  0x65   : > { %1522 = vmatpush.msk.msrb.mxu2 %vm630_vm0, %v602_v37  ;;  %1524 = vmatpush.msk.msrb.mxu3 %vm630_vm0, %v603_v38  ;;  %v217_v37 = vld [vmem:[%s1616_s17 + $0x168] sm:$0xff]  ;;  %v542_v38 = vld [vmem:[%s1616_s17 + $0xb90] sm:$0xff] }
  0x66   : > { %900 = vmatpush.msra.mxu0 %v244_v39  ;;  %920 = vmatpush.msra.mxu1 %v245_v40  ;;  %v543_v39 = vld [vmem:[%s1616_s17 + $0xb98] sm:$0xff]  ;;  %v184_v40 = vld [vmem:[%s1616_s17 + $0x60] sm:$0xff] }
  0x67   : > { %1010 = vmatpush.msrb.mxu2 %v570_v41  ;;  %1030 = vmatpush.msrb.mxu3 %v571_v43  ;;  %v185_v41 = vld [vmem:[%s1616_s17 + $0x68] sm:$0xff]  ;;  %v604_v43 = vld [vmem:[%s1616_s17 + $0xd80] sm:$0xf] }
  0x68   : > { %901 = vmatpush.msra.mxu0 %v212_v44  ;;  %921 = vmatpush.msra.mxu1 %v213_v45  ;;  %v605_v44 = vld [vmem:[%s1616_s17 + $0xd88] sm:$0xf]  ;;  %v510_v45 = vld [vmem:[%s1616_s17 + $0xa90] sm:$0xff] }
  0x69   : > { %1011 = vmatpush.msrb.mxu2 %v538_v46  ;;  %1031 = vmatpush.msrb.mxu3 %v539_v47  ;;  %v511_v46 = vld [vmem:[%s1616_s17 + $0xa98] sm:$0xff]  ;;  %v572_v47 = vld [vmem:[%s1616_s17 + $0xc80] sm:$0xff] }
  0x6a   : > { %902 = vmatpush.msra.mxu0 %v180_v48  ;;  %922 = vmatpush.msra.mxu1 %v181_v49  ;;  %v573_v48 = vld [vmem:[%s1616_s17 + $0xc88] sm:$0xff]  ;;  %v478_v49 = vld [vmem:[%s1616_s17 + $0x990] sm:$0xff] }
  0x6b   : > { %1503 = vmatmul.msk.f32.vlgmr.msrb.gmra.mxu0 %vm626_vm1, %v1735_v42  ;;  %1505 = vmatmul.msk.f32.vlgmr.msrb.gmra.mxu1 %vm626_vm1, %v1735_v42 }
  0x6c   : > { %1518 = vmatpush.msk.msrb.mxu0 %vm630_vm0, %v600_v50  ;;  %1520 = vmatpush.msk.msrb.mxu1 %vm630_vm0, %v601_v51  ;;  %v479_v50 = vld [vmem:[%s1616_s17 + $0x998] sm:$0xff]  ;;  %v540_v51 = vld [vmem:[%s1616_s17 + $0xb80] sm:$0xff] }
  0x6d   : > { %1012 = vmatpush.msrb.mxu2 %v506_v52  ;;  %1032 = vmatpush.msrb.mxu3 %v507_v53  ;;  %v541_v52 = vld [vmem:[%s1616_s17 + $0xb88] sm:$0xff]  ;;  %v446_v53 = vld [vmem:[%s1616_s17 + $0x890] sm:$0xff] }
  0x6e   : > { %970 = vmatpush.msrb.mxu0 %v568_v54  ;;  %990 = vmatpush.msrb.mxu1 %v569_v55  ;;  %v447_v54 = vld [vmem:[%s1616_s17 + $0x898] sm:$0xff]  ;;  %v508_v55 = vld [vmem:[%s1616_s17 + $0xa80] sm:$0xff] }
  0x6f   : > { %1013 = vmatpush.msrb.mxu2 %v474_v56  ;;  %1033 = vmatpush.msrb.mxu3 %v475_v57  ;;  %v509_v56 = vld [vmem:[%s1616_s17 + $0xa88] sm:$0xff]  ;;  %v414_v57 = vld [vmem:[%s1616_s17 + $0x790] sm:$0xff] }
  0x70   : > { %971 = vmatpush.msrb.mxu0 %v536_v58  ;;  %991 = vmatpush.msrb.mxu1 %v537_v59  ;;  %v415_v58 = vld [vmem:[%s1616_s17 + $0x798] sm:$0xff]  ;;  %v476_v59 = vld [vmem:[%s1616_s17 + $0x980] sm:$0xff] }
  0x71   : > { %1014 = vmatpush.msrb.mxu2 %v442_v60  ;;  %1034 = vmatpush.msrb.mxu3 %v443_v61  ;;  %v477_v60 = vld [vmem:[%s1616_s17 + $0x988] sm:$0xff]  ;;  %v382_v61 = vld [vmem:[%s1616_s17 + $0x690] sm:$0xff] }
  0x72   : > { %972 = vmatpush.msrb.mxu0 %v504_v62  ;;  %992 = vmatpush.msrb.mxu1 %v505_v63  ;;  %v383_v62 = vld [vmem:[%s1616_s17 + $0x698] sm:$0xff]  ;;  %v444_v63 = vld [vmem:[%s1616_s17 + $0x880] sm:$0xff] }
  0x73   : > { %1015 = vmatpush.msrb.mxu2 %v410_v0  ;;  %1035 = vmatpush.msrb.mxu3 %v411_v1  ;;  %v445_v0 = vld [vmem:[%s1616_s17 + $0x888] sm:$0xff]  ;;  %v350_v1 = vld [vmem:[%s1616_s17 + $0x590] sm:$0xff] }
  0x74   : > { %973 = vmatpush.msrb.mxu0 %v472_v2  ;;  %993 = vmatpush.msrb.mxu1 %v473_v3  ;;  %v351_v2 = vld [vmem:[%s1616_s17 + $0x598] sm:$0xff]  ;;  %v412_v3 = vld [vmem:[%s1616_s17 + $0x780] sm:$0xff] }
  0x75   : > { %1016 = vmatpush.msrb.mxu2 %v378_v4  ;;  %1036 = vmatpush.msrb.mxu3 %v379_v5  ;;  %v413_v4 = vld [vmem:[%s1616_s17 + $0x788] sm:$0xff]  ;;  %v318_v5 = vld [vmem:[%s1616_s17 + $0x490] sm:$0xff] }
  0x76   : > { %974 = vmatpush.msrb.mxu0 %v440_v6  ;;  %994 = vmatpush.msrb.mxu1 %v441_v7  ;;  %v319_v6 = vld [vmem:[%s1616_s17 + $0x498] sm:$0xff]  ;;  %v380_v7 = vld [vmem:[%s1616_s17 + $0x680] sm:$0xff] }
  0x77   : > { %1017 = vmatpush.msrb.mxu2 %v346_v8  ;;  %1037 = vmatpush.msrb.mxu3 %v347_v9  ;;  %v381_v8 = vld [vmem:[%s1616_s17 + $0x688] sm:$0xff]  ;;  %v286_v9 = vld [vmem:[%s1616_s17 + $0x390] sm:$0xff] }
  0x78   : > { %975 = vmatpush.msrb.mxu0 %v408_v10  ;;  %995 = vmatpush.msrb.mxu1 %v409_v11  ;;  %v287_v10 = vld [vmem:[%s1616_s17 + $0x398] sm:$0xff]  ;;  %v348_v11 = vld [vmem:[%s1616_s17 + $0x580] sm:$0xff] }
  0x79   : > { %1018 = vmatpush.msrb.mxu2 %v314_v12  ;;  %1038 = vmatpush.msrb.mxu3 %v315_v13  ;;  %v349_v12 = vld [vmem:[%s1616_s17 + $0x588] sm:$0xff]  ;;  %v254_v13 = vld [vmem:[%s1616_s17 + $0x290] sm:$0xff] }
  0x7a   : > { %976 = vmatpush.msrb.mxu0 %v376_v14  ;;  %996 = vmatpush.msrb.mxu1 %v377_v15  ;;  %v255_v14 = vld [vmem:[%s1616_s17 + $0x298] sm:$0xff]  ;;  %v316_v15 = vld [vmem:[%s1616_s17 + $0x480] sm:$0xff] }
  0x7b   : > { %1019 = vmatpush.msrb.mxu2 %v282_v16  ;;  %1039 = vmatpush.msrb.mxu3 %v283_v17  ;;  %v317_v16 = vld [vmem:[%s1616_s17 + $0x488] sm:$0xff]  ;;  %v222_v17 = vld [vmem:[%s1616_s17 + $0x190] sm:$0xff] }
  0x7c   : > { %977 = vmatpush.msrb.mxu0 %v344_v18  ;;  %997 = vmatpush.msrb.mxu1 %v345_v19  ;;  %v223_v18 = vld [vmem:[%s1616_s17 + $0x198] sm:$0xff]  ;;  %v284_v19 = vld [vmem:[%s1616_s17 + $0x380] sm:$0xff] }
  0x7d   : > { %1020 = vmatpush.msrb.mxu2 %v250_v20  ;;  %1040 = vmatpush.msrb.mxu3 %v251_v21  ;;  %v285_v20 = vld [vmem:[%s1616_s17 + $0x388] sm:$0xff]  ;;  %v190_v21 = vld [vmem:[%s1616_s17 + $0x90] sm:$0xff] }
  0x7e   : > { %978 = vmatpush.msrb.mxu0 %v312_v22  ;;  %998 = vmatpush.msrb.mxu1 %v313_v23  ;;  %v191_v22 = vld [vmem:[%s1616_s17 + $0x98] sm:$0xff]  ;;  %v610_v23 = vld [vmem:[%s1616_s17 + $0xdb0] sm:$0xf] }
  0x7f   : > { %1021 = vmatpush.msrb.mxu2 %v218_v24  ;;  %1041 = vmatpush.msrb.mxu3 %v219_v25  ;;  %v611_v24 = vld [vmem:[%s1616_s17 + $0xdb8] sm:$0xf]  ;;  %v252_v25 = vld [vmem:[%s1616_s17 + $0x280] sm:$0xff] }
  0x80   : > { %979 = vmatpush.msrb.mxu0 %v280_v26  ;;  %999 = vmatpush.msrb.mxu1 %v281_v27  ;;  %v253_v26 = vld [vmem:[%s1616_s17 + $0x288] sm:$0xff]  ;;  %v578_v27 = vld [vmem:[%s1616_s17 + $0xcb0] sm:$0xff] }
  0x81   : > { %1022 = vmatpush.msrb.mxu2 %v186_v28  ;;  %1042 = vmatpush.msrb.mxu3 %v187_v29  ;;  %v579_v28 = vld [vmem:[%s1616_s17 + $0xcb8] sm:$0xff]  ;;  %v220_v29 = vld [vmem:[%s1616_s17 + $0x180] sm:$0xff] }
  0x82   : > { %1515 = vmatmul.msk.f32.vlgmr.msra.gmra.mxu2 %vm626_vm1, %v1735_v42  ;;  %1517 = vmatmul.msk.f32.vlgmr.msra.gmra.mxu3 %vm626_vm1, %v1735_v42 }
  0x83   : > { %1530 = vmatpush.msk.msra.mxu2 %vm630_vm0, %v606_v30  ;;  %1532 = vmatpush.msk.msra.mxu3 %vm630_vm0, %v607_v31  ;;  %v221_v30 = vld [vmem:[%s1616_s17 + $0x188] sm:$0xff]  ;;  %v546_v31 = vld [vmem:[%s1616_s17 + $0xbb0] sm:$0xff] }
  0x84   : > { %980 = vmatpush.msrb.mxu0 %v248_v32  ;;  %1000 = vmatpush.msrb.mxu1 %v249_v33  ;;  %v547_v32 = vld [vmem:[%s1616_s17 + $0xbb8] sm:$0xff]  ;;  %v188_v33 = vld [vmem:[%s1616_s17 + $0x80] sm:$0xff] }
  0x85   : > { %1090 = vmatpush.msra.mxu2 %v574_v34  ;;  %1110 = vmatpush.msra.mxu3 %v575_v35  ;;  %v189_v34 = vld [vmem:[%s1616_s17 + $0x88] sm:$0xff]  ;;  %v608_v35 = vld [vmem:[%s1616_s17 + $0xda0] sm:$0xf] }
  0x86   : > { %981 = vmatpush.msrb.mxu0 %v216_v36  ;;  %1001 = vmatpush.msrb.mxu1 %v217_v37  ;;  %v609_v36 = vld [vmem:[%s1616_s17 + $0xda8] sm:$0xf]  ;;  %v514_v37 = vld [vmem:[%s1616_s17 + $0xab0] sm:$0xff] }
  0x87   : > { %1091 = vmatpush.msra.mxu2 %v542_v38  ;;  %1111 = vmatpush.msra.mxu3 %v543_v39  ;;  %v515_v38 = vld [vmem:[%s1616_s17 + $0xab8] sm:$0xff]  ;;  %v576_v39 = vld [vmem:[%s1616_s17 + $0xca0] sm:$0xff] }
  0x88   : > { %982 = vmatpush.msrb.mxu0 %v184_v40  ;;  %1002 = vmatpush.msrb.mxu1 %v185_v41  ;;  %v577_v40 = vld [vmem:[%s1616_s17 + $0xca8] sm:$0xff]  ;;  %v482_v41 = vld [vmem:[%s1616_s17 + $0x9b0] sm:$0xff] }
  0x89   : > { %1511 = vmatmul.msk.f32.vlgmr.msra.gmra.mxu0 %vm626_vm1, %v1735_v42  ;;  %1513 = vmatmul.msk.f32.vlgmr.msra.gmra.mxu1 %vm626_vm1, %v1735_v42 }
  0x8a   : > { %1526 = vmatpush.msk.msra.mxu0 %vm630_vm0, %v604_v43  ;;  %1528 = vmatpush.msk.msra.mxu1 %vm630_vm0, %v605_v44  ;;  %v483_v43 = vld [vmem:[%s1616_s17 + $0x9b8] sm:$0xff]  ;;  %v544_v44 = vld [vmem:[%s1616_s17 + $0xba0] sm:$0xff] }
  0x8b   : > { %1092 = vmatpush.msra.mxu2 %v510_v45  ;;  %1112 = vmatpush.msra.mxu3 %v511_v46  ;;  %v545_v45 = vld [vmem:[%s1616_s17 + $0xba8] sm:$0xff]  ;;  %v450_v46 = vld [vmem:[%s1616_s17 + $0x8b0] sm:$0xff] }
  0x8c   : > { %1050 = vmatpush.msra.mxu0 %v572_v47  ;;  %1070 = vmatpush.msra.mxu1 %v573_v48  ;;  %v451_v47 = vld [vmem:[%s1616_s17 + $0x8b8] sm:$0xff]  ;;  %v512_v48 = vld [vmem:[%s1616_s17 + $0xaa0] sm:$0xff] }
  0x8d   : > { %1093 = vmatpush.msra.mxu2 %v478_v49  ;;  %1113 = vmatpush.msra.mxu3 %v479_v50  ;;  %v513_v49 = vld [vmem:[%s1616_s17 + $0xaa8] sm:$0xff]  ;;  %v418_v50 = vld [vmem:[%s1616_s17 + $0x7b0] sm:$0xff] }
  0x8e   : > { %1051 = vmatpush.msra.mxu0 %v540_v51  ;;  %1071 = vmatpush.msra.mxu1 %v541_v52  ;;  %v419_v51 = vld [vmem:[%s1616_s17 + $0x7b8] sm:$0xff]  ;;  %v480_v52 = vld [vmem:[%s1616_s17 + $0x9a0] sm:$0xff] }
  0x8f   : > { %1094 = vmatpush.msra.mxu2 %v446_v53  ;;  %1114 = vmatpush.msra.mxu3 %v447_v54  ;;  %v481_v53 = vld [vmem:[%s1616_s17 + $0x9a8] sm:$0xff]  ;;  %v386_v54 = vld [vmem:[%s1616_s17 + $0x6b0] sm:$0xff] }
  0x90   : > { %1052 = vmatpush.msra.mxu0 %v508_v55  ;;  %1072 = vmatpush.msra.mxu1 %v509_v56  ;;  %v387_v55 = vld [vmem:[%s1616_s17 + $0x6b8] sm:$0xff]  ;;  %v448_v56 = vld [vmem:[%s1616_s17 + $0x8a0] sm:$0xff] }
  0x91   : > { %1095 = vmatpush.msra.mxu2 %v414_v57  ;;  %1115 = vmatpush.msra.mxu3 %v415_v58  ;;  %v449_v57 = vld [vmem:[%s1616_s17 + $0x8a8] sm:$0xff]  ;;  %v354_v58 = vld [vmem:[%s1616_s17 + $0x5b0] sm:$0xff] }
  0x92   : > { %1053 = vmatpush.msra.mxu0 %v476_v59  ;;  %1073 = vmatpush.msra.mxu1 %v477_v60  ;;  %v355_v59 = vld [vmem:[%s1616_s17 + $0x5b8] sm:$0xff]  ;;  %v416_v60 = vld [vmem:[%s1616_s17 + $0x7a0] sm:$0xff] }
  0x93   : > { %1096 = vmatpush.msra.mxu2 %v382_v61  ;;  %1116 = vmatpush.msra.mxu3 %v383_v62  ;;  %v417_v61 = vld [vmem:[%s1616_s17 + $0x7a8] sm:$0xff]  ;;  %v322_v62 = vld [vmem:[%s1616_s17 + $0x4b0] sm:$0xff] }
  0x94   : > { %1054 = vmatpush.msra.mxu0 %v444_v63  ;;  %1074 = vmatpush.msra.mxu1 %v445_v0  ;;  %v323_v63 = vld [vmem:[%s1616_s17 + $0x4b8] sm:$0xff]  ;;  %v384_v0 = vld [vmem:[%s1616_s17 + $0x6a0] sm:$0xff] }
  0x95   : > { %1097 = vmatpush.msra.mxu2 %v350_v1  ;;  %1117 = vmatpush.msra.mxu3 %v351_v2  ;;  %v385_v1 = vld [vmem:[%s1616_s17 + $0x6a8] sm:$0xff]  ;;  %v290_v2 = vld [vmem:[%s1616_s17 + $0x3b0] sm:$0xff] }
  0x96   : > { %1055 = vmatpush.msra.mxu0 %v412_v3  ;;  %1075 = vmatpush.msra.mxu1 %v413_v4  ;;  %v291_v3 = vld [vmem:[%s1616_s17 + $0x3b8] sm:$0xff]  ;;  %v352_v4 = vld [vmem:[%s1616_s17 + $0x5a0] sm:$0xff] }
  0x97   : > { %1098 = vmatpush.msra.mxu2 %v318_v5  ;;  %1118 = vmatpush.msra.mxu3 %v319_v6  ;;  %v353_v5 = vld [vmem:[%s1616_s17 + $0x5a8] sm:$0xff]  ;;  %v258_v6 = vld [vmem:[%s1616_s17 + $0x2b0] sm:$0xff] }
  0x98   : > { %1056 = vmatpush.msra.mxu0 %v380_v7  ;;  %1076 = vmatpush.msra.mxu1 %v381_v8  ;;  %v259_v7 = vld [vmem:[%s1616_s17 + $0x2b8] sm:$0xff]  ;;  %v320_v8 = vld [vmem:[%s1616_s17 + $0x4a0] sm:$0xff] }
  0x99   : > { %1099 = vmatpush.msra.mxu2 %v286_v9  ;;  %1119 = vmatpush.msra.mxu3 %v287_v10  ;;  %v321_v9 = vld [vmem:[%s1616_s17 + $0x4a8] sm:$0xff]  ;;  %v226_v10 = vld [vmem:[%s1616_s17 + $0x1b0] sm:$0xff] }
  0x9a   : > { %1057 = vmatpush.msra.mxu0 %v348_v11  ;;  %1077 = vmatpush.msra.mxu1 %v349_v12  ;;  %v227_v11 = vld [vmem:[%s1616_s17 + $0x1b8] sm:$0xff]  ;;  %v288_v12 = vld [vmem:[%s1616_s17 + $0x3a0] sm:$0xff] }
  0x9b   : > { %1100 = vmatpush.msra.mxu2 %v254_v13  ;;  %1120 = vmatpush.msra.mxu3 %v255_v14  ;;  %v289_v13 = vld [vmem:[%s1616_s17 + $0x3a8] sm:$0xff]  ;;  %v194_v14 = vld [vmem:[%s1616_s17 + $0xb0] sm:$0xff] }
  0x9c   : > { %1058 = vmatpush.msra.mxu0 %v316_v15  ;;  %1078 = vmatpush.msra.mxu1 %v317_v16  ;;  %v195_v15 = vld [vmem:[%s1616_s17 + $0xb8] sm:$0xff]  ;;  %v614_v16 = vld [vmem:[%s1616_s17 + $0xdd0] sm:$0xf] }
  0x9d   : > { %1101 = vmatpush.msra.mxu2 %v222_v17  ;;  %1121 = vmatpush.msra.mxu3 %v223_v18  ;;  %v615_v17 = vld [vmem:[%s1616_s17 + $0xdd8] sm:$0xf]  ;;  %v256_v18 = vld [vmem:[%s1616_s17 + $0x2a0] sm:$0xff] }
  0x9e   : > { %1059 = vmatpush.msra.mxu0 %v284_v19  ;;  %1079 = vmatpush.msra.mxu1 %v285_v20  ;;  %v257_v19 = vld [vmem:[%s1616_s17 + $0x2a8] sm:$0xff]  ;;  %v582_v20 = vld [vmem:[%s1616_s17 + $0xcd0] sm:$0xff] }
  0x9f   : > { %1102 = vmatpush.msra.mxu2 %v190_v21  ;;  %1122 = vmatpush.msra.mxu3 %v191_v22  ;;  %v583_v21 = vld [vmem:[%s1616_s17 + $0xcd8] sm:$0xff]  ;;  %v224_v22 = vld [vmem:[%s1616_s17 + $0x1a0] sm:$0xff] }
  0xa0   : > { %1523 = vmatmul.msk.f32.vlgmr.msrb.gmra.mxu2 %vm626_vm1, %v1735_v42  ;;  %1525 = vmatmul.msk.f32.vlgmr.msrb.gmra.mxu3 %vm626_vm1, %v1735_v42 }
  0xa1   : > { %1538 = vmatpush.msk.msrb.mxu2 %vm630_vm0, %v610_v23  ;;  %1540 = vmatpush.msk.msrb.mxu3 %vm630_vm0, %v611_v24  ;;  %v225_v23 = vld [vmem:[%s1616_s17 + $0x1a8] sm:$0xff]  ;;  %v550_v24 = vld [vmem:[%s1616_s17 + $0xbd0] sm:$0xff] }
  0xa2   : > { %1060 = vmatpush.msra.mxu0 %v252_v25  ;;  %1080 = vmatpush.msra.mxu1 %v253_v26  ;;  %v551_v25 = vld [vmem:[%s1616_s17 + $0xbd8] sm:$0xff]  ;;  %v192_v26 = vld [vmem:[%s1616_s17 + $0xa0] sm:$0xff] }
  0xa3   : > { %1170 = vmatpush.msrb.mxu2 %v578_v27  ;;  %1190 = vmatpush.msrb.mxu3 %v579_v28  ;;  %v193_v27 = vld [vmem:[%s1616_s17 + $0xa8] sm:$0xff]  ;;  %v612_v28 = vld [vmem:[%s1616_s17 + $0xdc0] sm:$0xf] }
  0xa4   : > { %1061 = vmatpush.msra.mxu0 %v220_v29  ;;  %1081 = vmatpush.msra.mxu1 %v221_v30  ;;  %v613_v29 = vld [vmem:[%s1616_s17 + $0xdc8] sm:$0xf]  ;;  %v518_v30 = vld [vmem:[%s1616_s17 + $0xad0] sm:$0xff] }
  0xa5   : > { %1171 = vmatpush.msrb.mxu2 %v546_v31  ;;  %1191 = vmatpush.msrb.mxu3 %v547_v32  ;;  %v519_v31 = vld [vmem:[%s1616_s17 + $0xad8] sm:$0xff]  ;;  %v580_v32 = vld [vmem:[%s1616_s17 + $0xcc0] sm:$0xff] }
  0xa6   : > { %1062 = vmatpush.msra.mxu0 %v188_v33  ;;  %1082 = vmatpush.msra.mxu1 %v189_v34  ;;  %v581_v33 = vld [vmem:[%s1616_s17 + $0xcc8] sm:$0xff]  ;;  %v486_v34 = vld [vmem:[%s1616_s17 + $0x9d0] sm:$0xff] }
  0xa7   : > { %1519 = vmatmul.msk.f32.vlgmr.msrb.gmra.mxu0 %vm626_vm1, %v1735_v42  ;;  %1521 = vmatmul.msk.f32.vlgmr.msrb.gmra.mxu1 %vm626_vm1, %v1735_v42 }
  0xa8   : > { %1534 = vmatpush.msk.msrb.mxu0 %vm630_vm0, %v608_v35  ;;  %1536 = vmatpush.msk.msrb.mxu1 %vm630_vm0, %v609_v36  ;;  %v487_v35 = vld [vmem:[%s1616_s17 + $0x9d8] sm:$0xff]  ;;  %v548_v36 = vld [vmem:[%s1616_s17 + $0xbc0] sm:$0xff] }
  0xa9   : > { %1172 = vmatpush.msrb.mxu2 %v514_v37  ;;  %1192 = vmatpush.msrb.mxu3 %v515_v38  ;;  %v549_v37 = vld [vmem:[%s1616_s17 + $0xbc8] sm:$0xff]  ;;  %v455_v38 = vld [vmem:[%s1616_s17 + $0x8d8] sm:$0xff] }
  0xaa   : > { %1130 = vmatpush.msrb.mxu0 %v576_v39  ;;  %1150 = vmatpush.msrb.mxu1 %v577_v40  ;;  %v516_v40 = vld [vmem:[%s1616_s17 + $0xac0] sm:$0xff] }
  0xab   : > { %1173 = vmatpush.msrb.mxu2 %v482_v41  ;;  %1193 = vmatpush.msrb.mxu3 %v483_v43  ;;  %v517_v41 = vld [vmem:[%s1616_s17 + $0xac8] sm:$0xff] }
  0xac   : > { %1131 = vmatpush.msrb.mxu0 %v544_v44  ;;  %1151 = vmatpush.msrb.mxu1 %v545_v45  ;;  %v422_v45 = vld [vmem:[%s1616_s17 + $0x7d0] sm:$0xff] }
  0xad   : > { %1174 = vmatpush.msrb.mxu2 %v450_v46  ;;  %1194 = vmatpush.msrb.mxu3 %v451_v47  ;;  %v423_v46 = vld [vmem:[%s1616_s17 + $0x7d8] sm:$0xff] }
  0xae   : > { %1132 = vmatpush.msrb.mxu0 %v512_v48  ;;  %1152 = vmatpush.msrb.mxu1 %v513_v49  ;;  %v484_v48 = vld [vmem:[%s1616_s17 + $0x9c0] sm:$0xff]  ;;  %v485_v49 = vld [vmem:[%s1616_s17 + $0x9c8] sm:$0xff] }
  0xaf   : > { %1175 = vmatpush.msrb.mxu2 %v418_v50  ;;  %1195 = vmatpush.msrb.mxu3 %v419_v51  ;;  %v390_v51 = vld [vmem:[%s1616_s17 + $0x6d0] sm:$0xff] }
  0xb0   : > { %1133 = vmatpush.msrb.mxu0 %v480_v52  ;;  %1153 = vmatpush.msrb.mxu1 %v481_v53  ;;  %v391_v52 = vld [vmem:[%s1616_s17 + $0x6d8] sm:$0xff] }
  0xb1   : > { %1176 = vmatpush.msrb.mxu2 %v386_v54  ;;  %1196 = vmatpush.msrb.mxu3 %v387_v55 }
  0xb2   : > { %1134 = vmatpush.msrb.mxu0 %v448_v56  ;;  %1154 = vmatpush.msrb.mxu1 %v449_v57  ;;  %v452_v56 = vld [vmem:[%s1616_s17 + $0x8c0] sm:$0xff]  ;;  %v453_v57 = vld [vmem:[%s1616_s17 + $0x8c8] sm:$0xff] }
  0xb3   : > { %1177 = vmatpush.msrb.mxu2 %v354_v58  ;;  %1197 = vmatpush.msrb.mxu3 %v355_v59  ;;  %v358_v59 = vld [vmem:[%s1616_s17 + $0x5d0] sm:$0xff] }
  0xb4   : > { %1135 = vmatpush.msrb.mxu0 %v416_v60  ;;  %1155 = vmatpush.msrb.mxu1 %v417_v61  ;;  %v359_v60 = vld [vmem:[%s1616_s17 + $0x5d8] sm:$0xff] }
  0xb5   : > { %1178 = vmatpush.msrb.mxu2 %v322_v62  ;;  %1198 = vmatpush.msrb.mxu3 %v323_v63 }
  0xb6   : > { %1136 = vmatpush.msrb.mxu0 %v384_v0  ;;  %1156 = vmatpush.msrb.mxu1 %v385_v1  ;;  %v420_v0 = vld [vmem:[%s1616_s17 + $0x7c0] sm:$0xff]  ;;  %v421_v1 = vld [vmem:[%s1616_s17 + $0x7c8] sm:$0xff] }
  0xb7   : > { %1179 = vmatpush.msrb.mxu2 %v290_v2  ;;  %1199 = vmatpush.msrb.mxu3 %v291_v3  ;;  %v326_v3 = vld [vmem:[%s1616_s17 + $0x4d0] sm:$0xff] }
  0xb8   : > { %1137 = vmatpush.msrb.mxu0 %v352_v4  ;;  %1157 = vmatpush.msrb.mxu1 %v353_v5  ;;  %v327_v4 = vld [vmem:[%s1616_s17 + $0x4d8] sm:$0xff]  ;;  %v388_v5 = vld [vmem:[%s1616_s17 + $0x6c0] sm:$0xff] }
  0xb9   : > { %1180 = vmatpush.msrb.mxu2 %v258_v6  ;;  %1200 = vmatpush.msrb.mxu3 %v259_v7  ;;  %v389_v6 = vld [vmem:[%s1616_s17 + $0x6c8] sm:$0xff]  ;;  %v294_v7 = vld [vmem:[%s1616_s17 + $0x3d0] sm:$0xff] }
  0xba   : > { %1138 = vmatpush.msrb.mxu0 %v320_v8  ;;  %1158 = vmatpush.msrb.mxu1 %v321_v9  ;;  %v295_v8 = vld [vmem:[%s1616_s17 + $0x3d8] sm:$0xff]  ;;  %v356_v9 = vld [vmem:[%s1616_s17 + $0x5c0] sm:$0xff] }
  0xbb   : > { %1181 = vmatpush.msrb.mxu2 %v226_v10  ;;  %1201 = vmatpush.msrb.mxu3 %v227_v11  ;;  %v357_v10 = vld [vmem:[%s1616_s17 + $0x5c8] sm:$0xff]  ;;  %v262_v11 = vld [vmem:[%s1616_s17 + $0x2d0] sm:$0xff] }
  0xbc   : > { %1139 = vmatpush.msrb.mxu0 %v288_v12  ;;  %1159 = vmatpush.msrb.mxu1 %v289_v13  ;;  %v263_v12 = vld [vmem:[%s1616_s17 + $0x2d8] sm:$0xff]  ;;  %v324_v13 = vld [vmem:[%s1616_s17 + $0x4c0] sm:$0xff] }
  0xbd   : > { %1182 = vmatpush.msrb.mxu2 %v194_v14  ;;  %1202 = vmatpush.msrb.mxu3 %v195_v15  ;;  %v325_v14 = vld [vmem:[%s1616_s17 + $0x4c8] sm:$0xff]  ;;  %v230_v15 = vld [vmem:[%s1616_s17 + $0x1d0] sm:$0xff] }
  0xbe   : > { %1531 = vmatmul.msk.f32.vlgmr.msra.gmra.mxu2 %vm626_vm1, %v1735_v42  ;;  %1533 = vmatmul.msk.f32.vlgmr.msra.gmra.mxu3 %vm626_vm1, %v1735_v42 }
  0xbf   : > { %1546 = vmatpush.msk.msra.mxu2 %vm630_vm0, %v614_v16  ;;  %1548 = vmatpush.msk.msra.mxu3 %vm630_vm0, %v615_v17  ;;  %v231_v16 = vld [vmem:[%s1616_s17 + $0x1d8] sm:$0xff]  ;;  %v292_v17 = vld [vmem:[%s1616_s17 + $0x3c0] sm:$0xff] }
  0xc0   : > { %1140 = vmatpush.msrb.mxu0 %v256_v18  ;;  %1160 = vmatpush.msrb.mxu1 %v257_v19  ;;  %v293_v18 = vld [vmem:[%s1616_s17 + $0x3c8] sm:$0xff]  ;;  %v198_v19 = vld [vmem:[%s1616_s17 + $0xd0] sm:$0xff] }
  0xc1   : > { %1250 = vmatpush.msra.mxu2 %v582_v20  ;;  %1270 = vmatpush.msra.mxu3 %v583_v21  ;;  %v199_v20 = vld [vmem:[%s1616_s17 + $0xd8] sm:$0xff]  ;;  %v618_v21 = vld [vmem:[%s1616_s17 + $0xdf0] sm:$0xf] }
  0xc2   : > { %1141 = vmatpush.msrb.mxu0 %v224_v22  ;;  %1161 = vmatpush.msrb.mxu1 %v225_v23  ;;  %v619_v22 = vld [vmem:[%s1616_s17 + $0xdf8] sm:$0xf]  ;;  %v260_v23 = vld [vmem:[%s1616_s17 + $0x2c0] sm:$0xff] }
  0xc3   : > { %1251 = vmatpush.msra.mxu2 %v550_v24  ;;  %1271 = vmatpush.msra.mxu3 %v551_v25  ;;  %v261_v24 = vld [vmem:[%s1616_s17 + $0x2c8] sm:$0xff]  ;;  %v2103_v25 = vld [vmem:[%s2251_s1] sm:$0xff] }
  0xc4   : > { %1142 = vmatpush.msrb.mxu0 %v192_v26  ;;  %1162 = vmatpush.msrb.mxu1 %v193_v27  ;;  %v586_v26 = vld [vmem:[%s1616_s17 + $0xcf0] sm:$0xff]  ;;  %v587_v27 = vld [vmem:[%s1616_s17 + $0xcf8] sm:$0xff] }
  0xc5   : > { %1527 = vmatmul.msk.f32.vlgmr.msra.gmra.mxu0 %vm626_vm1, %v1735_v42  ;;  %1529 = vmatmul.msk.f32.vlgmr.msra.gmra.mxu1 %vm626_vm1, %v1735_v42  ;;  %v454_v42 = vld [vmem:[%s1616_s17 + $0x8d0] sm:$0xff] }
  0xc6   : > { %1542 = vmatpush.msk.msra.mxu0 %vm630_vm0, %v612_v28  ;;  %1544 = vmatpush.msk.msra.mxu1 %vm630_vm0, %v613_v29  ;;  %v784_v39 = vpop.f32.mrf.mxu2  ;;  %v804_v47 = vpop.f32.mrf.mxu3  ;;  %v228_v28 = vld [vmem:[%s1616_s17 + $0x1c0] sm:$0xff]  ;;  %v229_v29 = vld [vmem:[%s1616_s17 + $0x1c8] sm:$0xff] }
  0xc7   : > { %1252 = vmatpush.msra.mxu2 %v518_v30  ;;  %1272 = vmatpush.msra.mxu3 %v519_v31  ;;  %v554_v30 = vld [vmem:[%s1616_s17 + $0xbf0] sm:$0xff]  ;;  %v555_v31 = vld [vmem:[%s1616_s17 + $0xbf8] sm:$0xff] }
  0xc8   : > { %1210 = vmatpush.msra.mxu0 %v580_v32  ;;  %1230 = vmatpush.msra.mxu1 %v581_v33  ;;  %v744_v43 = vpop.f32.mrf.mxu0  ;;  %v764_v44 = vpop.f32.mrf.mxu1  ;;  %v196_v32 = vld [vmem:[%s1616_s17 + $0xc0] sm:$0xff]  ;;  %v197_v33 = vld [vmem:[%s1616_s17 + $0xc8] sm:$0xff] }
  0xc9   : > { %1253 = vmatpush.msra.mxu2 %v486_v34  ;;  %1273 = vmatpush.msra.mxu3 %v487_v35  ;;  %v616_v34 = vld [vmem:[%s1616_s17 + $0xde0] sm:$0xf]  ;;  %v617_v35 = vld [vmem:[%s1616_s17 + $0xde8] sm:$0xf] }
  0xca   : > { %1211 = vmatpush.msra.mxu0 %v548_v36  ;;  %1231 = vmatpush.msra.mxu1 %v549_v37  ;;  %v522_v36 = vld [vmem:[%s1616_s17 + $0xaf0] sm:$0xff]  ;;  %v523_v37 = vld [vmem:[%s1616_s17 + $0xaf8] sm:$0xff] }
  0xcb   : > { %1254 = vmatpush.msra.mxu2 %v454_v42  ;;  %1274 = vmatpush.msra.mxu3 %v455_v38  ;;  %v2055_v50 = vpop.permute.xlu0 %623  ;;  %v584_v42 = vld [vmem:[%s1616_s17 + $0xce0] sm:$0xff]  ;;  %v585_v38 = vld [vmem:[%s1616_s17 + $0xce8] sm:$0xff] }
  0xcc   : > { %1212 = vmatpush.msra.mxu0 %v516_v40  ;;  %1232 = vmatpush.msra.mxu1 %v517_v41  ;;  %v745_v53 = vadd.f32 %v744_v43, %v2055_v50  ;;  %v765_v54 = vadd.f32 %v764_v44, %v2055_v50  ;;  %v785_v55 = vadd.f32 %v784_v39, %v2055_v50  ;;  %v490_v39 = vld [vmem:[%s1616_s17 + $0x9f0] sm:$0xff]  ;;  %v491_v40 = vld [vmem:[%s1616_s17 + $0x9f8] sm:$0xff]  ;;  %v552_v41 = vld [vmem:[%s1616_s17 + $0xbe0] sm:$0xff] }
  0xcd   : > { %1255 = vmatpush.msra.mxu2 %v422_v45  ;;  %1275 = vmatpush.msra.mxu3 %v423_v46  ;;  %v805_v58 = vadd.f32 %v804_v47, %v2055_v50  ;;  %v553_v43 = vld [vmem:[%s1616_s17 + $0xbe8] sm:$0xff]  ;;  %v458_v44 = vld [vmem:[%s1616_s17 + $0x8f0] sm:$0xff]  ;;  %v459_v45 = vld [vmem:[%s1616_s17 + $0x8f8] sm:$0xff] }
  0xce   : > { %1213 = vmatpush.msra.mxu0 %v484_v48  ;;  %1233 = vmatpush.msra.mxu1 %v485_v49  ;;  %v1367_v61 = vmax.f32 %v745_v53, 0.0  ;;  %v1368_v62 = vmax.f32 %v765_v54, 0.0  ;;  %v1369_v63 = vmax.f32 %v785_v55, 0.0  ;;  %v520_v46 = vld [vmem:[%s1616_s17 + $0xae0] sm:$0xff]  ;;  %v521_v47 = vld [vmem:[%s1616_s17 + $0xae8] sm:$0xff] }
  0xcf   : > { %1256 = vmatpush.msra.mxu2 %v390_v51  ;;  %1276 = vmatpush.msra.mxu3 %v391_v52  ;;  %v1370_v2 = vmax.f32 %v805_v58, 0.0  ;;  %v426_v51 = vld [vmem:[%s1616_s17 + $0x7f0] sm:$0xff]  ;;  %v427_v52 = vld [vmem:[%s1616_s17 + $0x7f8] sm:$0xff]  ;;  %v489_v58 = vld [vmem:[%s1616_s17 + $0x9e8] sm:$0xff] }
  0xd0   : > { %1214 = vmatpush.msra.mxu0 %v452_v56  ;;  %1234 = vmatpush.msra.mxu1 %v453_v57  ;;  %1399 = vst [vmem:[%s2067_s25] sm:$0xff] %v1367_v61  ;;  %v488_v57 = vld [vmem:[%s1616_s17 + $0x9e0] sm:$0xff]  ;;  %v394_v61 = vld [vmem:[%s1616_s17 + $0x6f0] sm:$0xff] }
  0xd1   : > { %1257 = vmatpush.msra.mxu2 %v358_v59  ;;  %1277 = vmatpush.msra.mxu3 %v359_v60  ;;  %1400 = vst [vmem:[%s2067_s25 + $0x8] sm:$0xff] %v1368_v62  ;;  %v395_v62 = vld [vmem:[%s1616_s17 + $0x6f8] sm:$0xff] }
  0xd2   : > { %1215 = vmatpush.msra.mxu0 %v420_v0  ;;  %1235 = vmatpush.msra.mxu1 %v421_v1  ;;  %1401 = vst [vmem:[%s2067_s25 + $0x10] sm:$0xff] %v1369_v63  ;;  %v456_v0 = vld [vmem:[%s1616_s17 + $0x8e0] sm:$0xff]  ;;  %v457_v1 = vld [vmem:[%s1616_s17 + $0x8e8] sm:$0xff] }
  0xd3   : > { %1258 = vmatpush.msra.mxu2 %v326_v3  ;;  %1278 = vmatpush.msra.mxu3 %v327_v4  ;;  %1402 = vst [vmem:[%s2067_s25 + $0x18] sm:$0xff] %v1370_v2 }
  0xd4   : > { %1216 = vmatpush.msra.mxu0 %v388_v5  ;;  %1236 = vmatpush.msra.mxu1 %v389_v6  ;;  %v362_v5 = vld [vmem:[%s1616_s17 + $0x5f0] sm:$0xff]  ;;  %v363_v6 = vld [vmem:[%s1616_s17 + $0x5f8] sm:$0xff] }
  0xd5   : > { %1259 = vmatpush.msra.mxu2 %v294_v7  ;;  %1279 = vmatpush.msra.mxu3 %v295_v8  ;;  %v424_v7 = vld [vmem:[%s1616_s17 + $0x7e0] sm:$0xff]  ;;  %v425_v8 = vld [vmem:[%s1616_s17 + $0x7e8] sm:$0xff] }
  0xd6   : > { %1217 = vmatpush.msra.mxu0 %v356_v9  ;;  %1237 = vmatpush.msra.mxu1 %v357_v10  ;;  %v330_v9 = vld [vmem:[%s1616_s17 + $0x4f0] sm:$0xff]  ;;  %v331_v10 = vld [vmem:[%s1616_s17 + $0x4f8] sm:$0xff] }
  0xd7   : > { %1260 = vmatpush.msra.mxu2 %v262_v11  ;;  %1280 = vmatpush.msra.mxu3 %v263_v12  ;;  %v392_v11 = vld [vmem:[%s1616_s17 + $0x6e0] sm:$0xff]  ;;  %v393_v12 = vld [vmem:[%s1616_s17 + $0x6e8] sm:$0xff] }
  0xd8   : > { %1218 = vmatpush.msra.mxu0 %v324_v13  ;;  %1238 = vmatpush.msra.mxu1 %v325_v14  ;;  %v298_v13 = vld [vmem:[%s1616_s17 + $0x3f0] sm:$0xff]  ;;  %v299_v14 = vld [vmem:[%s1616_s17 + $0x3f8] sm:$0xff] }
  0xd9   : > { %1261 = vmatpush.msra.mxu2 %v230_v15  ;;  %1281 = vmatpush.msra.mxu3 %v231_v16  ;;  %v360_v15 = vld [vmem:[%s1616_s17 + $0x5e0] sm:$0xff]  ;;  %v361_v16 = vld [vmem:[%s1616_s17 + $0x5e8] sm:$0xff] }
  0xda   : > { %1219 = vmatpush.msra.mxu0 %v292_v17  ;;  %1239 = vmatpush.msra.mxu1 %v293_v18  ;;  %v266_v17 = vld [vmem:[%s1616_s17 + $0x2f0] sm:$0xff]  ;;  %v267_v18 = vld [vmem:[%s1616_s17 + $0x2f8] sm:$0xff] }
  0xdb   : > { %1262 = vmatpush.msra.mxu2 %v198_v19  ;;  %1282 = vmatpush.msra.mxu3 %v199_v20  ;;  %v328_v19 = vld [vmem:[%s1616_s17 + $0x4e0] sm:$0xff]  ;;  %v329_v20 = vld [vmem:[%s1616_s17 + $0x4e8] sm:$0xff] }
  0xdc   : > { %1539 = vmatmul.msk.f32.vlgmr.msrb.gmra.mxu2 %vm626_vm1, %v2103_v25  ;;  %1541 = vmatmul.msk.f32.vlgmr.msrb.gmra.mxu3 %vm626_vm1, %v2103_v25 }
  0xdd   : > { %1554 = vmatpush.msk.msrb.mxu2 %vm630_vm0, %v618_v21  ;;  %1556 = vmatpush.msk.msrb.mxu3 %vm630_vm0, %v619_v22  ;;  %v234_v21 = vld [vmem:[%s1616_s17 + $0x1f0] sm:$0xff]  ;;  %v235_v22 = vld [vmem:[%s1616_s17 + $0x1f8] sm:$0xff] }
  0xde   : > { %1220 = vmatpush.msra.mxu0 %v260_v23  ;;  %1240 = vmatpush.msra.mxu1 %v261_v24  ;;  %v296_v23 = vld [vmem:[%s1616_s17 + $0x3e0] sm:$0xff]  ;;  %v297_v24 = vld [vmem:[%s1616_s17 + $0x3e8] sm:$0xff] }
  0xdf   : > { %1330 = vmatpush.msrb.mxu2 %v586_v26  ;;  %1350 = vmatpush.msrb.mxu3 %v587_v27  ;;  %v202_v26 = vld [vmem:[%s1616_s17 + $0xf0] sm:$0xff]  ;;  %v203_v27 = vld [vmem:[%s1616_s17 + $0xf8] sm:$0xff] }
  0xe0   : > { %1221 = vmatpush.msra.mxu0 %v228_v28  ;;  %1241 = vmatpush.msra.mxu1 %v229_v29  ;;  %v264_v28 = vld [vmem:[%s1616_s17 + $0x2e0] sm:$0xff]  ;;  %v265_v29 = vld [vmem:[%s1616_s17 + $0x2e8] sm:$0xff] }
  0xe1   : > { %1331 = vmatpush.msrb.mxu2 %v554_v30  ;;  %1351 = vmatpush.msrb.mxu3 %v555_v31  ;;  %v232_v30 = vld [vmem:[%s1616_s17 + $0x1e0] sm:$0xff]  ;;  %v233_v31 = vld [vmem:[%s1616_s17 + $0x1e8] sm:$0xff] }
  0xe2   : > { %1222 = vmatpush.msra.mxu0 %v196_v32  ;;  %1242 = vmatpush.msra.mxu1 %v197_v33  ;;  %v200_v32 = vld [vmem:[%s1616_s17 + $0xe0] sm:$0xff]  ;;  %v201_v33 = vld [vmem:[%s1616_s17 + $0xe8] sm:$0xff] }
  0xe3   : > { %1535 = vmatmul.msk.f32.vlgmr.msrb.gmra.mxu0 %vm626_vm1, %v2103_v25  ;;  %1537 = vmatmul.msk.f32.vlgmr.msrb.gmra.mxu1 %vm626_vm1, %v2103_v25 }
  0xe4   : > { %1550 = vmatpush.msk.msrb.mxu0 %vm630_vm0, %v616_v34  ;;  %1552 = vmatpush.msk.msrb.mxu1 %vm630_vm0, %v617_v35 }
  0xe5   : > { %1332 = vmatpush.msrb.mxu2 %v522_v36  ;;  %1352 = vmatpush.msrb.mxu3 %v523_v37 }
  0xe6   : > { %1290 = vmatpush.msrb.mxu0 %v584_v42  ;;  %1310 = vmatpush.msrb.mxu1 %v585_v38 }
  0xe7   : > { %1333 = vmatpush.msrb.mxu2 %v490_v39  ;;  %1353 = vmatpush.msrb.mxu3 %v491_v40  ;;  %v864_v48 = vpop.f32.mrf.mxu2  ;;  %v884_v49 = vpop.f32.mrf.mxu3 }
  0xe8   : > { %1291 = vmatpush.msrb.mxu0 %v552_v41  ;;  %1311 = vmatpush.msrb.mxu1 %v553_v43  ;;  %v824_v53 = vpop.f32.mrf.mxu0  ;;  %v844_v54 = vpop.f32.mrf.mxu1  ;;  %v865_v55 = vadd.f32 %v864_v48, %v2055_v50  ;;  %v885_v56 = vadd.f32 %v884_v49, %v2055_v50 }
  0xe9   : > { %1334 = vmatpush.msrb.mxu2 %v458_v44  ;;  %1354 = vmatpush.msrb.mxu3 %v459_v45  ;;  %v825_v59 = vadd.f32 %v824_v53, %v2055_v50  ;;  %v845_v60 = vadd.f32 %v844_v54, %v2055_v50 }
  0xea   : > { %1292 = vmatpush.msrb.mxu0 %v520_v46  ;;  %1312 = vmatpush.msrb.mxu1 %v521_v47  ;;  %v1373_v63 = vmax.f32 %v865_v55, 0.0  ;;  %v1374_v4 = vmax.f32 %v885_v56, 0.0 }
  0xeb   : > { %1335 = vmatpush.msrb.mxu2 %v426_v51  ;;  %1355 = vmatpush.msrb.mxu3 %v427_v52  ;;  %v1371_v2 = vmax.f32 %v825_v59, 0.0  ;;  %v1372_v3 = vmax.f32 %v845_v60, 0.0 }
  0xec   : > { %1293 = vmatpush.msrb.mxu0 %v488_v57  ;;  %1313 = vmatpush.msrb.mxu1 %v489_v58  ;;  %1405 = vst [vmem:[%s2067_s25 + $0x30] sm:$0xff] %v1373_v63 }
  0xed   : > { %1336 = vmatpush.msrb.mxu2 %v394_v61  ;;  %1356 = vmatpush.msrb.mxu3 %v395_v62  ;;  %1403 = vst [vmem:[%s2067_s25 + $0x20] sm:$0xff] %v1371_v2 }
  0xee   : > { %1294 = vmatpush.msrb.mxu0 %v456_v0  ;;  %1314 = vmatpush.msrb.mxu1 %v457_v1  ;;  %1404 = vst [vmem:[%s2067_s25 + $0x28] sm:$0xff] %v1372_v3 }
  0xef   : > { %1337 = vmatpush.msrb.mxu2 %v362_v5  ;;  %1357 = vmatpush.msrb.mxu3 %v363_v6  ;;  %1406 = vst [vmem:[%s2067_s25 + $0x38] sm:$0xff] %v1374_v4 }
  0xf0   : > { %1295 = vmatpush.msrb.mxu0 %v424_v7  ;;  %1315 = vmatpush.msrb.mxu1 %v425_v8 }
  0xf1   : > { %1338 = vmatpush.msrb.mxu2 %v330_v9  ;;  %1358 = vmatpush.msrb.mxu3 %v331_v10 }
  0xf2   : > { %1547 = vmatmul.msk.f32.vlgmr.msra.gmra.mxu2 %vm626_vm1, %v2103_v25  ;;  %1549 = vmatmul.msk.f32.vlgmr.msra.gmra.mxu3 %vm626_vm1, %v2103_v25 }
  0xf3   : > { %1296 = vmatpush.msrb.mxu0 %v392_v11  ;;  %1316 = vmatpush.msrb.mxu1 %v393_v12 }
  0xf4   : > { %1339 = vmatpush.msrb.mxu2 %v298_v13  ;;  %1359 = vmatpush.msrb.mxu3 %v299_v14 }
  0xf5   : > { %1297 = vmatpush.msrb.mxu0 %v360_v15  ;;  %1317 = vmatpush.msrb.mxu1 %v361_v16 }
  0xf6   : > { %1340 = vmatpush.msrb.mxu2 %v266_v17  ;;  %1360 = vmatpush.msrb.mxu3 %v267_v18 }
  0xf7   : > { %1298 = vmatpush.msrb.mxu0 %v328_v19  ;;  %1318 = vmatpush.msrb.mxu1 %v329_v20 }
  0xf8   : > { %1341 = vmatpush.msrb.mxu2 %v234_v21  ;;  %1361 = vmatpush.msrb.mxu3 %v235_v22 }
  0xf9   : > { %1543 = vmatmul.msk.f32.vlgmr.msra.gmra.mxu0 %vm626_vm1, %v2103_v25  ;;  %1545 = vmatmul.msk.f32.vlgmr.msra.gmra.mxu1 %vm626_vm1, %v2103_v25 }
  0xfa   : > { %1299 = vmatpush.msrb.mxu0 %v296_v23  ;;  %1319 = vmatpush.msrb.mxu1 %v297_v24 }
  0xfb   : > { %1342 = vmatpush.msrb.mxu2 %v202_v26  ;;  %1362 = vmatpush.msrb.mxu3 %v203_v27 }
  0xfc   : > { %1555 = vmatmul.msk.f32.vlgmr.msrb.gmra.mxu2 %vm626_vm1, %v2103_v25  ;;  %1557 = vmatmul.msk.f32.vlgmr.msrb.gmra.mxu3 %vm626_vm1, %v2103_v25 }
  0xfd   : > { %1300 = vmatpush.msrb.mxu0 %v264_v28  ;;  %1320 = vmatpush.msrb.mxu1 %v265_v29 }
  0xff   : > { %1301 = vmatpush.msrb.mxu0 %v232_v30  ;;  %1321 = vmatpush.msrb.mxu1 %v233_v31 }
 0x101   : > { %1302 = vmatpush.msrb.mxu0 %v200_v32  ;;  %1322 = vmatpush.msrb.mxu1 %v201_v33 }
 0x102   : > { %1551 = vmatmul.msk.f32.vlgmr.msrb.gmra.mxu0 %vm626_vm1, %v2103_v25  ;;  %1553 = vmatmul.msk.f32.vlgmr.msrb.gmra.mxu1 %vm626_vm1, %v2103_v25 }
 0x105   : > { %v944_v34 = vpop.f32.mrf.mxu2  ;;  %v964_v35 = vpop.f32.mrf.mxu3 }
 0x106   : > { %v904_v36 = vpop.f32.mrf.mxu0  ;;  %v924_v37 = vpop.f32.mrf.mxu1  ;;  %v945_v42 = vadd.f32 %v944_v34, %v2055_v50  ;;  %v965_v38 = vadd.f32 %v964_v35, %v2055_v50 }
 0x107   : > { %v905_v39 = vadd.f32 %v904_v36, %v2055_v50  ;;  %v925_v40 = vadd.f32 %v924_v37, %v2055_v50 }
 0x108   : > { %v1377_v41 = vmax.f32 %v945_v42, 0.0  ;;  %v1378_v45 = vmax.f32 %v965_v38, 0.0 }
 0x109   : > { %v1375_v43 = vmax.f32 %v905_v39, 0.0  ;;  %v1376_v44 = vmax.f32 %v925_v40, 0.0 }
 0x10a   : > { %1409 = vst [vmem:[%s2067_s25 + $0x50] sm:$0xff] %v1377_v41 }
 0x10b   : > { %1407 = vst [vmem:[%s2067_s25 + $0x40] sm:$0xff] %v1375_v43 }
 0x10c   : > { %1408 = vst [vmem:[%s2067_s25 + $0x48] sm:$0xff] %v1376_v44 }
 0x10d   : > { %1410 = vst [vmem:[%s2067_s25 + $0x58] sm:$0xff] %v1378_v45 }
 0x123   : > { %v1024_v25 = vpop.f32.mrf.mxu2  ;;  %v1044_v46 = vpop.f32.mrf.mxu3 }
 0x124   : > { %v984_v47 = vpop.f32.mrf.mxu0  ;;  %v1004_v48 = vpop.f32.mrf.mxu1  ;;  %v1025_v49 = vadd.f32 %v1024_v25, %v2055_v50  ;;  %v1045_v51 = vadd.f32 %v1044_v46, %v2055_v50 }
 0x125   : > { %v985_v52 = vadd.f32 %v984_v47, %v2055_v50  ;;  %v1005_v53 = vadd.f32 %v1004_v48, %v2055_v50 }
 0x126   : > { %v1381_v54 = vmax.f32 %v1025_v49, 0.0  ;;  %v1382_v57 = vmax.f32 %v1045_v51, 0.0 }
 0x127   : > { %v1379_v55 = vmax.f32 %v985_v52, 0.0  ;;  %v1380_v56 = vmax.f32 %v1005_v53, 0.0 }
 0x128   : > { %1413 = vst [vmem:[%s2067_s25 + $0x70] sm:$0xff] %v1381_v54 }
 0x129   : > { %1411 = vst [vmem:[%s2067_s25 + $0x60] sm:$0xff] %v1379_v55 }
 0x12a   : > { %1412 = vst [vmem:[%s2067_s25 + $0x68] sm:$0xff] %v1380_v56 }
 0x12b   : > { %1414 = vst [vmem:[%s2067_s25 + $0x78] sm:$0xff] %v1382_v57 }
 0x141   : > { %v1104_v58 = vpop.f32.mrf.mxu2  ;;  %v1124_v59 = vpop.f32.mrf.mxu3 }
 0x142   : > { %v1064_v60 = vpop.f32.mrf.mxu0  ;;  %v1084_v61 = vpop.f32.mrf.mxu1  ;;  %v1105_v62 = vadd.f32 %v1104_v58, %v2055_v50  ;;  %v1125_v63 = vadd.f32 %v1124_v59, %v2055_v50 }
 0x143   : > { %v1065_v0 = vadd.f32 %v1064_v60, %v2055_v50  ;;  %v1085_v1 = vadd.f32 %v1084_v61, %v2055_v50 }
 0x144   : > { %v1385_v2 = vmax.f32 %v1105_v62, 0.0  ;;  %v1386_v5 = vmax.f32 %v1125_v63, 0.0 }
 0x145   : > { %v1383_v3 = vmax.f32 %v1065_v0, 0.0  ;;  %v1384_v4 = vmax.f32 %v1085_v1, 0.0 }
 0x146   : > { %1417 = vst [vmem:[%s2067_s25 + $0x90] sm:$0xff] %v1385_v2 }
 0x147   : > { %1415 = vst [vmem:[%s2067_s25 + $0x80] sm:$0xff] %v1383_v3 }
 0x148   : > { %1416 = vst [vmem:[%s2067_s25 + $0x88] sm:$0xff] %v1384_v4 }
 0x149   : > { %1418 = vst [vmem:[%s2067_s25 + $0x98] sm:$0xff] %v1386_v5 }
 0x15f   : > { %v1184_v6 = vpop.f32.mrf.mxu2  ;;  %v1204_v7 = vpop.f32.mrf.mxu3 }
 0x160   : > { %v1144_v8 = vpop.f32.mrf.mxu0  ;;  %v1164_v9 = vpop.f32.mrf.mxu1  ;;  %v1185_v10 = vadd.f32 %v1184_v6, %v2055_v50  ;;  %v1205_v11 = vadd.f32 %v1204_v7, %v2055_v50 }
 0x161   : > { %v1145_v12 = vadd.f32 %v1144_v8, %v2055_v50  ;;  %v1165_v13 = vadd.f32 %v1164_v9, %v2055_v50 }
 0x162   : > { %v1389_v14 = vmax.f32 %v1185_v10, 0.0  ;;  %v1390_v17 = vmax.f32 %v1205_v11, 0.0 }
 0x163   : > { %v1387_v15 = vmax.f32 %v1145_v12, 0.0  ;;  %v1388_v16 = vmax.f32 %v1165_v13, 0.0 }
 0x164   : > { %1421 = vst [vmem:[%s2067_s25 + $0xb0] sm:$0xff] %v1389_v14 }
 0x165   : > { %1419 = vst [vmem:[%s2067_s25 + $0xa0] sm:$0xff] %v1387_v15 }
 0x166   : > { %1420 = vst [vmem:[%s2067_s25 + $0xa8] sm:$0xff] %v1388_v16 }
 0x167   : > { %1422 = vst [vmem:[%s2067_s25 + $0xb8] sm:$0xff] %v1390_v17 }
 0x175   : > { %v1264_v18 = vpop.f32.mrf.mxu2  ;;  %v1284_v19 = vpop.f32.mrf.mxu3 }
 0x176   : > { %v1224_v20 = vpop.f32.mrf.mxu0  ;;  %v1244_v21 = vpop.f32.mrf.mxu1  ;;  %v1265_v22 = vadd.f32 %v1264_v18, %v2055_v50  ;;  %v1285_v23 = vadd.f32 %v1284_v19, %v2055_v50 }
 0x177   : > { %v1225_v24 = vadd.f32 %v1224_v20, %v2055_v50  ;;  %v1245_v26 = vadd.f32 %v1244_v21, %v2055_v50 }
 0x178   : > { %v1393_v27 = vmax.f32 %v1265_v22, 0.0  ;;  %v1394_v30 = vmax.f32 %v1285_v23, 0.0 }
 0x179   : > { %v1391_v28 = vmax.f32 %v1225_v24, 0.0  ;;  %v1392_v29 = vmax.f32 %v1245_v26, 0.0 }
 0x17a   : > { %1425 = vst [vmem:[%s2067_s25 + $0xd0] sm:$0xff] %v1393_v27 }
 0x17b   : > { %1423 = vst [vmem:[%s2067_s25 + $0xc0] sm:$0xff] %v1391_v28 }
 0x17c   : > { %1424 = vst [vmem:[%s2067_s25 + $0xc8] sm:$0xff] %v1392_v29 }
 0x17d   : > { %1426 = vst [vmem:[%s2067_s25 + $0xd8] sm:$0xff] %v1394_v30 }
 0x17f   : > { %v1304_v31 = vpop.f32.mrf.mxu0  ;;  %v1324_v32 = vpop.f32.mrf.mxu1 }
 0x180   : > { %v1305_v33 = vadd.f32 %v1304_v31, %v2055_v50  ;;  %v1325_v34 = vadd.f32 %v1324_v32, %v2055_v50  ;;  %v1344_v35 = vpop.f32.mrf.mxu2  ;;  %v1364_v36 = vpop.f32.mrf.mxu3 }
 0x181   : > { %v1345_v37 = vadd.f32 %v1344_v35, %v2055_v50  ;;  %v1365_v42 = vadd.f32 %v1364_v36, %v2055_v50 }
 0x182   : > { %v1395_v38 = vmax.f32 %v1305_v33, 0.0  ;;  %v1396_v39 = vmax.f32 %v1325_v34, 0.0 }
 0x183   : > { %v1397_v40 = vmax.f32 %v1345_v37, 0.0  ;;  %v1398_v41 = vmax.f32 %v1365_v42, 0.0 }
 0x184   : > { %1427 = vst [vmem:[%s2067_s25 + $0xe0] sm:$0xff] %v1395_v38 }
 0x185   : > { %1428 = vst [vmem:[%s2067_s25 + $0xe8] sm:$0xff] %v1396_v39 }
 0x186   : > { %1429 = vst [vmem:[%s2067_s25 + $0xf0] sm:$0xff] %v1397_v40 }
 0x187   : > { %1430 = vst [vmem:[%s2067_s25 + $0xf8] sm:$0xff] %v1398_v41 }
 0x188 PF: > { %s13_s12 = sadd.s32 1, %s1579_s12  }
 0x189   : > { %p10_p4 = scmp.ge.s32.totalorder %s13_s12, 4  }
 0x18b   :  { %12 = sbr.rel (!%p10_p4) target bundleno = 1 (0x1), region = 62 }

// kernel: conv_block.3
= control target key start
LH: loop header
LB: loop body
LE: loop exit
PB: predicated region body
PF: predicated region fallthrough
CT: control target
= control target key end

     0   :  { %s2534_s12 = smov 0   ;;  %s3619_s0 = inlined_call_operand.vmem [shape: f32[2,216,4096], index: 0, kind: input, shape index: {}]   ;;  %s3620_s1 = inlined_call_operand.vmem [shape: f32[8,216], index: 1, kind: input, shape index: {}]   ;;  %s3621_s2 = inlined_call_operand.vmem [shape: f32[8,1], index: 2, kind: input, shape index: {}]   ;;  %s3622_s3 = inlined_call_operand.vmem [shape: f32[2,8,4096], index: 3, kind: output, shape index: {}]  }
   0x1 LB: > { %s2446_s13 = sadd.s32 4294967295, %s2511_s12   ;;  %p2450_p0 = scmp.ge.s32.totalorder %s2511_s12, 1  ;;  %s2511_s12 = sphi %s2534_s12, %s13_s12  }
   0x2   : > { %p137_p1 = scmp.lt.s32.totalorder %s2511_s12, 3 }
   0x4   : > { %p138_p2 = pnand %p2450_p0, %p137_p1 }
   0x5   : > { %p161_p3 = scmp.lt.s32.totalorder (!%p138_p2), %s2446_s13, 1 }
   0x6   : > { %141 = sbr.rel (%p138_p2) target bundleno = 616 (0x268), region = 32 }
   0xb   : > { %s3624_s13 = smov (!%p161_p3, %s2446_s13), 1  ;;  %vm1043_vm0 = vcmask 719872  }
   0xc   : > { %s2489_s14 = smul.u32 6912, %s3624_s13  ;;  %s2488_s24 = sshll.u32 %s3624_s13, 8 }
   0xd   : > { %s2959_s27 = scalar_lea.vmem %s3622_s3, %s2488_s24 }
   0xe   : > { %s2548_s17 = scalar_lea.vmem %s3619_s0, %s2489_s14 }
   0xf   : > { %v653_v0 = vld [vmem:[%s2548_s17 + $0xf00] sm:$0xff]  ;;  %v654_v2 = vld [vmem:[%s2548_s17 + $0xf08] sm:$0xff]  ;;  %v655_v43 = vld [vmem:[%s2548_s17 + $0xf10] sm:$0xff] }
  0x10   : > { %v621_v1 = vld [vmem:[%s2548_s17 + $0xe00] sm:$0xff]  ;;  %1047 = vmatpush.msra.mxu0 %v653_v0  ;;  %1087 = vmatpush.msra.mxu2 %v654_v2  ;;  %v622_v4 = vld [vmem:[%s2548_s17 + $0xe08] sm:$0xff]  ;;  %v623_v47 = vld [vmem:[%s2548_s17 + $0xe10] sm:$0xff] }
  0x11   : > { %v589_v3 = vld [vmem:[%s2548_s17 + $0xd00] sm:$0xff]  ;;  %v590_v6 = vld [vmem:[%s2548_s17 + $0xd08] sm:$0xff]  ;;  %v591_v51 = vld [vmem:[%s2548_s17 + $0xd10] sm:$0xff] }
  0x12   : > { %v1005_v5 = vld [vmem:[%s2548_s17 + $0x1a00] sm:$0xff]  ;;  %1048 = vmatpush.msra.mxu0 %v621_v1  ;;  %1088 = vmatpush.msra.mxu2 %v622_v4  ;;  %v558_v10 = vld [vmem:[%s2548_s17 + $0xc08] sm:$0xff]  ;;  %v559_v55 = vld [vmem:[%s2548_s17 + $0xc10] sm:$0xff] }
  0x13   : > { %1072 = vmatpush.msra.mxu1 %v1005_v5  ;;  %v973_v7 = vld [vmem:[%s2548_s17 + $0x1900] sm:$0xff]  ;;  %v1006_v13 = vld [vmem:[%s2548_s17 + $0x1a08] sm:$0xff]  ;;  %v1007_v57 = vld [vmem:[%s2548_s17 + $0x1a10] sm:$0xff] }
  0x14   : > { %v557_v8 = vld [vmem:[%s2548_s17 + $0xc00] sm:$0xff]  ;;  %1049 = vmatpush.msra.mxu0 %v589_v3  ;;  %1089 = vmatpush.msra.mxu2 %v590_v6  ;;  %v526_v14 = vld [vmem:[%s2548_s17 + $0xb08] sm:$0xff]  ;;  %v656_v58 = vld [vmem:[%s2548_s17 + $0xf18] sm:$0xff] }
  0x15   : > { %v941_v9 = vld [vmem:[%s2548_s17 + $0x1800] sm:$0xff]  ;;  %1073 = vmatpush.msra.mxu1 %v973_v7  ;;  %v974_v15 = vld [vmem:[%s2548_s17 + $0x1908] sm:$0xff]  ;;  %1112 = vmatpush.msra.mxu3 %v1006_v13  ;;  %v1008_v60 = vld [vmem:[%s2548_s17 + $0x1a18] sm:$0xff] }
  0x16   : > { %v525_v11 = vld [vmem:[%s2548_s17 + $0xb00] sm:$0xff]  ;;  %1050 = vmatpush.msra.mxu0 %v557_v8  ;;  %1090 = vmatpush.msra.mxu2 %v558_v10  ;;  %v494_v18 = vld [vmem:[%s2548_s17 + $0xa08] sm:$0xff]  ;;  %v527_v61 = vld [vmem:[%s2548_s17 + $0xb10] sm:$0xff] }
  0x17   : > { %v909_v12 = vld [vmem:[%s2548_s17 + $0x1700] sm:$0xff]  ;;  %1074 = vmatpush.msra.mxu1 %v941_v9  ;;  %v942_v19 = vld [vmem:[%s2548_s17 + $0x1808] sm:$0xff]  ;;  %1113 = vmatpush.msra.mxu3 %v974_v15  ;;  %v624_v62 = vld [vmem:[%s2548_s17 + $0xe18] sm:$0xff] }
  0x18   : > { %v493_v16 = vld [vmem:[%s2548_s17 + $0xa00] sm:$0xff]  ;;  %1051 = vmatpush.msra.mxu0 %v525_v11  ;;  %1091 = vmatpush.msra.mxu2 %v526_v14  ;;  %v462_v22 = vld [vmem:[%s2548_s17 + $0x908] sm:$0xff]  ;;  %v975_v63 = vld [vmem:[%s2548_s17 + $0x1910] sm:$0xff] }
  0x19   : > { %v877_v17 = vld [vmem:[%s2548_s17 + $0x1600] sm:$0xff]  ;;  %1075 = vmatpush.msra.mxu1 %v909_v12  ;;  %v910_v23 = vld [vmem:[%s2548_s17 + $0x1708] sm:$0xff]  ;;  %1114 = vmatpush.msra.mxu3 %v942_v19  ;;  %v976_v0 = vld [vmem:[%s2548_s17 + $0x1918] sm:$0xff] }
  0x1a   : > { %v461_v20 = vld [vmem:[%s2548_s17 + $0x900] sm:$0xff]  ;;  %1052 = vmatpush.msra.mxu0 %v493_v16  ;;  %1092 = vmatpush.msra.mxu2 %v494_v18  ;;  %v430_v26 = vld [vmem:[%s2548_s17 + $0x808] sm:$0xff]  ;;  %v495_v1 = vld [vmem:[%s2548_s17 + $0xa10] sm:$0xff] }
  0x1b   : > { %v845_v21 = vld [vmem:[%s2548_s17 + $0x1500] sm:$0xff]  ;;  %1076 = vmatpush.msra.mxu1 %v877_v17  ;;  %v878_v27 = vld [vmem:[%s2548_s17 + $0x1608] sm:$0xff]  ;;  %1115 = vmatpush.msra.mxu3 %v910_v23  ;;  %v592_v2 = vld [vmem:[%s2548_s17 + $0xd18] sm:$0xff] }
  0x1c   : > { %v429_v24 = vld [vmem:[%s2548_s17 + $0x800] sm:$0xff]  ;;  %1053 = vmatpush.msra.mxu0 %v461_v20  ;;  %1093 = vmatpush.msra.mxu2 %v462_v22  ;;  %v398_v30 = vld [vmem:[%s2548_s17 + $0x708] sm:$0xff]  ;;  %v943_v3 = vld [vmem:[%s2548_s17 + $0x1810] sm:$0xff] }
  0x1d   : > { %v813_v25 = vld [vmem:[%s2548_s17 + $0x1400] sm:$0xff]  ;;  %1077 = vmatpush.msra.mxu1 %v845_v21  ;;  %v846_v31 = vld [vmem:[%s2548_s17 + $0x1508] sm:$0xff]  ;;  %1116 = vmatpush.msra.mxu3 %v878_v27  ;;  %v944_v4 = vld [vmem:[%s2548_s17 + $0x1818] sm:$0xff] }
  0x1e   : > { %v397_v28 = vld [vmem:[%s2548_s17 + $0x700] sm:$0xff]  ;;  %1054 = vmatpush.msra.mxu0 %v429_v24  ;;  %1094 = vmatpush.msra.mxu2 %v430_v26  ;;  %v366_v34 = vld [vmem:[%s2548_s17 + $0x608] sm:$0xff]  ;;  %v463_v5 = vld [vmem:[%s2548_s17 + $0x910] sm:$0xff] }
  0x1f   : > { %v781_v29 = vld [vmem:[%s2548_s17 + $0x1300] sm:$0xff]  ;;  %1078 = vmatpush.msra.mxu1 %v813_v25  ;;  %v814_v35 = vld [vmem:[%s2548_s17 + $0x1408] sm:$0xff]  ;;  %1117 = vmatpush.msra.mxu3 %v846_v31  ;;  %v560_v6 = vld [vmem:[%s2548_s17 + $0xc18] sm:$0xff] }
  0x20   : > { %v365_v32 = vld [vmem:[%s2548_s17 + $0x600] sm:$0xff]  ;;  %1055 = vmatpush.msra.mxu0 %v397_v28  ;;  %1095 = vmatpush.msra.mxu2 %v398_v30  ;;  %v334_v38 = vld [vmem:[%s2548_s17 + $0x508] sm:$0xff]  ;;  %v911_v7 = vld [vmem:[%s2548_s17 + $0x1710] sm:$0xff] }
  0x21   : > { %v749_v33 = vld [vmem:[%s2548_s17 + $0x1200] sm:$0xff]  ;;  %1079 = vmatpush.msra.mxu1 %v781_v29  ;;  %v782_v39 = vld [vmem:[%s2548_s17 + $0x1308] sm:$0xff]  ;;  %1118 = vmatpush.msra.mxu3 %v814_v35  ;;  %v912_v8 = vld [vmem:[%s2548_s17 + $0x1718] sm:$0xff] }
  0x22   : > { %v333_v36 = vld [vmem:[%s2548_s17 + $0x500] sm:$0xff]  ;;  %1056 = vmatpush.msra.mxu0 %v365_v32  ;;  %1096 = vmatpush.msra.mxu2 %v366_v34  ;;  %v302_v42 = vld [vmem:[%s2548_s17 + $0x408] sm:$0xff]  ;;  %v431_v9 = vld [vmem:[%s2548_s17 + $0x810] sm:$0xff] }
  0x23   : > { %v717_v37 = vld [vmem:[%s2548_s17 + $0x1100] sm:$0xff]  ;;  %1080 = vmatpush.msra.mxu1 %v749_v33  ;;  %1119 = vmatpush.msra.mxu3 %v782_v39  ;;  %v750_v45 = vld [vmem:[%s2548_s17 + $0x1208] sm:$0xff]  ;;  %v528_v10 = vld [vmem:[%s2548_s17 + $0xb18] sm:$0xff] }
  0x24   : > { %v301_v40 = vld [vmem:[%s2548_s17 + $0x400] sm:$0xff]  ;;  %1057 = vmatpush.msra.mxu0 %v333_v36  ;;  %1097 = vmatpush.msra.mxu2 %v334_v38  ;;  %v270_v46 = vld [vmem:[%s2548_s17 + $0x308] sm:$0xff]  ;;  %v879_v11 = vld [vmem:[%s2548_s17 + $0x1610] sm:$0xff] }
  0x25   : > { %v685_v41 = vld [vmem:[%s2548_s17 + $0x1000] sm:$0xff]  ;;  %1081 = vmatpush.msra.mxu1 %v717_v37  ;;  %v718_v49 = vld [vmem:[%s2548_s17 + $0x1108] sm:$0xff]  ;;  %1120 = vmatpush.msra.mxu3 %v750_v45  ;;  %v880_v12 = vld [vmem:[%s2548_s17 + $0x1618] sm:$0xff] }
  0x26   : > { %v269_v44 = vld [vmem:[%s2548_s17 + $0x300] sm:$0xff]  ;;  %1058 = vmatpush.msra.mxu0 %v301_v40  ;;  %1098 = vmatpush.msra.mxu2 %v302_v42  ;;  %v238_v50 = vld [vmem:[%s2548_s17 + $0x208] sm:$0xff]  ;;  %v399_v13 = vld [vmem:[%s2548_s17 + $0x710] sm:$0xff] }
  0x27   : > { %1082 = vmatpush.msra.mxu1 %v685_v41  ;;  %v237_v48 = vld [vmem:[%s2548_s17 + $0x200] sm:$0xff]  ;;  %v686_v53 = vld [vmem:[%s2548_s17 + $0x1008] sm:$0xff]  ;;  %1121 = vmatpush.msra.mxu3 %v718_v49  ;;  %v496_v14 = vld [vmem:[%s2548_s17 + $0xa18] sm:$0xff] }
  0x28   : > { %1059 = vmatpush.msra.mxu0 %v269_v44  ;;  %v205_v52 = vld [vmem:[%s2548_s17 + $0x100] sm:$0xff]  ;;  %1099 = vmatpush.msra.mxu2 %v270_v46  ;;  %v206_v54 = vld [vmem:[%s2548_s17 + $0x108] sm:$0xff]  ;;  %v847_v15 = vld [vmem:[%s2548_s17 + $0x1510] sm:$0xff] }
  0x29   : > { %1127 = vmatpush.msrb.mxu1 %v655_v43  ;;  %v173_v56 = vld [vmem:[%s2548_s17] sm:$0xff]  ;;  %v174_v59 = vld [vmem:[%s2548_s17 + $0x8] sm:$0xff]  ;;  %1122 = vmatpush.msra.mxu3 %v686_v53  ;;  %v848_v16 = vld [vmem:[%s2548_s17 + $0x1518] sm:$0xff] }
  0x2a   : > { %1060 = vmatpush.msra.mxu0 %v237_v48  ;;  %1100 = vmatpush.msra.mxu2 %v238_v50  ;;  %v367_v17 = vld [vmem:[%s2548_s17 + $0x610] sm:$0xff]  ;;  %v464_v18 = vld [vmem:[%s2548_s17 + $0x918] sm:$0xff]  ;;  %v2652_v35 = vld [vmem:[%s3620_s1] sm:$0xff] }
  0x2b   : > { %1128 = vmatpush.msrb.mxu1 %v623_v47  ;;  %1152 = vmatpush.msrb.mxu3 %v1007_v57  ;;  %v815_v19 = vld [vmem:[%s2548_s17 + $0x1410] sm:$0xff]  ;;  %v816_v20 = vld [vmem:[%s2548_s17 + $0x1418] sm:$0xff]  ;;  %v2660_v39 = vld [vmem:[%s3620_s1 + $0x8] sm:$0xff] }
  0x2c   : > { %1061 = vmatpush.msra.mxu0 %v205_v52  ;;  %1101 = vmatpush.msra.mxu2 %v206_v54  ;;  %v335_v21 = vld [vmem:[%s2548_s17 + $0x510] sm:$0xff]  ;;  %v432_v22 = vld [vmem:[%s2548_s17 + $0x818] sm:$0xff]  ;;  %v657_v40 = vld [vmem:[%s2548_s17 + $0xf20] sm:$0xff] }
  0x2d   : > { %1129 = vmatpush.msrb.mxu1 %v591_v51  ;;  %1153 = vmatpush.msrb.mxu3 %v975_v63  ;;  %v783_v23 = vld [vmem:[%s2548_s17 + $0x1310] sm:$0xff]  ;;  %v784_v24 = vld [vmem:[%s2548_s17 + $0x1318] sm:$0xff]  ;;  %v658_v41 = vld [vmem:[%s2548_s17 + $0xf28] sm:$0xff] }
  0x2e   : > { %1062 = vmatpush.msra.mxu0 %v173_v56  ;;  %1102 = vmatpush.msra.mxu2 %v174_v59  ;;  %v303_v25 = vld [vmem:[%s2548_s17 + $0x410] sm:$0xff]  ;;  %v400_v26 = vld [vmem:[%s2548_s17 + $0x718] sm:$0xff]  ;;  %v625_v44 = vld [vmem:[%s2548_s17 + $0xe20] sm:$0xff] }
  0x2f   : > { %1130 = vmatpush.msrb.mxu1 %v559_v55  ;;  %1154 = vmatpush.msrb.mxu3 %v943_v3  ;;  %v751_v27 = vld [vmem:[%s2548_s17 + $0x1210] sm:$0xff]  ;;  %v752_v28 = vld [vmem:[%s2548_s17 + $0x1218] sm:$0xff]  ;;  %v626_v46 = vld [vmem:[%s2548_s17 + $0xe28] sm:$0xff] }
  0x30   : > { %1167 = vmatpush.msrb.mxu0 %v656_v58  ;;  %1192 = vmatpush.msrb.mxu2 %v1008_v60  ;;  %v271_v29 = vld [vmem:[%s2548_s17 + $0x310] sm:$0xff]  ;;  %v368_v30 = vld [vmem:[%s2548_s17 + $0x618] sm:$0xff]  ;;  %v593_v48 = vld [vmem:[%s2548_s17 + $0xd20] sm:$0xff] }
  0x31   : > { %1131 = vmatpush.msrb.mxu1 %v527_v61  ;;  %1155 = vmatpush.msrb.mxu3 %v911_v7  ;;  %v719_v31 = vld [vmem:[%s2548_s17 + $0x1110] sm:$0xff]  ;;  %v720_v32 = vld [vmem:[%s2548_s17 + $0x1118] sm:$0xff]  ;;  %v1009_v50 = vld [vmem:[%s2548_s17 + $0x1a20] sm:$0xff] }
  0x32   : > { %1168 = vmatpush.msrb.mxu0 %v624_v62  ;;  %1193 = vmatpush.msrb.mxu2 %v976_v0  ;;  %v239_v33 = vld [vmem:[%s2548_s17 + $0x210] sm:$0xff]  ;;  %v336_v34 = vld [vmem:[%s2548_s17 + $0x518] sm:$0xff]  ;;  %v594_v51 = vld [vmem:[%s2548_s17 + $0xd28] sm:$0xff] }
  0x33   : > { %1132 = vmatpush.msrb.mxu1 %v495_v1  ;;  %1156 = vmatpush.msrb.mxu3 %v879_v11  ;;  %v687_v36 = vld [vmem:[%s2548_s17 + $0x1010] sm:$0xff]  ;;  %v688_v37 = vld [vmem:[%s2548_s17 + $0x1018] sm:$0xff]  ;;  %v561_v53 = vld [vmem:[%s2548_s17 + $0xc20] sm:$0xff] }
  0x34   : > { %1169 = vmatpush.msrb.mxu0 %v592_v2  ;;  %1194 = vmatpush.msrb.mxu2 %v944_v4  ;;  %v304_v38 = vld [vmem:[%s2548_s17 + $0x418] sm:$0xff]  ;;  %v207_v43 = vld [vmem:[%s2548_s17 + $0x110] sm:$0xff]  ;;  %v1010_v54 = vld [vmem:[%s2548_s17 + $0x1a28] sm:$0xff] }
  0x35   : > { %1133 = vmatpush.msrb.mxu1 %v463_v5  ;;  %1157 = vmatpush.msrb.mxu3 %v847_v15  ;;  %v272_v42 = vld [vmem:[%s2548_s17 + $0x318] sm:$0xff]  ;;  %v175_v47 = vld [vmem:[%s2548_s17 + $0x10] sm:$0xff]  ;;  %v977_v55 = vld [vmem:[%s2548_s17 + $0x1920] sm:$0xff]  ;;  %v2513_v5 = vmov 0  }
  0x36   : > { %1170 = vmatpush.msrb.mxu0 %v560_v6  ;;  %1195 = vmatpush.msrb.mxu2 %v912_v8  ;;  %v240_v45 = vld [vmem:[%s2548_s17 + $0x218] sm:$0xff]  ;;  %v562_v56 = vld [vmem:[%s2548_s17 + $0xc28] sm:$0xff]  ;;  %v529_v57 = vld [vmem:[%s2548_s17 + $0xb20] sm:$0xff] }
  0x37   : > { %1134 = vmatpush.msrb.mxu1 %v431_v9  ;;  %1158 = vmatpush.msrb.mxu3 %v815_v19  ;;  %v208_v49 = vld [vmem:[%s2548_s17 + $0x118] sm:$0xff]  ;;  %v978_v58 = vld [vmem:[%s2548_s17 + $0x1928] sm:$0xff]  ;;  %v945_v59 = vld [vmem:[%s2548_s17 + $0x1820] sm:$0xff] }
  0x38   : > { %1171 = vmatpush.msrb.mxu0 %v528_v10  ;;  %1196 = vmatpush.msrb.mxu2 %v880_v12  ;;  %v176_v52 = vld [vmem:[%s2548_s17 + $0x18] sm:$0xff]  ;;  %v530_v60 = vld [vmem:[%s2548_s17 + $0xb28] sm:$0xff]  ;;  %v497_v61 = vld [vmem:[%s2548_s17 + $0xa20] sm:$0xff] }
  0x39   : > { %1135 = vmatpush.msrb.mxu1 %v399_v13  ;;  %1159 = vmatpush.msrb.mxu3 %v783_v23  ;;  %v946_v62 = vld [vmem:[%s2548_s17 + $0x1828] sm:$0xff]  ;;  %v913_v63 = vld [vmem:[%s2548_s17 + $0x1720] sm:$0xff] }
  0x3a   : > { %1172 = vmatpush.msrb.mxu0 %v496_v14  ;;  %1197 = vmatpush.msrb.mxu2 %v848_v16  ;;  %v498_v0 = vld [vmem:[%s2548_s17 + $0xa28] sm:$0xff]  ;;  %v465_v2 = vld [vmem:[%s2548_s17 + $0x920] sm:$0xff] }
  0x3b   : > { %1136 = vmatpush.msrb.mxu1 %v367_v17  ;;  %1160 = vmatpush.msrb.mxu3 %v751_v27  ;;  %v914_v1 = vld [vmem:[%s2548_s17 + $0x1728] sm:$0xff]  ;;  %v881_v3 = vld [vmem:[%s2548_s17 + $0x1620] sm:$0xff] }
  0x3c   : > { %1173 = vmatpush.msrb.mxu0 %v464_v18  ;;  %1198 = vmatpush.msrb.mxu2 %v816_v20  ;;  %v466_v4 = vld [vmem:[%s2548_s17 + $0x928] sm:$0xff]  ;;  %v1037_v7 = vld [vmem:[%s3621_s2] sm:$0xff] }
  0x3d   : > { %1137 = vmatpush.msrb.mxu1 %v335_v21  ;;  %1161 = vmatpush.msrb.mxu3 %v719_v31  ;;  %v882_v6 = vld [vmem:[%s2548_s17 + $0x1628] sm:$0xff]  ;;  %v433_v8 = vld [vmem:[%s2548_s17 + $0x820] sm:$0xff] }
  0x3e   : > { %1174 = vmatpush.msrb.mxu0 %v432_v22  ;;  %1199 = vmatpush.msrb.mxu2 %v784_v24  ;;  %v849_v9 = vld [vmem:[%s2548_s17 + $0x1520] sm:$0xff]  ;;  %v434_v10 = vld [vmem:[%s2548_s17 + $0x828] sm:$0xff] }
  0x3f   : > { %1138 = vmatpush.msrb.mxu1 %v303_v25  ;;  %1103 = vmatmul.f32.vlgmr.msra.gmra.mxu2 %v2652_v35  ;;  %v850_v11 = vld [vmem:[%s2548_s17 + $0x1528] sm:$0xff]  ;;  %v401_v12 = vld [vmem:[%s2548_s17 + $0x720] sm:$0xff] }
  0x40   : > { %1175 = vmatpush.msrb.mxu0 %v400_v26  ;;  %1200 = vmatpush.msrb.mxu2 %v752_v28  ;;  %v817_v13 = vld [vmem:[%s2548_s17 + $0x1420] sm:$0xff]  ;;  %v402_v14 = vld [vmem:[%s2548_s17 + $0x728] sm:$0xff] }
  0x41   : > { %1139 = vmatpush.msrb.mxu1 %v271_v29  ;;  %1162 = vmatpush.msrb.mxu3 %v687_v36  ;;  %v818_v15 = vld [vmem:[%s2548_s17 + $0x1428] sm:$0xff]  ;;  %v369_v16 = vld [vmem:[%s2548_s17 + $0x620] sm:$0xff] }
  0x42   : > { %1176 = vmatpush.msrb.mxu0 %v368_v30  ;;  %1201 = vmatpush.msrb.mxu2 %v720_v32  ;;  %v785_v17 = vld [vmem:[%s2548_s17 + $0x1320] sm:$0xff]  ;;  %v370_v18 = vld [vmem:[%s2548_s17 + $0x628] sm:$0xff]  ;;  %v659_v32 = vld [vmem:[%s2548_s17 + $0xf30] sm:$0xff] }
  0x43   : > { %1140 = vmatpush.msrb.mxu1 %v239_v33  ;;  %2455 = vmatmul.msk.f32.vlgmr.msra.gmra.mxu3 %vm1043_vm0, %v2660_v39  ;;  %v786_v19 = vld [vmem:[%s2548_s17 + $0x1328] sm:$0xff]  ;;  %v337_v20 = vld [vmem:[%s2548_s17 + $0x520] sm:$0xff]  ;;  %v660_v33 = vld [vmem:[%s2548_s17 + $0xf38] sm:$0xff] }
  0x44   : > { %1177 = vmatpush.msrb.mxu0 %v336_v34  ;;  %1202 = vmatpush.msrb.mxu2 %v688_v37  ;;  %v753_v21 = vld [vmem:[%s2548_s17 + $0x1220] sm:$0xff]  ;;  %v338_v22 = vld [vmem:[%s2548_s17 + $0x528] sm:$0xff]  ;;  %v627_v37 = vld [vmem:[%s2548_s17 + $0xe30] sm:$0xff] }
  0x45   : > { %1207 = vmatpush.msra.mxu3 %v657_v40  ;;  %1141 = vmatpush.msrb.mxu1 %v207_v43  ;;  %v754_v23 = vld [vmem:[%s2548_s17 + $0x1228] sm:$0xff]  ;;  %v305_v24 = vld [vmem:[%s2548_s17 + $0x420] sm:$0xff]  ;;  %v596_v43 = vld [vmem:[%s2548_s17 + $0xd38] sm:$0xff] }
  0x46   : > { %1178 = vmatpush.msrb.mxu0 %v304_v38  ;;  %1247 = vmatpush.msra.mxu2 %v658_v41  ;;  %v721_v25 = vld [vmem:[%s2548_s17 + $0x1120] sm:$0xff]  ;;  %v306_v26 = vld [vmem:[%s2548_s17 + $0x428] sm:$0xff]  ;;  %v628_v38 = vld [vmem:[%s2548_s17 + $0xe38] sm:$0xff] }
  0x47   : > { %1063 = vmatmul.f32.vlgmr.msra.gmra.mxu0 %v2652_v35  ;;  %1208 = vmatpush.msra.mxu3 %v625_v44  ;;  %v722_v27 = vld [vmem:[%s2548_s17 + $0x1128] sm:$0xff]  ;;  %v273_v28 = vld [vmem:[%s2548_s17 + $0x320] sm:$0xff] }
  0x48   : > { %1179 = vmatpush.msrb.mxu0 %v272_v42  ;;  %1248 = vmatpush.msra.mxu2 %v626_v46  ;;  %v689_v29 = vld [vmem:[%s2548_s17 + $0x1020] sm:$0xff]  ;;  %v274_v30 = vld [vmem:[%s2548_s17 + $0x328] sm:$0xff]  ;;  %v595_v42 = vld [vmem:[%s2548_s17 + $0xd30] sm:$0xff] }
  0x49   : > { %1142 = vmatpush.msrb.mxu1 %v175_v47  ;;  %1209 = vmatpush.msra.mxu3 %v593_v48  ;;  %v690_v31 = vld [vmem:[%s2548_s17 + $0x1028] sm:$0xff]  ;;  %v241_v34 = vld [vmem:[%s2548_s17 + $0x220] sm:$0xff]  ;;  %v563_v46 = vld [vmem:[%s2548_s17 + $0xc30] sm:$0xff] }
  0x4a   : > { %1180 = vmatpush.msrb.mxu0 %v240_v45  ;;  %2454 = vmatmul.msk.f32.vlgmr.msra.gmra.mxu1 %vm1043_vm0, %v2660_v39  ;;  %v242_v36 = vld [vmem:[%s2548_s17 + $0x228] sm:$0xff]  ;;  %v209_v40 = vld [vmem:[%s2548_s17 + $0x120] sm:$0xff]  ;;  %v1011_v47 = vld [vmem:[%s2548_s17 + $0x1a30] sm:$0xff] }
  0x4b   : > { %1232 = vmatpush.msra.mxu1 %v1009_v50  ;;  %1249 = vmatpush.msra.mxu2 %v594_v51  ;;  %v210_v41 = vld [vmem:[%s2548_s17 + $0x128] sm:$0xff]  ;;  %v177_v44 = vld [vmem:[%s2548_s17 + $0x20] sm:$0xff]  ;;  %v564_v48 = vld [vmem:[%s2548_s17 + $0xc38] sm:$0xff] }
  0x4c   : > { %1181 = vmatpush.msrb.mxu0 %v208_v49  ;;  %1210 = vmatpush.msra.mxu3 %v561_v53  ;;  %v178_v45 = vld [vmem:[%s2548_s17 + $0x28] sm:$0xff]  ;;  %v1012_v49 = vld [vmem:[%s2548_s17 + $0x1a38] sm:$0xff]  ;;  %v531_v50 = vld [vmem:[%s2548_s17 + $0xb30] sm:$0xff] }
  0x4d   : > { %1233 = vmatpush.msra.mxu1 %v977_v55  ;;  %1250 = vmatpush.msra.mxu2 %v562_v56  ;;  %v979_v51 = vld [vmem:[%s2548_s17 + $0x1930] sm:$0xff]  ;;  %v980_v53 = vld [vmem:[%s2548_s17 + $0x1938] sm:$0xff] }
  0x4e   : > { %1182 = vmatpush.msrb.mxu0 %v176_v52  ;;  %1211 = vmatpush.msra.mxu3 %v529_v57  ;;  %v532_v52 = vld [vmem:[%s2548_s17 + $0xb38] sm:$0xff]  ;;  %v947_v55 = vld [vmem:[%s2548_s17 + $0x1830] sm:$0xff] }
  0x4f   : > { %1234 = vmatpush.msra.mxu1 %v945_v59  ;;  %1251 = vmatpush.msra.mxu2 %v530_v60  ;;  %v500_v56 = vld [vmem:[%s2548_s17 + $0xa38] sm:$0xff]  ;;  %v915_v59 = vld [vmem:[%s2548_s17 + $0x1730] sm:$0xff] }
  0x50   : > { %1272 = vmatpush.msra.mxu0 %v1010_v54  ;;  %1212 = vmatpush.msra.mxu3 %v497_v61  ;;  %v499_v54 = vld [vmem:[%s2548_s17 + $0xa30] sm:$0xff]  ;;  %v948_v57 = vld [vmem:[%s2548_s17 + $0x1838] sm:$0xff] }
  0x51   : > { %1235 = vmatpush.msra.mxu1 %v913_v63  ;;  %1252 = vmatpush.msra.mxu2 %v498_v0  ;;  %v468_v60 = vld [vmem:[%s2548_s17 + $0x938] sm:$0xff]  ;;  %v883_v63 = vld [vmem:[%s2548_s17 + $0x1630] sm:$0xff] }
  0x52   : > { %1273 = vmatpush.msra.mxu0 %v978_v58  ;;  %2499 = vset.pattern.permute.xlu0 %v2513_v5  ;;  %v467_v58 = vld [vmem:[%s2548_s17 + $0x930] sm:$0xff]  ;;  %v916_v61 = vld [vmem:[%s2548_s17 + $0x1738] sm:$0xff] }
  0x53   : > { %1213 = vmatpush.msra.mxu3 %v465_v2  ;;  %1236 = vmatpush.msra.mxu1 %v881_v3  ;;  %v436_v0 = vld [vmem:[%s2548_s17 + $0x838] sm:$0xff]  ;;  %v403_v2 = vld [vmem:[%s2548_s17 + $0x730] sm:$0xff] }
  0x54   : > { %1274 = vmatpush.msra.mxu0 %v946_v62  ;;  %1253 = vmatpush.msra.mxu2 %v466_v4  ;;  %v435_v62 = vld [vmem:[%s2548_s17 + $0x830] sm:$0xff]  ;;  %v404_v4 = vld [vmem:[%s2548_s17 + $0x738] sm:$0xff] }
  0x55   : > { %1040 = vperm.xlu0 %2499, %v1037_v7   ;;  %1214 = vmatpush.msra.mxu3 %v433_v8  ;;  %v851_v3 = vld [vmem:[%s2548_s17 + $0x1530] sm:$0xff]  ;;  %v852_v5 = vld [vmem:[%s2548_s17 + $0x1538] sm:$0xff] }
  0x56   : > { %1275 = vmatpush.msra.mxu0 %v914_v1  ;;  %1237 = vmatpush.msra.mxu1 %v849_v9  ;;  %v884_v1 = vld [vmem:[%s2548_s17 + $0x1638] sm:$0xff]  ;;  %v819_v7 = vld [vmem:[%s2548_s17 + $0x1430] sm:$0xff] }
  0x57   : > { %1254 = vmatpush.msra.mxu2 %v434_v10  ;;  %1215 = vmatpush.msra.mxu3 %v401_v12  ;;  %v372_v8 = vld [vmem:[%s2548_s17 + $0x638] sm:$0xff]  ;;  %v339_v10 = vld [vmem:[%s2548_s17 + $0x530] sm:$0xff] }
  0x58   : > { %1276 = vmatpush.msra.mxu0 %v882_v6  ;;  %1238 = vmatpush.msra.mxu1 %v817_v13  ;;  %v371_v6 = vld [vmem:[%s2548_s17 + $0x630] sm:$0xff]  ;;  %v820_v9 = vld [vmem:[%s2548_s17 + $0x1438] sm:$0xff] }
  0x59   : > { %1255 = vmatpush.msra.mxu2 %v402_v14  ;;  %1216 = vmatpush.msra.mxu3 %v369_v16  ;;  %v340_v12 = vld [vmem:[%s2548_s17 + $0x538] sm:$0xff]  ;;  %v307_v14 = vld [vmem:[%s2548_s17 + $0x430] sm:$0xff] }
  0x5a   : > { %1277 = vmatpush.msra.mxu0 %v850_v11  ;;  %1239 = vmatpush.msra.mxu1 %v785_v17  ;;  %v787_v11 = vld [vmem:[%s2548_s17 + $0x1330] sm:$0xff]  ;;  %v788_v13 = vld [vmem:[%s2548_s17 + $0x1338] sm:$0xff] }
  0x5b   : > { %1256 = vmatpush.msra.mxu2 %v370_v18  ;;  %1217 = vmatpush.msra.mxu3 %v337_v20  ;;  %v308_v16 = vld [vmem:[%s2548_s17 + $0x438] sm:$0xff]  ;;  %v275_v18 = vld [vmem:[%s2548_s17 + $0x330] sm:$0xff] }
  0x5c   : > { %1278 = vmatpush.msra.mxu0 %v818_v15  ;;  %1240 = vmatpush.msra.mxu1 %v753_v21  ;;  %v755_v15 = vld [vmem:[%s2548_s17 + $0x1230] sm:$0xff]  ;;  %v756_v17 = vld [vmem:[%s2548_s17 + $0x1238] sm:$0xff] }
  0x5d   : > { %1257 = vmatpush.msra.mxu2 %v338_v22  ;;  %2456 = vmatmul.msk.f32.vlgmr.msrb.gmra.mxu3 %vm1043_vm0, %v2660_v39  ;;  %v276_v20 = vld [vmem:[%s2548_s17 + $0x338] sm:$0xff]  ;;  %v243_v22 = vld [vmem:[%s2548_s17 + $0x230] sm:$0xff] }
  0x5e   : > { %1279 = vmatpush.msra.mxu0 %v786_v19  ;;  %2457 = vmatmul.msk.f32.vlgmr.msrb.gmra.mxu2 %vm1043_vm0, %v2660_v39  ;;  %v723_v19 = vld [vmem:[%s2548_s17 + $0x1130] sm:$0xff]  ;;  %v724_v21 = vld [vmem:[%s2548_s17 + $0x1138] sm:$0xff] }
  0x5f   : > { %1218 = vmatpush.msra.mxu3 %v305_v24  ;;  %1241 = vmatpush.msra.mxu1 %v721_v25  ;;  %v244_v24 = vld [vmem:[%s2548_s17 + $0x238] sm:$0xff] }
  0x60   : > { %1280 = vmatpush.msra.mxu0 %v754_v23  ;;  %1258 = vmatpush.msra.mxu2 %v306_v26  ;;  %v691_v23 = vld [vmem:[%s2548_s17 + $0x1030] sm:$0xff]  ;;  %v692_v25 = vld [vmem:[%s2548_s17 + $0x1038] sm:$0xff]  ;;  %v661_v26 = vld [vmem:[%s2548_s17 + $0xf40] sm:$0xff] }
  0x61   : > { %1219 = vmatpush.msra.mxu3 %v273_v28  ;;  %1242 = vmatpush.msra.mxu1 %v689_v29  ;;  %v211_v28 = vld [vmem:[%s2548_s17 + $0x130] sm:$0xff]  ;;  %v212_v29 = vld [vmem:[%s2548_s17 + $0x138] sm:$0xff] }
  0x62   : > { %1281 = vmatpush.msra.mxu0 %v722_v27  ;;  %1259 = vmatpush.msra.mxu2 %v274_v30  ;;  %v662_v27 = vld [vmem:[%s2548_s17 + $0xf48] sm:$0xff]  ;;  %v629_v30 = vld [vmem:[%s2548_s17 + $0xe40] sm:$0xff] }
  0x63   : > { %1143 = vmatmul.f32.vlgmr.msrb.gmra.mxu1 %v2652_v35  ;;  %1183 = vmatmul.f32.vlgmr.msrb.gmra.mxu0 %v2652_v35 }
  0x64   : > { %1282 = vmatpush.msra.mxu0 %v690_v31  ;;  %1287 = vmatpush.msrb.mxu1 %v659_v32  ;;  %v630_v31 = vld [vmem:[%s2548_s17 + $0xe48] sm:$0xff]  ;;  %v179_v32 = vld [vmem:[%s2548_s17 + $0x30] sm:$0xff] }
  0x65   : > { %1220 = vmatpush.msra.mxu3 %v241_v34  ;;  %1260 = vmatpush.msra.mxu2 %v242_v36  ;;  %v597_v34 = vld [vmem:[%s2548_s17 + $0xd40] sm:$0xff] }
  0x66   : > { %1327 = vmatpush.msrb.mxu0 %v660_v33  ;;  %1288 = vmatpush.msrb.mxu1 %v627_v37  ;;  %v180_v33 = vld [vmem:[%s2548_s17 + $0x38] sm:$0xff]  ;;  %v1013_v36 = vld [vmem:[%s2548_s17 + $0x1a40] sm:$0xff]  ;;  %v598_v37 = vld [vmem:[%s2548_s17 + $0xd48] sm:$0xff] }
  0x67   : > { %1221 = vmatpush.msra.mxu3 %v209_v40  ;;  %1261 = vmatpush.msra.mxu2 %v210_v41  ;;  %v565_v40 = vld [vmem:[%s2548_s17 + $0xc40] sm:$0xff] }
  0x68   : > { %1328 = vmatpush.msrb.mxu0 %v628_v38  ;;  %1289 = vmatpush.msrb.mxu1 %v595_v42  ;;  %v1014_v38 = vld [vmem:[%s2548_s17 + $0x1a48] sm:$0xff]  ;;  %v981_v41 = vld [vmem:[%s2548_s17 + $0x1940] sm:$0xff] }
  0x69   : > { %1222 = vmatpush.msra.mxu3 %v177_v44  ;;  %1262 = vmatpush.msra.mxu2 %v178_v45  ;;  %v566_v42 = vld [vmem:[%s2548_s17 + $0xc48] sm:$0xff]  ;;  %v533_v44 = vld [vmem:[%s2548_s17 + $0xb40] sm:$0xff] }
  0x6a   : > { %1329 = vmatpush.msrb.mxu0 %v596_v43  ;;  %1290 = vmatpush.msrb.mxu1 %v563_v46  ;;  %v982_v43 = vld [vmem:[%s2548_s17 + $0x1948] sm:$0xff]  ;;  %v949_v45 = vld [vmem:[%s2548_s17 + $0x1840] sm:$0xff] }
  0x6b   : > { %1312 = vmatpush.msrb.mxu3 %v1011_v47  ;;  %1352 = vmatpush.msrb.mxu2 %v1012_v49  ;;  %v534_v46 = vld [vmem:[%s2548_s17 + $0xb48] sm:$0xff]  ;;  %v917_v49 = vld [vmem:[%s2548_s17 + $0x1740] sm:$0xff] }
  0x6c   : > { %1330 = vmatpush.msrb.mxu0 %v564_v48  ;;  %1291 = vmatpush.msrb.mxu1 %v531_v50  ;;  %v950_v47 = vld [vmem:[%s2548_s17 + $0x1848] sm:$0xff]  ;;  %v501_v48 = vld [vmem:[%s2548_s17 + $0xa40] sm:$0xff] }
  0x6d   : > { %1313 = vmatpush.msrb.mxu3 %v979_v51  ;;  %1353 = vmatpush.msrb.mxu2 %v980_v53  ;;  %v502_v50 = vld [vmem:[%s2548_s17 + $0xa48] sm:$0xff]  ;;  %v885_v53 = vld [vmem:[%s2548_s17 + $0x1640] sm:$0xff] }
  0x6e   : > { %1331 = vmatpush.msrb.mxu0 %v532_v52  ;;  %1292 = vmatpush.msrb.mxu1 %v499_v54  ;;  %v918_v51 = vld [vmem:[%s2548_s17 + $0x1748] sm:$0xff]  ;;  %v469_v52 = vld [vmem:[%s2548_s17 + $0x940] sm:$0xff] }
  0x6f   : > { %1314 = vmatpush.msrb.mxu3 %v947_v55  ;;  %1354 = vmatpush.msrb.mxu2 %v948_v57  ;;  %v470_v54 = vld [vmem:[%s2548_s17 + $0x948] sm:$0xff]  ;;  %v853_v57 = vld [vmem:[%s2548_s17 + $0x1540] sm:$0xff] }
  0x70   : > { %1332 = vmatpush.msrb.mxu0 %v500_v56  ;;  %1293 = vmatpush.msrb.mxu1 %v467_v58  ;;  %v886_v55 = vld [vmem:[%s2548_s17 + $0x1648] sm:$0xff]  ;;  %v437_v56 = vld [vmem:[%s2548_s17 + $0x840] sm:$0xff] }
  0x71   : > { %1315 = vmatpush.msrb.mxu3 %v915_v59  ;;  %1355 = vmatpush.msrb.mxu2 %v916_v61  ;;  %v438_v58 = vld [vmem:[%s2548_s17 + $0x848] sm:$0xff]  ;;  %v821_v61 = vld [vmem:[%s2548_s17 + $0x1440] sm:$0xff] }
  0x72   : > { %1333 = vmatpush.msrb.mxu0 %v468_v60  ;;  %1294 = vmatpush.msrb.mxu1 %v435_v62  ;;  %v854_v59 = vld [vmem:[%s2548_s17 + $0x1548] sm:$0xff]  ;;  %v405_v60 = vld [vmem:[%s2548_s17 + $0x740] sm:$0xff] }
  0x73   : > { %1316 = vmatpush.msrb.mxu3 %v883_v63  ;;  %1356 = vmatpush.msrb.mxu2 %v884_v1  ;;  %v406_v62 = vld [vmem:[%s2548_s17 + $0x748] sm:$0xff]  ;;  %v789_v1 = vld [vmem:[%s2548_s17 + $0x1340] sm:$0xff] }
  0x74   : > { %1334 = vmatpush.msrb.mxu0 %v436_v0  ;;  %1295 = vmatpush.msrb.mxu1 %v403_v2  ;;  %v822_v63 = vld [vmem:[%s2548_s17 + $0x1448] sm:$0xff]  ;;  %v373_v0 = vld [vmem:[%s2548_s17 + $0x640] sm:$0xff] }
  0x75   : > { %1317 = vmatpush.msrb.mxu3 %v851_v3  ;;  %1357 = vmatpush.msrb.mxu2 %v852_v5  ;;  %v374_v2 = vld [vmem:[%s2548_s17 + $0x648] sm:$0xff]  ;;  %v757_v5 = vld [vmem:[%s2548_s17 + $0x1240] sm:$0xff] }
  0x76   : > { %1335 = vmatpush.msrb.mxu0 %v404_v4  ;;  %1296 = vmatpush.msrb.mxu1 %v371_v6  ;;  %v790_v3 = vld [vmem:[%s2548_s17 + $0x1348] sm:$0xff]  ;;  %v341_v4 = vld [vmem:[%s2548_s17 + $0x540] sm:$0xff] }
  0x77   : > { %1318 = vmatpush.msrb.mxu3 %v819_v7  ;;  %1358 = vmatpush.msrb.mxu2 %v820_v9  ;;  %v342_v6 = vld [vmem:[%s2548_s17 + $0x548] sm:$0xff]  ;;  %v725_v9 = vld [vmem:[%s2548_s17 + $0x1140] sm:$0xff] }
  0x78   : > { %1336 = vmatpush.msrb.mxu0 %v372_v8  ;;  %1297 = vmatpush.msrb.mxu1 %v339_v10  ;;  %v758_v7 = vld [vmem:[%s2548_s17 + $0x1248] sm:$0xff]  ;;  %v309_v8 = vld [vmem:[%s2548_s17 + $0x440] sm:$0xff] }
  0x79   : > { %1319 = vmatpush.msrb.mxu3 %v787_v11  ;;  %1359 = vmatpush.msrb.mxu2 %v788_v13  ;;  %v310_v10 = vld [vmem:[%s2548_s17 + $0x448] sm:$0xff]  ;;  %v693_v13 = vld [vmem:[%s2548_s17 + $0x1040] sm:$0xff] }
  0x7a   : > { %1337 = vmatpush.msrb.mxu0 %v340_v12  ;;  %1298 = vmatpush.msrb.mxu1 %v307_v14  ;;  %v726_v11 = vld [vmem:[%s2548_s17 + $0x1148] sm:$0xff]  ;;  %v277_v12 = vld [vmem:[%s2548_s17 + $0x340] sm:$0xff] }
  0x7b   : > { %1320 = vmatpush.msrb.mxu3 %v755_v15  ;;  %1360 = vmatpush.msrb.mxu2 %v756_v17  ;;  %v278_v14 = vld [vmem:[%s2548_s17 + $0x348] sm:$0xff]  ;;  %v664_v17 = vld [vmem:[%s2548_s17 + $0xf58] sm:$0xff] }
  0x7c   : > { %1338 = vmatpush.msrb.mxu0 %v308_v16  ;;  %1223 = vmatmul.f32.vlgmr.msra.gmra.mxu3 %v2652_v35  ;;  %v694_v15 = vld [vmem:[%s2548_s17 + $0x1048] sm:$0xff]  ;;  %v663_v16 = vld [vmem:[%s2548_s17 + $0xf50] sm:$0xff] }
  0x7d   : > { %1263 = vmatmul.f32.vlgmr.msra.gmra.mxu2 %v2652_v35  ;;  %1299 = vmatpush.msrb.mxu1 %v275_v18  ;;  %v245_v18 = vld [vmem:[%s2548_s17 + $0x240] sm:$0xff] }
  0x7e   : > { %1321 = vmatpush.msrb.mxu3 %v723_v19  ;;  %1339 = vmatpush.msrb.mxu0 %v276_v20  ;;  %v246_v19 = vld [vmem:[%s2548_s17 + $0x248] sm:$0xff]  ;;  %v631_v20 = vld [vmem:[%s2548_s17 + $0xe50] sm:$0xff] }
  0x7f   : > { %1361 = vmatpush.msrb.mxu2 %v724_v21  ;;  %1300 = vmatpush.msrb.mxu1 %v243_v22  ;;  %v632_v21 = vld [vmem:[%s2548_s17 + $0xe58] sm:$0xff]  ;;  %v213_v22 = vld [vmem:[%s2548_s17 + $0x140] sm:$0xff] }
  0x80   : > { %1322 = vmatpush.msrb.mxu3 %v691_v23  ;;  %1340 = vmatpush.msrb.mxu0 %v244_v24  ;;  %v214_v23 = vld [vmem:[%s2548_s17 + $0x148] sm:$0xff]  ;;  %v599_v24 = vld [vmem:[%s2548_s17 + $0xd50] sm:$0xff] }
  0x81   : > { %1362 = vmatpush.msrb.mxu2 %v692_v25  ;;  %1301 = vmatpush.msrb.mxu1 %v211_v28  ;;  %v600_v25 = vld [vmem:[%s2548_s17 + $0xd58] sm:$0xff]  ;;  %v567_v28 = vld [vmem:[%s2548_s17 + $0xc50] sm:$0xff] }
  0x82   : > { %1367 = vmatpush.msra.mxu3 %v661_v26  ;;  %1341 = vmatpush.msrb.mxu0 %v212_v29  ;;  %v181_v26 = vld [vmem:[%s2548_s17 + $0x40] sm:$0xff]  ;;  %v1015_v29 = vld [vmem:[%s2548_s17 + $0x1a50] sm:$0xff] }
  0x83   : > { %1407 = vmatpush.msra.mxu2 %v662_v27  ;;  %1302 = vmatpush.msrb.mxu1 %v179_v32  ;;  %v182_v27 = vld [vmem:[%s2548_s17 + $0x48] sm:$0xff]  ;;  %v535_v32 = vld [vmem:[%s2548_s17 + $0xb50] sm:$0xff] }
  0x84   : > { %1368 = vmatpush.msra.mxu3 %v629_v30  ;;  %1342 = vmatpush.msrb.mxu0 %v180_v33  ;;  %v568_v30 = vld [vmem:[%s2548_s17 + $0xc58] sm:$0xff]  ;;  %v983_v33 = vld [vmem:[%s2548_s17 + $0x1950] sm:$0xff] }
  0x85   : > { %1408 = vmatpush.msra.mxu2 %v630_v31  ;;  %2458 = vmatmul.msk.f32.vlgmr.msra.gmra.mxu1 %vm1043_vm0, %v2660_v39  ;;  %v1016_v31 = vld [vmem:[%s2548_s17 + $0x1a58] sm:$0xff] }
  0x86   : > { %2459 = vmatmul.msk.f32.vlgmr.msra.gmra.mxu0 %vm1043_vm0, %v2660_v39  ;;  %1369 = vmatpush.msra.mxu3 %v597_v34  ;;  %v536_v34 = vld [vmem:[%s2548_s17 + $0xb58] sm:$0xff] }
  0x87   : > { %1392 = vmatpush.msra.mxu1 %v1013_v36  ;;  %1409 = vmatpush.msra.mxu2 %v598_v37  ;;  %v984_v36 = vld [vmem:[%s2548_s17 + $0x1958] sm:$0xff]  ;;  %v503_v37 = vld [vmem:[%s2548_s17 + $0xa50] sm:$0xff] }
  0x88   : > { %1432 = vmatpush.msra.mxu0 %v1014_v38  ;;  %1370 = vmatpush.msra.mxu3 %v565_v40  ;;  %v951_v38 = vld [vmem:[%s2548_s17 + $0x1850] sm:$0xff]  ;;  %v504_v40 = vld [vmem:[%s2548_s17 + $0xa58] sm:$0xff] }
  0x89   : > { %1393 = vmatpush.msra.mxu1 %v981_v41  ;;  %1410 = vmatpush.msra.mxu2 %v566_v42  ;;  %v952_v41 = vld [vmem:[%s2548_s17 + $0x1858] sm:$0xff]  ;;  %v471_v42 = vld [vmem:[%s2548_s17 + $0x950] sm:$0xff] }
  0x8a   : > { %1433 = vmatpush.msra.mxu0 %v982_v43  ;;  %1371 = vmatpush.msra.mxu3 %v533_v44  ;;  %v919_v43 = vld [vmem:[%s2548_s17 + $0x1750] sm:$0xff]  ;;  %v472_v44 = vld [vmem:[%s2548_s17 + $0x958] sm:$0xff] }
  0x8b   : > { %1394 = vmatpush.msra.mxu1 %v949_v45  ;;  %1411 = vmatpush.msra.mxu2 %v534_v46  ;;  %v920_v45 = vld [vmem:[%s2548_s17 + $0x1758] sm:$0xff]  ;;  %v439_v46 = vld [vmem:[%s2548_s17 + $0x850] sm:$0xff] }
  0x8c   : > { %1434 = vmatpush.msra.mxu0 %v950_v47  ;;  %1372 = vmatpush.msra.mxu3 %v501_v48  ;;  %v887_v47 = vld [vmem:[%s2548_s17 + $0x1650] sm:$0xff]  ;;  %v440_v48 = vld [vmem:[%s2548_s17 + $0x858] sm:$0xff] }
  0x8d   : > { %1395 = vmatpush.msra.mxu1 %v917_v49  ;;  %1412 = vmatpush.msra.mxu2 %v502_v50  ;;  %v888_v49 = vld [vmem:[%s2548_s17 + $0x1658] sm:$0xff]  ;;  %v407_v50 = vld [vmem:[%s2548_s17 + $0x750] sm:$0xff] }
  0x8e   : > { %1435 = vmatpush.msra.mxu0 %v918_v51  ;;  %1373 = vmatpush.msra.mxu3 %v469_v52  ;;  %v855_v51 = vld [vmem:[%s2548_s17 + $0x1550] sm:$0xff]  ;;  %v408_v52 = vld [vmem:[%s2548_s17 + $0x758] sm:$0xff] }
  0x8f   : > { %1396 = vmatpush.msra.mxu1 %v885_v53  ;;  %1413 = vmatpush.msra.mxu2 %v470_v54  ;;  %v856_v53 = vld [vmem:[%s2548_s17 + $0x1558] sm:$0xff]  ;;  %v375_v54 = vld [vmem:[%s2548_s17 + $0x650] sm:$0xff] }
  0x90   : > { %1436 = vmatpush.msra.mxu0 %v886_v55  ;;  %1374 = vmatpush.msra.mxu3 %v437_v56  ;;  %v823_v55 = vld [vmem:[%s2548_s17 + $0x1450] sm:$0xff]  ;;  %v376_v56 = vld [vmem:[%s2548_s17 + $0x658] sm:$0xff] }
  0x91   : > { %1397 = vmatpush.msra.mxu1 %v853_v57  ;;  %1414 = vmatpush.msra.mxu2 %v438_v58  ;;  %v824_v57 = vld [vmem:[%s2548_s17 + $0x1458] sm:$0xff]  ;;  %v343_v58 = vld [vmem:[%s2548_s17 + $0x550] sm:$0xff] }
  0x92   : > { %1437 = vmatpush.msra.mxu0 %v854_v59  ;;  %1375 = vmatpush.msra.mxu3 %v405_v60  ;;  %v791_v59 = vld [vmem:[%s2548_s17 + $0x1350] sm:$0xff]  ;;  %v344_v60 = vld [vmem:[%s2548_s17 + $0x558] sm:$0xff] }
  0x93   : > { %1398 = vmatpush.msra.mxu1 %v821_v61  ;;  %1415 = vmatpush.msra.mxu2 %v406_v62  ;;  %v792_v61 = vld [vmem:[%s2548_s17 + $0x1358] sm:$0xff]  ;;  %v311_v62 = vld [vmem:[%s2548_s17 + $0x450] sm:$0xff] }
  0x94   : > { %1438 = vmatpush.msra.mxu0 %v822_v63  ;;  %1376 = vmatpush.msra.mxu3 %v373_v0  ;;  %v759_v63 = vld [vmem:[%s2548_s17 + $0x1250] sm:$0xff]  ;;  %v312_v0 = vld [vmem:[%s2548_s17 + $0x458] sm:$0xff] }
  0x95   : > { %1399 = vmatpush.msra.mxu1 %v789_v1  ;;  %1416 = vmatpush.msra.mxu2 %v374_v2  ;;  %v760_v1 = vld [vmem:[%s2548_s17 + $0x1258] sm:$0xff]  ;;  %v279_v2 = vld [vmem:[%s2548_s17 + $0x350] sm:$0xff] }
  0x96   : > { %1439 = vmatpush.msra.mxu0 %v790_v3  ;;  %1377 = vmatpush.msra.mxu3 %v341_v4  ;;  %v727_v3 = vld [vmem:[%s2548_s17 + $0x1150] sm:$0xff]  ;;  %v280_v4 = vld [vmem:[%s2548_s17 + $0x358] sm:$0xff] }
  0x97   : > { %1400 = vmatpush.msra.mxu1 %v757_v5  ;;  %1417 = vmatpush.msra.mxu2 %v342_v6  ;;  %v728_v5 = vld [vmem:[%s2548_s17 + $0x1158] sm:$0xff]  ;;  %v247_v6 = vld [vmem:[%s2548_s17 + $0x250] sm:$0xff] }
  0x98   : > { %1440 = vmatpush.msra.mxu0 %v758_v7  ;;  %2460 = vmatmul.msk.f32.vlgmr.msrb.gmra.mxu3 %vm1043_vm0, %v2660_v39  ;;  %v695_v7 = vld [vmem:[%s2548_s17 + $0x1050] sm:$0xff] }
  0x99   : > { %2461 = vmatmul.msk.f32.vlgmr.msrb.gmra.mxu2 %vm1043_vm0, %v2660_v39  ;;  %1378 = vmatpush.msra.mxu3 %v309_v8  ;;  %v248_v8 = vld [vmem:[%s2548_s17 + $0x258] sm:$0xff] }
  0x9a   : > { %1401 = vmatpush.msra.mxu1 %v725_v9  ;;  %1418 = vmatpush.msra.mxu2 %v310_v10  ;;  %v696_v9 = vld [vmem:[%s2548_s17 + $0x1058] sm:$0xff]  ;;  %v665_v10 = vld [vmem:[%s2548_s17 + $0xf60] sm:$0xff] }
  0x9b   : > { %1441 = vmatpush.msra.mxu0 %v726_v11  ;;  %1379 = vmatpush.msra.mxu3 %v277_v12  ;;  %v666_v11 = vld [vmem:[%s2548_s17 + $0xf68] sm:$0xff]  ;;  %v215_v12 = vld [vmem:[%s2548_s17 + $0x150] sm:$0xff] }
  0x9c   : > { %1402 = vmatpush.msra.mxu1 %v693_v13  ;;  %1419 = vmatpush.msra.mxu2 %v278_v14  ;;  %v633_v13 = vld [vmem:[%s2548_s17 + $0xe60] sm:$0xff]  ;;  %v634_v14 = vld [vmem:[%s2548_s17 + $0xe68] sm:$0xff] }
  0x9d   : > { %1442 = vmatpush.msra.mxu0 %v694_v15  ;;  %1303 = vmatmul.f32.vlgmr.msrb.gmra.mxu1 %v2652_v35  ;;  %v183_v15 = vld [vmem:[%s2548_s17 + $0x50] sm:$0xff] }
  0x9e   : > { %1343 = vmatmul.f32.vlgmr.msrb.gmra.mxu0 %v2652_v35  ;;  %1447 = vmatpush.msrb.mxu1 %v663_v16  ;;  %v184_v16 = vld [vmem:[%s2548_s17 + $0x58] sm:$0xff] }
  0x9f   : > { %1487 = vmatpush.msrb.mxu0 %v664_v17  ;;  %1380 = vmatpush.msra.mxu3 %v245_v18  ;;  %v601_v17 = vld [vmem:[%s2548_s17 + $0xd60] sm:$0xff] }
  0xa0   : > { %1420 = vmatpush.msra.mxu2 %v246_v19  ;;  %1448 = vmatpush.msrb.mxu1 %v631_v20  ;;  %v1017_v18 = vld [vmem:[%s2548_s17 + $0x1a60] sm:$0xff]  ;;  %v602_v19 = vld [vmem:[%s2548_s17 + $0xd68] sm:$0xff] }
  0xa1   : > { %1488 = vmatpush.msrb.mxu0 %v632_v21  ;;  %1381 = vmatpush.msra.mxu3 %v213_v22  ;;  %v1018_v20 = vld [vmem:[%s2548_s17 + $0x1a68] sm:$0xff]  ;;  %v569_v21 = vld [vmem:[%s2548_s17 + $0xc60] sm:$0xff] }
  0xa2   : > { %1421 = vmatpush.msra.mxu2 %v214_v23  ;;  %1449 = vmatpush.msrb.mxu1 %v599_v24  ;;  %v985_v22 = vld [vmem:[%s2548_s17 + $0x1960] sm:$0xff]  ;;  %v570_v23 = vld [vmem:[%s2548_s17 + $0xc68] sm:$0xff] }
  0xa3   : > { %1489 = vmatpush.msrb.mxu0 %v600_v25  ;;  %1382 = vmatpush.msra.mxu3 %v181_v26  ;;  %v986_v24 = vld [vmem:[%s2548_s17 + $0x1968] sm:$0xff]  ;;  %v537_v25 = vld [vmem:[%s2548_s17 + $0xb60] sm:$0xff] }
  0xa4   : > { %1422 = vmatpush.msra.mxu2 %v182_v27  ;;  %1450 = vmatpush.msrb.mxu1 %v567_v28  ;;  %v953_v26 = vld [vmem:[%s2548_s17 + $0x1860] sm:$0xff]  ;;  %v538_v27 = vld [vmem:[%s2548_s17 + $0xb68] sm:$0xff] }
  0xa5   : > { %1472 = vmatpush.msrb.mxu3 %v1015_v29  ;;  %1490 = vmatpush.msrb.mxu0 %v568_v30  ;;  %v505_v28 = vld [vmem:[%s2548_s17 + $0xa60] sm:$0xff]  ;;  %v506_v30 = vld [vmem:[%s2548_s17 + $0xa68] sm:$0xff] }
  0xa6   : > { %1512 = vmatpush.msrb.mxu2 %v1016_v31  ;;  %1451 = vmatpush.msrb.mxu1 %v535_v32  ;;  %v921_v29 = vld [vmem:[%s2548_s17 + $0x1760] sm:$0xff]  ;;  %v922_v31 = vld [vmem:[%s2548_s17 + $0x1768] sm:$0xff] }
  0xa7   : > { %1473 = vmatpush.msrb.mxu3 %v983_v33  ;;  %1491 = vmatpush.msrb.mxu0 %v536_v34  ;;  %v473_v32 = vld [vmem:[%s2548_s17 + $0x960] sm:$0xff] }
  0xa8   : > { %1513 = vmatpush.msrb.mxu2 %v984_v36  ;;  %1452 = vmatpush.msrb.mxu1 %v503_v37  ;;  %v889_v33 = vld [vmem:[%s2548_s17 + $0x1660] sm:$0xff]  ;;  %v474_v37 = vld [vmem:[%s2548_s17 + $0x968] sm:$0xff] }
  0xa9   : > { %1474 = vmatpush.msrb.mxu3 %v951_v38  ;;  %1492 = vmatpush.msrb.mxu0 %v504_v40  ;;  %v890_v38 = vld [vmem:[%s2548_s17 + $0x1668] sm:$0xff]  ;;  %v441_v40 = vld [vmem:[%s2548_s17 + $0x860] sm:$0xff] }
  0xaa   : > { %1514 = vmatpush.msrb.mxu2 %v952_v41  ;;  %1453 = vmatpush.msrb.mxu1 %v471_v42  ;;  %v857_v41 = vld [vmem:[%s2548_s17 + $0x1560] sm:$0xff] }
  0xab   : > { %1475 = vmatpush.msrb.mxu3 %v919_v43  ;;  %1493 = vmatpush.msrb.mxu0 %v472_v44  ;;  %v442_v44 = vld [vmem:[%s2548_s17 + $0x868] sm:$0xff] }
  0xac   : > { %1515 = vmatpush.msrb.mxu2 %v920_v45  ;;  %1454 = vmatpush.msrb.mxu1 %v439_v46  ;;  %v858_v45 = vld [vmem:[%s2548_s17 + $0x1568] sm:$0xff] }
  0xad   : > { %1476 = vmatpush.msrb.mxu3 %v887_v47  ;;  %1494 = vmatpush.msrb.mxu0 %v440_v48 }
  0xae   : > { %1516 = vmatpush.msrb.mxu2 %v888_v49  ;;  %1455 = vmatpush.msrb.mxu1 %v407_v50  ;;  %v409_v49 = vld [vmem:[%s2548_s17 + $0x760] sm:$0xff] }
  0xaf   : > { %1477 = vmatpush.msrb.mxu3 %v855_v51  ;;  %1495 = vmatpush.msrb.mxu0 %v408_v52  ;;  %v825_v50 = vld [vmem:[%s2548_s17 + $0x1460] sm:$0xff]  ;;  %v410_v51 = vld [vmem:[%s2548_s17 + $0x768] sm:$0xff] }
  0xb0   : > { %1517 = vmatpush.msrb.mxu2 %v856_v53  ;;  %1456 = vmatpush.msrb.mxu1 %v375_v54  ;;  %v826_v52 = vld [vmem:[%s2548_s17 + $0x1468] sm:$0xff] }
  0xb1   : > { %1478 = vmatpush.msrb.mxu3 %v823_v55  ;;  %1496 = vmatpush.msrb.mxu0 %v376_v56  ;;  %v377_v55 = vld [vmem:[%s2548_s17 + $0x660] sm:$0xff] }
  0xb2   : > { %1518 = vmatpush.msrb.mxu2 %v824_v57  ;;  %1457 = vmatpush.msrb.mxu1 %v343_v58  ;;  %v793_v56 = vld [vmem:[%s2548_s17 + $0x1360] sm:$0xff]  ;;  %v378_v57 = vld [vmem:[%s2548_s17 + $0x668] sm:$0xff] }
  0xb3   : > { %1479 = vmatpush.msrb.mxu3 %v791_v59  ;;  %1497 = vmatpush.msrb.mxu0 %v344_v60  ;;  %v794_v58 = vld [vmem:[%s2548_s17 + $0x1368] sm:$0xff] }
  0xb4   : > { %1519 = vmatpush.msrb.mxu2 %v792_v61  ;;  %1458 = vmatpush.msrb.mxu1 %v311_v62  ;;  %v345_v61 = vld [vmem:[%s2548_s17 + $0x560] sm:$0xff] }
  0xb5   : > { %1480 = vmatpush.msrb.mxu3 %v759_v63  ;;  %1498 = vmatpush.msrb.mxu0 %v312_v0  ;;  %v761_v62 = vld [vmem:[%s2548_s17 + $0x1260] sm:$0xff]  ;;  %v346_v63 = vld [vmem:[%s2548_s17 + $0x568] sm:$0xff] }
  0xb6   : > { %1520 = vmatpush.msrb.mxu2 %v760_v1  ;;  %1383 = vmatmul.f32.vlgmr.msra.gmra.mxu3 %v2652_v35  ;;  %v762_v0 = vld [vmem:[%s2548_s17 + $0x1268] sm:$0xff]  ;;  %v313_v1 = vld [vmem:[%s2548_s17 + $0x460] sm:$0xff] }
  0xb7   : > { %1423 = vmatmul.f32.vlgmr.msra.gmra.mxu2 %v2652_v35  ;;  %1459 = vmatpush.msrb.mxu1 %v279_v2  ;;  %v216_v35 = vld [vmem:[%s2548_s17 + $0x158] sm:$0xff]  ;;  %v729_v2 = vld [vmem:[%s2548_s17 + $0x1160] sm:$0xff] }
  0xb8   : > { %1481 = vmatpush.msrb.mxu3 %v727_v3  ;;  %1499 = vmatpush.msrb.mxu0 %v280_v4  ;;  %v314_v3 = vld [vmem:[%s2548_s17 + $0x468] sm:$0xff] }
  0xb9   : > { %1521 = vmatpush.msrb.mxu2 %v728_v5  ;;  %1460 = vmatpush.msrb.mxu1 %v247_v6  ;;  %v730_v4 = vld [vmem:[%s2548_s17 + $0x1168] sm:$0xff]  ;;  %v281_v6 = vld [vmem:[%s2548_s17 + $0x360] sm:$0xff] }
  0xba   : > { %1482 = vmatpush.msrb.mxu3 %v695_v7  ;;  %1500 = vmatpush.msrb.mxu0 %v248_v8  ;;  %v2976_v5 = vld [vmem:[%s3620_s1 + $0x8] sm:$0xff]  ;;  %v697_v7 = vld [vmem:[%s2548_s17 + $0x1060] sm:$0xff] }
  0xbb   : > { %1522 = vmatpush.msrb.mxu2 %v696_v9  ;;  %1461 = vmatpush.msrb.mxu1 %v215_v12  ;;  %v282_v8 = vld [vmem:[%s2548_s17 + $0x368] sm:$0xff]  ;;  %v249_v12 = vld [vmem:[%s2548_s17 + $0x260] sm:$0xff] }
  0xbc   : > { %1527 = vmatpush.msra.mxu3 %v665_v10  ;;  %1501 = vmatpush.msrb.mxu0 %v216_v35  ;;  %v698_v9 = vld [vmem:[%s2548_s17 + $0x1068] sm:$0xff]  ;;  %v667_v10 = vld [vmem:[%s2548_s17 + $0xf70] sm:$0xff] }
  0xbd   : > { %1567 = vmatpush.msra.mxu2 %v666_v11  ;;  %1462 = vmatpush.msrb.mxu1 %v183_v15  ;;  %v668_v11 = vld [vmem:[%s2548_s17 + $0xf78] sm:$0xff]  ;;  %v250_v35 = vld [vmem:[%s2548_s17 + $0x268] sm:$0xff] }
  0xbe   : > { %1528 = vmatpush.msra.mxu3 %v633_v13  ;;  %1502 = vmatpush.msrb.mxu0 %v184_v16  ;;  %v2993_v13 = vld [vmem:[%s3620_s1] sm:$0xff]  ;;  %v636_v15 = vld [vmem:[%s2548_s17 + $0xe78] sm:$0xff] }
  0xbf   : > { %1568 = vmatpush.msra.mxu2 %v634_v14  ;;  %2462 = vmatmul.msk.f32.vlgmr.msra.gmra.mxu1 %vm1043_vm0, %v2660_v39  ;;  %v635_v14 = vld [vmem:[%s2548_s17 + $0xe70] sm:$0xff]  ;;  %v217_v16 = vld [vmem:[%s2548_s17 + $0x160] sm:$0xff] }
  0xc0   : > { %2463 = vmatmul.msk.f32.vlgmr.msra.gmra.mxu0 %vm1043_vm0, %v2660_v39  ;;  %1529 = vmatpush.msra.mxu3 %v601_v17  ;;  %v954_v39 = vld [vmem:[%s2548_s17 + $0x1868] sm:$0xff] }
  0xc1   : > { %1552 = vmatpush.msra.mxu1 %v1017_v18  ;;  %1569 = vmatpush.msra.mxu2 %v602_v19  ;;  %v218_v17 = vld [vmem:[%s2548_s17 + $0x168] sm:$0xff]  ;;  %v603_v18 = vld [vmem:[%s2548_s17 + $0xd70] sm:$0xff]  ;;  %v604_v19 = vld [vmem:[%s2548_s17 + $0xd78] sm:$0xff] }
  0xc2   : > { %1592 = vmatpush.msra.mxu0 %v1018_v20  ;;  %1530 = vmatpush.msra.mxu3 %v569_v21  ;;  %v1104_v36 = vpop.f32.mrf.mxu2  ;;  %v185_v20 = vld [vmem:[%s2548_s17 + $0x60] sm:$0xff]  ;;  %v186_v21 = vld [vmem:[%s2548_s17 + $0x68] sm:$0xff] }
  0xc3   : > { %1553 = vmatpush.msra.mxu1 %v985_v22  ;;  %1570 = vmatpush.msra.mxu2 %v570_v23  ;;  %v571_v22 = vld [vmem:[%s2548_s17 + $0xc70] sm:$0xff] }
  0xc4   : > { %1593 = vmatpush.msra.mxu0 %v986_v24  ;;  %1531 = vmatpush.msra.mxu3 %v537_v25  ;;  %v1064_v34 = vpop.f32.mrf.mxu0  ;;  %v1019_v23 = vld [vmem:[%s2548_s17 + $0x1a70] sm:$0xff]  ;;  %v572_v24 = vld [vmem:[%s2548_s17 + $0xc78] sm:$0xff] }
  0xc5   : > { %1554 = vmatpush.msra.mxu1 %v953_v26  ;;  %1571 = vmatpush.msra.mxu2 %v538_v27  ;;  %v1020_v25 = vld [vmem:[%s2548_s17 + $0x1a78] sm:$0xff]  ;;  %v539_v26 = vld [vmem:[%s2548_s17 + $0xb70] sm:$0xff] }
  0xc6   : > { %1594 = vmatpush.msra.mxu0 %v954_v39  ;;  %1532 = vmatpush.msra.mxu3 %v505_v28  ;;  %v1124_v48 = vpop.f32.mrf.mxu3  ;;  %v987_v27 = vld [vmem:[%s2548_s17 + $0x1970] sm:$0xff]  ;;  %v540_v39 = vld [vmem:[%s2548_s17 + $0xb78] sm:$0xff] }
  0xc7   : > { %1555 = vmatpush.msra.mxu1 %v921_v29  ;;  %1572 = vmatpush.msra.mxu2 %v506_v30  ;;  %v2943_v42 = vpop.permute.xlu0 %1040  ;;  %v1084_v43 = vpop.f32.mrf.mxu1  ;;  %v988_v28 = vld [vmem:[%s2548_s17 + $0x1978] sm:$0xff]  ;;  %v507_v29 = vld [vmem:[%s2548_s17 + $0xa70] sm:$0xff] }
  0xc8   : > { %1595 = vmatpush.msra.mxu0 %v922_v31  ;;  %1533 = vmatpush.msra.mxu3 %v473_v32  ;;  %v1065_v46 = vadd.f32 %v1064_v34, %v2943_v42  ;;  %v1105_v47 = vadd.f32 %v1104_v36, %v2943_v42  ;;  %v955_v30 = vld [vmem:[%s2548_s17 + $0x1870] sm:$0xff]  ;;  %v508_v31 = vld [vmem:[%s2548_s17 + $0xa78] sm:$0xff] }
  0xc9   : > { %1556 = vmatpush.msra.mxu1 %v889_v33  ;;  %1573 = vmatpush.msra.mxu2 %v474_v37  ;;  %v956_v32 = vld [vmem:[%s2548_s17 + $0x1878] sm:$0xff]  ;;  %v475_v36 = vld [vmem:[%s2548_s17 + $0x970] sm:$0xff] }
  0xca   : > { %1596 = vmatpush.msra.mxu0 %v890_v38  ;;  %1534 = vmatpush.msra.mxu3 %v441_v40  ;;  %v1085_v53 = vadd.f32 %v1084_v43, %v1065_v46  ;;  %v1125_v54 = vadd.f32 %v1124_v48, %v1105_v47  ;;  %v923_v37 = vld [vmem:[%s2548_s17 + $0x1770] sm:$0xff] }
  0xcb   : > { %1557 = vmatpush.msra.mxu1 %v857_v41  ;;  %1574 = vmatpush.msra.mxu2 %v442_v44  ;;  %v476_v44 = vld [vmem:[%s2548_s17 + $0x978] sm:$0xff]  ;;  %v443_v46 = vld [vmem:[%s2548_s17 + $0x870] sm:$0xff] }
  0xcc   : > { %1597 = vmatpush.msra.mxu0 %v858_v45  ;;  %1535 = vmatpush.msra.mxu3 %v409_v49  ;;  %v2327_v59 = vmax.f32 %v1085_v53, 0.0  ;;  %v2328_v60 = vmax.f32 %v1125_v54, 0.0  ;;  %v924_v45 = vld [vmem:[%s2548_s17 + $0x1778] sm:$0xff]  ;;  %v891_v47 = vld [vmem:[%s2548_s17 + $0x1670] sm:$0xff] }
  0xcd   : > { %1558 = vmatpush.msra.mxu1 %v825_v50  ;;  %1575 = vmatpush.msra.mxu2 %v410_v51  ;;  %v444_v50 = vld [vmem:[%s2548_s17 + $0x878] sm:$0xff]  ;;  %v859_v53 = vld [vmem:[%s2548_s17 + $0x1570] sm:$0xff] }
  0xce   : > { %1598 = vmatpush.msra.mxu0 %v826_v52  ;;  %1536 = vmatpush.msra.mxu3 %v377_v55  ;;  %2359 = vst [vmem:[%s2959_s27] sm:$0xff] %v2327_v59  ;;  %v892_v51 = vld [vmem:[%s2548_s17 + $0x1678] sm:$0xff]  ;;  %v411_v52 = vld [vmem:[%s2548_s17 + $0x770] sm:$0xff] }
  0xcf   : > { %1559 = vmatpush.msra.mxu1 %v793_v56  ;;  %1576 = vmatpush.msra.mxu2 %v378_v57  ;;  %2360 = vst [vmem:[%s2959_s27 + $0x8] sm:$0xff] %v2328_v60  ;;  %v412_v56 = vld [vmem:[%s2548_s17 + $0x778] sm:$0xff]  ;;  %v827_v59 = vld [vmem:[%s2548_s17 + $0x1470] sm:$0xff] }
  0xd0   : > { %1599 = vmatpush.msra.mxu0 %v794_v58  ;;  %1537 = vmatpush.msra.mxu3 %v345_v61  ;;  %v860_v57 = vld [vmem:[%s2548_s17 + $0x1578] sm:$0xff]  ;;  %v379_v58 = vld [vmem:[%s2548_s17 + $0x670] sm:$0xff] }
  0xd1   : > { %1560 = vmatpush.msra.mxu1 %v761_v62  ;;  %1577 = vmatpush.msra.mxu2 %v346_v63  ;;  %v380_v60 = vld [vmem:[%s2548_s17 + $0x678] sm:$0xff]  ;;  %v347_v62 = vld [vmem:[%s2548_s17 + $0x570] sm:$0xff] }
  0xd2   : > { %1600 = vmatpush.msra.mxu0 %v762_v0  ;;  %2464 = vmatmul.msk.f32.vlgmr.msrb.gmra.mxu3 %vm1043_vm0, %v2976_v5  ;;  %v828_v61 = vld [vmem:[%s2548_s17 + $0x1478] sm:$0xff]  ;;  %v795_v63 = vld [vmem:[%s2548_s17 + $0x1370] sm:$0xff] }
  0xd3   : > { %2465 = vmatmul.msk.f32.vlgmr.msrb.gmra.mxu2 %vm1043_vm0, %v2976_v5  ;;  %1538 = vmatpush.msra.mxu3 %v313_v1  ;;  %v348_v0 = vld [vmem:[%s2548_s17 + $0x578] sm:$0xff] }
  0xd4   : > { %1561 = vmatpush.msra.mxu1 %v729_v2  ;;  %1578 = vmatpush.msra.mxu2 %v314_v3  ;;  %v796_v1 = vld [vmem:[%s2548_s17 + $0x1378] sm:$0xff]  ;;  %v315_v2 = vld [vmem:[%s2548_s17 + $0x470] sm:$0xff] }
  0xd5   : > { %1601 = vmatpush.msra.mxu0 %v730_v4  ;;  %1539 = vmatpush.msra.mxu3 %v281_v6  ;;  %v763_v3 = vld [vmem:[%s2548_s17 + $0x1270] sm:$0xff]  ;;  %v316_v4 = vld [vmem:[%s2548_s17 + $0x478] sm:$0xff] }
  0xd6   : > { %1562 = vmatpush.msra.mxu1 %v697_v7  ;;  %1579 = vmatpush.msra.mxu2 %v282_v8  ;;  %v764_v6 = vld [vmem:[%s2548_s17 + $0x1278] sm:$0xff]  ;;  %v283_v7 = vld [vmem:[%s2548_s17 + $0x370] sm:$0xff] }
  0xd7   : > { %1602 = vmatpush.msra.mxu0 %v698_v9  ;;  %1463 = vmatmul.f32.vlgmr.msrb.gmra.mxu1 %v2993_v13  ;;  %v731_v8 = vld [vmem:[%s2548_s17 + $0x1170] sm:$0xff]  ;;  %v284_v9 = vld [vmem:[%s2548_s17 + $0x378] sm:$0xff] }
  0xd8   : > { %1503 = vmatmul.f32.vlgmr.msrb.gmra.mxu0 %v2993_v13  ;;  %1607 = vmatpush.msrb.mxu1 %v667_v10  ;;  %v732_v10 = vld [vmem:[%s2548_s17 + $0x1178] sm:$0xff] }
  0xd9   : > { %1647 = vmatpush.msrb.mxu0 %v668_v11  ;;  %1540 = vmatpush.msra.mxu3 %v249_v12  ;;  %v251_v11 = vld [vmem:[%s2548_s17 + $0x270] sm:$0xff] }
  0xda   : > { %1580 = vmatpush.msra.mxu2 %v250_v35  ;;  %1608 = vmatpush.msrb.mxu1 %v635_v14  ;;  %v699_v12 = vld [vmem:[%s2548_s17 + $0x1070] sm:$0xff]  ;;  %v252_v35 = vld [vmem:[%s2548_s17 + $0x278] sm:$0xff] }
  0xdb   : > { %1648 = vmatpush.msrb.mxu0 %v636_v15  ;;  %1541 = vmatpush.msra.mxu3 %v217_v16  ;;  %v700_v14 = vld [vmem:[%s2548_s17 + $0x1078] sm:$0xff]  ;;  %v669_v15 = vld [vmem:[%s2548_s17 + $0xf80] sm:$0xff]  ;;  %v670_v16 = vld [vmem:[%s2548_s17 + $0xf88] sm:$0xff] }
  0xdc   : > { %1581 = vmatpush.msra.mxu2 %v218_v17  ;;  %1609 = vmatpush.msrb.mxu1 %v603_v18  ;;  %v219_v17 = vld [vmem:[%s2548_s17 + $0x170] sm:$0xff]  ;;  %v220_v18 = vld [vmem:[%s2548_s17 + $0x178] sm:$0xff] }
  0xdd   : > { %1649 = vmatpush.msrb.mxu0 %v604_v19  ;;  %1542 = vmatpush.msra.mxu3 %v185_v20  ;;  %v637_v19 = vld [vmem:[%s2548_s17 + $0xe80] sm:$0xff]  ;;  %v638_v20 = vld [vmem:[%s2548_s17 + $0xe88] sm:$0xff] }
  0xde   : > { %1582 = vmatpush.msra.mxu2 %v186_v21  ;;  %1610 = vmatpush.msrb.mxu1 %v571_v22  ;;  %v187_v21 = vld [vmem:[%s2548_s17 + $0x70] sm:$0xff]  ;;  %v188_v22 = vld [vmem:[%s2548_s17 + $0x78] sm:$0xff] }
  0xdf   : > { %1632 = vmatpush.msrb.mxu3 %v1019_v23  ;;  %1650 = vmatpush.msrb.mxu0 %v572_v24  ;;  %v605_v23 = vld [vmem:[%s2548_s17 + $0xd80] sm:$0xff] }
  0xe0   : > { %1672 = vmatpush.msrb.mxu2 %v1020_v25  ;;  %1611 = vmatpush.msrb.mxu1 %v539_v26  ;;  %v1144_v33 = vpop.f32.mrf.mxu1  ;;  %v1184_v34 = vpop.f32.mrf.mxu0  ;;  %v1021_v24 = vld [vmem:[%s2548_s17 + $0x1a80] sm:$0xff]  ;;  %v606_v25 = vld [vmem:[%s2548_s17 + $0xd88] sm:$0xff] }
  0xe1   : > { %1633 = vmatpush.msrb.mxu3 %v987_v27  ;;  %1651 = vmatpush.msrb.mxu0 %v540_v39  ;;  %v1145_v38 = vadd.f32 %v1144_v33, %v2943_v42  ;;  %v1185_v40 = vadd.f32 %v1184_v34, %v2943_v42  ;;  %v1164_v41 = vpop.f32.mrf.mxu3  ;;  %v1204_v43 = vpop.f32.mrf.mxu2  ;;  %v1022_v26 = vld [vmem:[%s2548_s17 + $0x1a88] sm:$0xff]  ;;  %v573_v27 = vld [vmem:[%s2548_s17 + $0xc80] sm:$0xff] }
  0xe2   : > { %1673 = vmatpush.msrb.mxu2 %v988_v28  ;;  %1612 = vmatpush.msrb.mxu1 %v507_v29  ;;  %v989_v39 = vld [vmem:[%s2548_s17 + $0x1980] sm:$0xff]  ;;  %v574_v28 = vld [vmem:[%s2548_s17 + $0xc88] sm:$0xff] }
  0xe3   : > { %1634 = vmatpush.msrb.mxu3 %v955_v30  ;;  %1652 = vmatpush.msrb.mxu0 %v508_v31  ;;  %v1165_v48 = vadd.f32 %v1164_v41, %v1145_v38  ;;  %v1205_v49 = vadd.f32 %v1204_v43, %v1185_v40  ;;  %v990_v29 = vld [vmem:[%s2548_s17 + $0x1988] sm:$0xff]  ;;  %v541_v30 = vld [vmem:[%s2548_s17 + $0xb80] sm:$0xff] }
  0xe4   : > { %1674 = vmatpush.msrb.mxu2 %v956_v32  ;;  %1613 = vmatpush.msrb.mxu1 %v475_v36  ;;  %v957_v31 = vld [vmem:[%s2548_s17 + $0x1880] sm:$0xff]  ;;  %v542_v32 = vld [vmem:[%s2548_s17 + $0xb88] sm:$0xff] }
  0xe5   : > { %1635 = vmatpush.msrb.mxu3 %v923_v37  ;;  %1653 = vmatpush.msrb.mxu0 %v476_v44  ;;  %v2329_v54 = vmax.f32 %v1165_v48, 0.0  ;;  %v2330_v55 = vmax.f32 %v1205_v49, 0.0  ;;  %v958_v33 = vld [vmem:[%s2548_s17 + $0x1888] sm:$0xff]  ;;  %v509_v34 = vld [vmem:[%s2548_s17 + $0xa80] sm:$0xff] }
  0xe6   : > { %1675 = vmatpush.msrb.mxu2 %v924_v45  ;;  %1614 = vmatpush.msrb.mxu1 %v443_v46  ;;  %v925_v36 = vld [vmem:[%s2548_s17 + $0x1780] sm:$0xff]  ;;  %v510_v37 = vld [vmem:[%s2548_s17 + $0xa88] sm:$0xff] }
  0xe7   : > { %1636 = vmatpush.msrb.mxu3 %v891_v47  ;;  %1654 = vmatpush.msrb.mxu0 %v444_v50  ;;  %2361 = vst [vmem:[%s2959_s27 + $0x10] sm:$0xff] %v2329_v54  ;;  %v926_v38 = vld [vmem:[%s2548_s17 + $0x1788] sm:$0xff]  ;;  %v477_v40 = vld [vmem:[%s2548_s17 + $0x980] sm:$0xff] }
  0xe8   : > { %1676 = vmatpush.msrb.mxu2 %v892_v51  ;;  %1615 = vmatpush.msrb.mxu1 %v411_v52  ;;  %2362 = vst [vmem:[%s2959_s27 + $0x18] sm:$0xff] %v2330_v55  ;;  %v893_v41 = vld [vmem:[%s2548_s17 + $0x1680] sm:$0xff]  ;;  %v478_v45 = vld [vmem:[%s2548_s17 + $0x988] sm:$0xff] }
  0xe9   : > { %1637 = vmatpush.msrb.mxu3 %v859_v53  ;;  %1655 = vmatpush.msrb.mxu0 %v412_v56  ;;  %v894_v46 = vld [vmem:[%s2548_s17 + $0x1688] sm:$0xff]  ;;  %v445_v49 = vld [vmem:[%s2548_s17 + $0x880] sm:$0xff] }
  0xea   : > { %1677 = vmatpush.msrb.mxu2 %v860_v57  ;;  %1616 = vmatpush.msrb.mxu1 %v379_v58  ;;  %v861_v50 = vld [vmem:[%s2548_s17 + $0x1580] sm:$0xff]  ;;  %v446_v51 = vld [vmem:[%s2548_s17 + $0x888] sm:$0xff] }
  0xeb   : > { %1638 = vmatpush.msrb.mxu3 %v827_v59  ;;  %1656 = vmatpush.msrb.mxu0 %v380_v60  ;;  %v862_v52 = vld [vmem:[%s2548_s17 + $0x1588] sm:$0xff]  ;;  %v413_v55 = vld [vmem:[%s2548_s17 + $0x780] sm:$0xff] }
  0xec   : > { %1678 = vmatpush.msrb.mxu2 %v828_v61  ;;  %1617 = vmatpush.msrb.mxu1 %v347_v62  ;;  %v829_v56 = vld [vmem:[%s2548_s17 + $0x1480] sm:$0xff]  ;;  %v414_v59 = vld [vmem:[%s2548_s17 + $0x788] sm:$0xff] }
  0xed   : > { %1639 = vmatpush.msrb.mxu3 %v795_v63  ;;  %1657 = vmatpush.msrb.mxu0 %v348_v0  ;;  %v830_v60 = vld [vmem:[%s2548_s17 + $0x1488] sm:$0xff]  ;;  %v381_v61 = vld [vmem:[%s2548_s17 + $0x680] sm:$0xff] }
  0xee   : > { %1679 = vmatpush.msrb.mxu2 %v796_v1  ;;  %1618 = vmatpush.msrb.mxu1 %v315_v2  ;;  %v797_v62 = vld [vmem:[%s2548_s17 + $0x1380] sm:$0xff]  ;;  %v382_v1 = vld [vmem:[%s2548_s17 + $0x688] sm:$0xff] }
  0xef   : > { %1640 = vmatpush.msrb.mxu3 %v763_v3  ;;  %1658 = vmatpush.msrb.mxu0 %v316_v4  ;;  %v798_v2 = vld [vmem:[%s2548_s17 + $0x1388] sm:$0xff]  ;;  %v349_v3 = vld [vmem:[%s2548_s17 + $0x580] sm:$0xff] }
  0xf0   : > { %1680 = vmatpush.msrb.mxu2 %v764_v6  ;;  %1543 = vmatmul.f32.vlgmr.msra.gmra.mxu3 %v2993_v13  ;;  %v765_v4 = vld [vmem:[%s2548_s17 + $0x1280] sm:$0xff]  ;;  %v350_v6 = vld [vmem:[%s2548_s17 + $0x588] sm:$0xff] }
  0xf1   : > { %1583 = vmatmul.f32.vlgmr.msra.gmra.mxu2 %v2993_v13  ;;  %1619 = vmatpush.msrb.mxu1 %v283_v7  ;;  %v766_v7 = vld [vmem:[%s2548_s17 + $0x1288] sm:$0xff] }
  0xf2   : > { %1641 = vmatpush.msrb.mxu3 %v731_v8  ;;  %1659 = vmatpush.msrb.mxu0 %v284_v9  ;;  %v317_v8 = vld [vmem:[%s2548_s17 + $0x480] sm:$0xff] }
  0xf3   : > { %1681 = vmatpush.msrb.mxu2 %v732_v10  ;;  %1620 = vmatpush.msrb.mxu1 %v251_v11  ;;  %v733_v9 = vld [vmem:[%s2548_s17 + $0x1180] sm:$0xff]  ;;  %v318_v10 = vld [vmem:[%s2548_s17 + $0x488] sm:$0xff] }
  0xf4   : > { %1642 = vmatpush.msrb.mxu3 %v699_v12  ;;  %1660 = vmatpush.msrb.mxu0 %v252_v35  ;;  %v734_v11 = vld [vmem:[%s2548_s17 + $0x1188] sm:$0xff]  ;;  %v285_v12 = vld [vmem:[%s2548_s17 + $0x380] sm:$0xff] }
  0xf5   : > { %1682 = vmatpush.msrb.mxu2 %v700_v14  ;;  %1621 = vmatpush.msrb.mxu1 %v219_v17  ;;  %v701_v35 = vld [vmem:[%s2548_s17 + $0x1080] sm:$0xff]  ;;  %v286_v14 = vld [vmem:[%s2548_s17 + $0x388] sm:$0xff]  ;;  %v672_v17 = vld [vmem:[%s2548_s17 + $0xf98] sm:$0xff] }
  0xf6   : > { %1687 = vmatpush.msra.mxu3 %v669_v15  ;;  %1661 = vmatpush.msrb.mxu0 %v220_v18  ;;  %v702_v15 = vld [vmem:[%s2548_s17 + $0x1088] sm:$0xff]  ;;  %v253_v18 = vld [vmem:[%s2548_s17 + $0x280] sm:$0xff] }
  0xf7   : > { %1727 = vmatpush.msra.mxu2 %v670_v16  ;;  %1622 = vmatpush.msrb.mxu1 %v187_v21  ;;  %v671_v16 = vld [vmem:[%s2548_s17 + $0xf90] sm:$0xff]  ;;  %v640_v21 = vld [vmem:[%s2548_s17 + $0xe98] sm:$0xff] }
  0xf8   : > { %1688 = vmatpush.msra.mxu3 %v637_v19  ;;  %1662 = vmatpush.msrb.mxu0 %v188_v22  ;;  %v254_v19 = vld [vmem:[%s2548_s17 + $0x288] sm:$0xff]  ;;  %v221_v22 = vld [vmem:[%s2548_s17 + $0x180] sm:$0xff] }
  0xf9   : > { %1728 = vmatpush.msra.mxu2 %v638_v20  ;;  %2466 = vmatmul.msk.f32.vlgmr.msra.gmra.mxu1 %vm1043_vm0, %v2976_v5  ;;  %v639_v20 = vld [vmem:[%s2548_s17 + $0xe90] sm:$0xff] }
  0xfa   : > { %2467 = vmatmul.msk.f32.vlgmr.msra.gmra.mxu0 %vm1043_vm0, %v2976_v5  ;;  %1689 = vmatpush.msra.mxu3 %v605_v23  ;;  %v222_v23 = vld [vmem:[%s2548_s17 + $0x188] sm:$0xff] }
  0xfb   : > { %1712 = vmatpush.msra.mxu1 %v1021_v24  ;;  %1729 = vmatpush.msra.mxu2 %v606_v25  ;;  %v607_v24 = vld [vmem:[%s2548_s17 + $0xd90] sm:$0xff]  ;;  %v608_v25 = vld [vmem:[%s2548_s17 + $0xd98] sm:$0xff] }
  0xfc   : > { %1752 = vmatpush.msra.mxu0 %v1022_v26  ;;  %1690 = vmatpush.msra.mxu3 %v573_v27  ;;  %v189_v26 = vld [vmem:[%s2548_s17 + $0x80] sm:$0xff]  ;;  %v190_v27 = vld [vmem:[%s2548_s17 + $0x88] sm:$0xff] }
  0xfd   : > { %1713 = vmatpush.msra.mxu1 %v989_v39  ;;  %1730 = vmatpush.msra.mxu2 %v574_v28  ;;  %v575_v39 = vld [vmem:[%s2548_s17 + $0xc90] sm:$0xff] }
  0xfe   : > { %1753 = vmatpush.msra.mxu0 %v990_v29  ;;  %1691 = vmatpush.msra.mxu3 %v541_v30  ;;  %v1023_v28 = vld [vmem:[%s2548_s17 + $0x1a90] sm:$0xff]  ;;  %v576_v29 = vld [vmem:[%s2548_s17 + $0xc98] sm:$0xff] }
  0xff   : > { %1714 = vmatpush.msra.mxu1 %v957_v31  ;;  %1731 = vmatpush.msra.mxu2 %v542_v32  ;;  %v1224_v43 = vpop.f32.mrf.mxu3  ;;  %v1024_v30 = vld [vmem:[%s2548_s17 + $0x1a98] sm:$0xff]  ;;  %v543_v31 = vld [vmem:[%s2548_s17 + $0xb90] sm:$0xff] }
 0x100   : > { %1754 = vmatpush.msra.mxu0 %v958_v33  ;;  %v1264_v44 = vpop.f32.mrf.mxu2  ;;  %1692 = vmatpush.msra.mxu3 %v509_v34  ;;  %v1225_v47 = vadd.f32 %v1224_v43, %v2943_v42  ;;  %v991_v32 = vld [vmem:[%s2548_s17 + $0x1990] sm:$0xff]  ;;  %v544_v33 = vld [vmem:[%s2548_s17 + $0xb98] sm:$0xff] }
 0x101   : > { %1715 = vmatpush.msra.mxu1 %v925_v36  ;;  %v1265_v48 = vadd.f32 %v1264_v44, %v2943_v42  ;;  %1732 = vmatpush.msra.mxu2 %v510_v37  ;;  %v992_v34 = vld [vmem:[%s2548_s17 + $0x1998] sm:$0xff]  ;;  %v511_v36 = vld [vmem:[%s2548_s17 + $0xa90] sm:$0xff] }
 0x102   : > { %1755 = vmatpush.msra.mxu0 %v926_v38  ;;  %1693 = vmatpush.msra.mxu3 %v477_v40  ;;  %v1244_v53 = vpop.f32.mrf.mxu1  ;;  %v959_v37 = vld [vmem:[%s2548_s17 + $0x1890] sm:$0xff]  ;;  %v512_v38 = vld [vmem:[%s2548_s17 + $0xa98] sm:$0xff] }
 0x103   : > { %1716 = vmatpush.msra.mxu1 %v893_v41  ;;  %v1284_v54 = vpop.f32.mrf.mxu0  ;;  %1733 = vmatpush.msra.mxu2 %v478_v45  ;;  %v1245_v57 = vadd.f32 %v1244_v53, %v1225_v47  ;;  %v960_v40 = vld [vmem:[%s2548_s17 + $0x1898] sm:$0xff]  ;;  %v479_v44 = vld [vmem:[%s2548_s17 + $0x990] sm:$0xff] }
 0x104   : > { %1756 = vmatpush.msra.mxu0 %v894_v46  ;;  %v1285_v58 = vadd.f32 %v1284_v54, %v1265_v48  ;;  %1694 = vmatpush.msra.mxu3 %v445_v49  ;;  %v927_v45 = vld [vmem:[%s2548_s17 + $0x1790] sm:$0xff] }
 0x105   : > { %1717 = vmatpush.msra.mxu1 %v861_v50  ;;  %1734 = vmatpush.msra.mxu2 %v446_v51  ;;  %v2331_v63 = vmax.f32 %v1245_v57, 0.0  ;;  %v480_v50 = vld [vmem:[%s2548_s17 + $0x998] sm:$0xff]  ;;  %v895_v53 = vld [vmem:[%s2548_s17 + $0x1690] sm:$0xff] }
 0x106   : > { %1757 = vmatpush.msra.mxu0 %v862_v52  ;;  %v2332_v0 = vmax.f32 %v1285_v58, 0.0  ;;  %1695 = vmatpush.msra.mxu3 %v413_v55  ;;  %v928_v51 = vld [vmem:[%s2548_s17 + $0x1798] sm:$0xff]  ;;  %v447_v52 = vld [vmem:[%s2548_s17 + $0x890] sm:$0xff] }
 0x107   : > { %1718 = vmatpush.msra.mxu1 %v829_v56  ;;  %1735 = vmatpush.msra.mxu2 %v414_v59  ;;  %2363 = vst [vmem:[%s2959_s27 + $0x20] sm:$0xff] %v2331_v63  ;;  %v448_v56 = vld [vmem:[%s2548_s17 + $0x898] sm:$0xff]  ;;  %v415_v58 = vld [vmem:[%s2548_s17 + $0x790] sm:$0xff] }
 0x108   : > { %1758 = vmatpush.msra.mxu0 %v830_v60  ;;  %1696 = vmatpush.msra.mxu3 %v381_v61  ;;  %2364 = vst [vmem:[%s2959_s27 + $0x28] sm:$0xff] %v2332_v0  ;;  %v896_v57 = vld [vmem:[%s2548_s17 + $0x1698] sm:$0xff]  ;;  %v863_v59 = vld [vmem:[%s2548_s17 + $0x1590] sm:$0xff] }
 0x109   : > { %1719 = vmatpush.msra.mxu1 %v797_v62  ;;  %1736 = vmatpush.msra.mxu2 %v382_v1  ;;  %v416_v62 = vld [vmem:[%s2548_s17 + $0x798] sm:$0xff]  ;;  %v383_v0 = vld [vmem:[%s2548_s17 + $0x690] sm:$0xff] }
 0x10a   : > { %1759 = vmatpush.msra.mxu0 %v798_v2  ;;  %1697 = vmatpush.msra.mxu3 %v349_v3  ;;  %v864_v63 = vld [vmem:[%s2548_s17 + $0x1598] sm:$0xff]  ;;  %v831_v1 = vld [vmem:[%s2548_s17 + $0x1490] sm:$0xff] }
 0x10b   : > { %1720 = vmatpush.msra.mxu1 %v765_v4  ;;  %1737 = vmatpush.msra.mxu2 %v350_v6  ;;  %v384_v2 = vld [vmem:[%s2548_s17 + $0x698] sm:$0xff]  ;;  %v351_v4 = vld [vmem:[%s2548_s17 + $0x590] sm:$0xff] }
 0x10c   : > { %1760 = vmatpush.msra.mxu0 %v766_v7  ;;  %2468 = vmatmul.msk.f32.vlgmr.msrb.gmra.mxu3 %vm1043_vm0, %v2976_v5  ;;  %v832_v3 = vld [vmem:[%s2548_s17 + $0x1498] sm:$0xff]  ;;  %v799_v6 = vld [vmem:[%s2548_s17 + $0x1390] sm:$0xff] }
 0x10d   : > { %2469 = vmatmul.msk.f32.vlgmr.msrb.gmra.mxu2 %vm1043_vm0, %v2976_v5  ;;  %1698 = vmatpush.msra.mxu3 %v317_v8  ;;  %v352_v7 = vld [vmem:[%s2548_s17 + $0x598] sm:$0xff] }
 0x10e   : > { %1721 = vmatpush.msra.mxu1 %v733_v9  ;;  %1738 = vmatpush.msra.mxu2 %v318_v10  ;;  %v800_v8 = vld [vmem:[%s2548_s17 + $0x1398] sm:$0xff]  ;;  %v319_v9 = vld [vmem:[%s2548_s17 + $0x490] sm:$0xff] }
 0x10f   : > { %1761 = vmatpush.msra.mxu0 %v734_v11  ;;  %1699 = vmatpush.msra.mxu3 %v285_v12  ;;  %v767_v10 = vld [vmem:[%s2548_s17 + $0x1290] sm:$0xff]  ;;  %v320_v11 = vld [vmem:[%s2548_s17 + $0x498] sm:$0xff] }
 0x110   : > { %1722 = vmatpush.msra.mxu1 %v701_v35  ;;  %1739 = vmatpush.msra.mxu2 %v286_v14  ;;  %v768_v12 = vld [vmem:[%s2548_s17 + $0x1298] sm:$0xff]  ;;  %v287_v35 = vld [vmem:[%s2548_s17 + $0x390] sm:$0xff] }
 0x111   : > { %1762 = vmatpush.msra.mxu0 %v702_v15  ;;  %1623 = vmatmul.f32.vlgmr.msrb.gmra.mxu1 %v2993_v13  ;;  %v735_v14 = vld [vmem:[%s2548_s17 + $0x1190] sm:$0xff]  ;;  %v288_v15 = vld [vmem:[%s2548_s17 + $0x398] sm:$0xff] }
 0x112   : > { %1663 = vmatmul.f32.vlgmr.msrb.gmra.mxu0 %v2993_v13  ;;  %1767 = vmatpush.msrb.mxu1 %v671_v16  ;;  %v736_v16 = vld [vmem:[%s2548_s17 + $0x1198] sm:$0xff] }
 0x113   : > { %1807 = vmatpush.msrb.mxu0 %v672_v17  ;;  %1700 = vmatpush.msra.mxu3 %v253_v18  ;;  %v255_v17 = vld [vmem:[%s2548_s17 + $0x290] sm:$0xff] }
 0x114   : > { %1740 = vmatpush.msra.mxu2 %v254_v19  ;;  %1768 = vmatpush.msrb.mxu1 %v639_v20  ;;  %v703_v18 = vld [vmem:[%s2548_s17 + $0x1090] sm:$0xff]  ;;  %v256_v19 = vld [vmem:[%s2548_s17 + $0x298] sm:$0xff] }
 0x115   : > { %1808 = vmatpush.msrb.mxu0 %v640_v21  ;;  %1701 = vmatpush.msra.mxu3 %v221_v22  ;;  %v704_v20 = vld [vmem:[%s2548_s17 + $0x1098] sm:$0xff]  ;;  %v673_v21 = vld [vmem:[%s2548_s17 + $0xfa0] sm:$0xff]  ;;  %v674_v22 = vld [vmem:[%s2548_s17 + $0xfa8] sm:$0xff] }
 0x116   : > { %1741 = vmatpush.msra.mxu2 %v222_v23  ;;  %1769 = vmatpush.msrb.mxu1 %v607_v24  ;;  %v223_v23 = vld [vmem:[%s2548_s17 + $0x190] sm:$0xff]  ;;  %v224_v24 = vld [vmem:[%s2548_s17 + $0x198] sm:$0xff] }
 0x117   : > { %1809 = vmatpush.msrb.mxu0 %v608_v25  ;;  %1702 = vmatpush.msra.mxu3 %v189_v26  ;;  %v641_v25 = vld [vmem:[%s2548_s17 + $0xea0] sm:$0xff]  ;;  %v642_v26 = vld [vmem:[%s2548_s17 + $0xea8] sm:$0xff] }
 0x118   : > { %1742 = vmatpush.msra.mxu2 %v190_v27  ;;  %1770 = vmatpush.msrb.mxu1 %v575_v39  ;;  %v191_v27 = vld [vmem:[%s2548_s17 + $0x90] sm:$0xff]  ;;  %v192_v39 = vld [vmem:[%s2548_s17 + $0x98] sm:$0xff] }
 0x119   : > { %1792 = vmatpush.msrb.mxu3 %v1023_v28  ;;  %1810 = vmatpush.msrb.mxu0 %v576_v29  ;;  %v609_v28 = vld [vmem:[%s2548_s17 + $0xda0] sm:$0xff] }
 0x11a   : > { %1832 = vmatpush.msrb.mxu2 %v1024_v30  ;;  %1771 = vmatpush.msrb.mxu1 %v543_v31  ;;  %v1304_v41 = vpop.f32.mrf.mxu1  ;;  %v1025_v29 = vld [vmem:[%s2548_s17 + $0x1aa0] sm:$0xff]  ;;  %v610_v30 = vld [vmem:[%s2548_s17 + $0xda8] sm:$0xff] }
 0x11b   : > { %1793 = vmatpush.msrb.mxu3 %v991_v32  ;;  %v1344_v43 = vpop.f32.mrf.mxu0  ;;  %1811 = vmatpush.msrb.mxu0 %v544_v33  ;;  %v1305_v46 = vadd.f32 %v1304_v41, %v2943_v42  ;;  %v1324_v48 = vpop.f32.mrf.mxu3  ;;  %v1026_v31 = vld [vmem:[%s2548_s17 + $0x1aa8] sm:$0xff]  ;;  %v577_v32 = vld [vmem:[%s2548_s17 + $0xca0] sm:$0xff] }
 0x11c   : > { %1833 = vmatpush.msrb.mxu2 %v992_v34  ;;  %v1345_v47 = vadd.f32 %v1344_v43, %v2943_v42  ;;  %v1364_v49 = vpop.f32.mrf.mxu2  ;;  %1772 = vmatpush.msrb.mxu1 %v511_v36  ;;  %v993_v33 = vld [vmem:[%s2548_s17 + $0x19a0] sm:$0xff]  ;;  %v578_v34 = vld [vmem:[%s2548_s17 + $0xca8] sm:$0xff] }
 0x11d   : > { %1794 = vmatpush.msrb.mxu3 %v959_v37  ;;  %1812 = vmatpush.msrb.mxu0 %v512_v38  ;;  %v1325_v54 = vadd.f32 %v1324_v48, %v1305_v46  ;;  %v994_v36 = vld [vmem:[%s2548_s17 + $0x19a8] sm:$0xff]  ;;  %v545_v37 = vld [vmem:[%s2548_s17 + $0xba0] sm:$0xff] }
 0x11e   : > { %1834 = vmatpush.msrb.mxu2 %v960_v40  ;;  %v1365_v55 = vadd.f32 %v1364_v49, %v1345_v47  ;;  %1773 = vmatpush.msrb.mxu1 %v479_v44  ;;  %v961_v38 = vld [vmem:[%s2548_s17 + $0x18a0] sm:$0xff]  ;;  %v546_v40 = vld [vmem:[%s2548_s17 + $0xba8] sm:$0xff] }
 0x11f   : > { %1795 = vmatpush.msrb.mxu3 %v927_v45  ;;  %1813 = vmatpush.msrb.mxu0 %v480_v50  ;;  %v2333_v60 = vmax.f32 %v1325_v54, 0.0  ;;  %v962_v41 = vld [vmem:[%s2548_s17 + $0x18a8] sm:$0xff]  ;;  %v513_v43 = vld [vmem:[%s2548_s17 + $0xaa0] sm:$0xff] }
 0x120   : > { %1835 = vmatpush.msrb.mxu2 %v928_v51  ;;  %v2334_v61 = vmax.f32 %v1365_v55, 0.0  ;;  %1774 = vmatpush.msrb.mxu1 %v447_v52  ;;  %v929_v44 = vld [vmem:[%s2548_s17 + $0x17a0] sm:$0xff]  ;;  %v514_v45 = vld [vmem:[%s2548_s17 + $0xaa8] sm:$0xff] }
 0x121   : > { %1796 = vmatpush.msrb.mxu3 %v895_v53  ;;  %1814 = vmatpush.msrb.mxu0 %v448_v56  ;;  %2365 = vst [vmem:[%s2959_s27 + $0x30] sm:$0xff] %v2333_v60  ;;  %v930_v46 = vld [vmem:[%s2548_s17 + $0x17a8] sm:$0xff]  ;;  %v481_v47 = vld [vmem:[%s2548_s17 + $0x9a0] sm:$0xff] }
 0x122   : > { %1836 = vmatpush.msrb.mxu2 %v896_v57  ;;  %1775 = vmatpush.msrb.mxu1 %v415_v58  ;;  %2366 = vst [vmem:[%s2959_s27 + $0x38] sm:$0xff] %v2334_v61  ;;  %v897_v48 = vld [vmem:[%s2548_s17 + $0x16a0] sm:$0xff]  ;;  %v482_v51 = vld [vmem:[%s2548_s17 + $0x9a8] sm:$0xff] }
 0x123   : > { %1797 = vmatpush.msrb.mxu3 %v863_v59  ;;  %1815 = vmatpush.msrb.mxu0 %v416_v62  ;;  %v898_v52 = vld [vmem:[%s2548_s17 + $0x16a8] sm:$0xff]  ;;  %v449_v55 = vld [vmem:[%s2548_s17 + $0x8a0] sm:$0xff] }
 0x124   : > { %1837 = vmatpush.msrb.mxu2 %v864_v63  ;;  %1776 = vmatpush.msrb.mxu1 %v383_v0  ;;  %v865_v56 = vld [vmem:[%s2548_s17 + $0x15a0] sm:$0xff]  ;;  %v450_v57 = vld [vmem:[%s2548_s17 + $0x8a8] sm:$0xff] }
 0x125   : > { %1798 = vmatpush.msrb.mxu3 %v831_v1  ;;  %1816 = vmatpush.msrb.mxu0 %v384_v2  ;;  %v866_v58 = vld [vmem:[%s2548_s17 + $0x15a8] sm:$0xff]  ;;  %v417_v61 = vld [vmem:[%s2548_s17 + $0x7a0] sm:$0xff] }
 0x126   : > { %1838 = vmatpush.msrb.mxu2 %v832_v3  ;;  %1777 = vmatpush.msrb.mxu1 %v351_v4  ;;  %v833_v62 = vld [vmem:[%s2548_s17 + $0x14a0] sm:$0xff]  ;;  %v418_v1 = vld [vmem:[%s2548_s17 + $0x7a8] sm:$0xff] }
 0x127   : > { %1799 = vmatpush.msrb.mxu3 %v799_v6  ;;  %1817 = vmatpush.msrb.mxu0 %v352_v7  ;;  %v834_v2 = vld [vmem:[%s2548_s17 + $0x14a8] sm:$0xff]  ;;  %v385_v3 = vld [vmem:[%s2548_s17 + $0x6a0] sm:$0xff] }
 0x128   : > { %1839 = vmatpush.msrb.mxu2 %v800_v8  ;;  %1778 = vmatpush.msrb.mxu1 %v319_v9  ;;  %v801_v4 = vld [vmem:[%s2548_s17 + $0x13a0] sm:$0xff]  ;;  %v386_v8 = vld [vmem:[%s2548_s17 + $0x6a8] sm:$0xff] }
 0x129   : > { %1800 = vmatpush.msrb.mxu3 %v767_v10  ;;  %1818 = vmatpush.msrb.mxu0 %v320_v11  ;;  %v802_v9 = vld [vmem:[%s2548_s17 + $0x13a8] sm:$0xff]  ;;  %v353_v10 = vld [vmem:[%s2548_s17 + $0x5a0] sm:$0xff] }
 0x12a   : > { %1840 = vmatpush.msrb.mxu2 %v768_v12  ;;  %1703 = vmatmul.f32.vlgmr.msra.gmra.mxu3 %v2993_v13  ;;  %v769_v11 = vld [vmem:[%s2548_s17 + $0x12a0] sm:$0xff]  ;;  %v354_v12 = vld [vmem:[%s2548_s17 + $0x5a8] sm:$0xff] }
 0x12b   : > { %1743 = vmatmul.f32.vlgmr.msra.gmra.mxu2 %v2993_v13  ;;  %1779 = vmatpush.msrb.mxu1 %v287_v35  ;;  %v770_v35 = vld [vmem:[%s2548_s17 + $0x12a8] sm:$0xff] }
 0x12c   : > { %1801 = vmatpush.msrb.mxu3 %v735_v14  ;;  %1819 = vmatpush.msrb.mxu0 %v288_v15  ;;  %v321_v14 = vld [vmem:[%s2548_s17 + $0x4a0] sm:$0xff] }
 0x12d   : > { %1841 = vmatpush.msrb.mxu2 %v736_v16  ;;  %1780 = vmatpush.msrb.mxu1 %v255_v17  ;;  %v737_v15 = vld [vmem:[%s2548_s17 + $0x11a0] sm:$0xff]  ;;  %v322_v16 = vld [vmem:[%s2548_s17 + $0x4a8] sm:$0xff] }
 0x12e   : > { %1802 = vmatpush.msrb.mxu3 %v703_v18  ;;  %1820 = vmatpush.msrb.mxu0 %v256_v19  ;;  %v738_v17 = vld [vmem:[%s2548_s17 + $0x11a8] sm:$0xff]  ;;  %v289_v18 = vld [vmem:[%s2548_s17 + $0x3a0] sm:$0xff] }
 0x12f   : > { %1842 = vmatpush.msrb.mxu2 %v704_v20  ;;  %1781 = vmatpush.msrb.mxu1 %v223_v23  ;;  %v705_v19 = vld [vmem:[%s2548_s17 + $0x10a0] sm:$0xff]  ;;  %v290_v20 = vld [vmem:[%s2548_s17 + $0x3a8] sm:$0xff]  ;;  %v676_v23 = vld [vmem:[%s2548_s17 + $0xfb8] sm:$0xff] }
 0x130   : > { %1847 = vmatpush.msra.mxu3 %v673_v21  ;;  %1821 = vmatpush.msrb.mxu0 %v224_v24  ;;  %v706_v21 = vld [vmem:[%s2548_s17 + $0x10a8] sm:$0xff] }
 0x131   : > { %1887 = vmatpush.msra.mxu2 %v674_v22  ;;  %1782 = vmatpush.msrb.mxu1 %v191_v27  ;;  %v675_v22 = vld [vmem:[%s2548_s17 + $0xfb0] sm:$0xff]  ;;  %v258_v24 = vld [vmem:[%s2548_s17 + $0x2a8] sm:$0xff]  ;;  %v225_v27 = vld [vmem:[%s2548_s17 + $0x1a0] sm:$0xff] }
 0x132   : > { %1848 = vmatpush.msra.mxu3 %v641_v25  ;;  %1822 = vmatpush.msrb.mxu0 %v192_v39  ;;  %v643_v25 = vld [vmem:[%s2548_s17 + $0xeb0] sm:$0xff]  ;;  %v226_v39 = vld [vmem:[%s2548_s17 + $0x1a8] sm:$0xff] }
 0x133   : > { %1888 = vmatpush.msra.mxu2 %v642_v26  ;;  %2470 = vmatmul.msk.f32.vlgmr.msra.gmra.mxu1 %vm1043_vm0, %v2976_v5  ;;  %v644_v26 = vld [vmem:[%s2548_s17 + $0xeb8] sm:$0xff] }
 0x134   : > { %2471 = vmatmul.msk.f32.vlgmr.msra.gmra.mxu0 %vm1043_vm0, %v2976_v5  ;;  %1849 = vmatpush.msra.mxu3 %v609_v28  ;;  %v611_v28 = vld [vmem:[%s2548_s17 + $0xdb0] sm:$0xff] }
 0x135   : > { %1872 = vmatpush.msra.mxu1 %v1025_v29  ;;  %1889 = vmatpush.msra.mxu2 %v610_v30  ;;  %v612_v29 = vld [vmem:[%s2548_s17 + $0xdb8] sm:$0xff]  ;;  %v193_v30 = vld [vmem:[%s2548_s17 + $0xa0] sm:$0xff] }
 0x136   : > { %1912 = vmatpush.msra.mxu0 %v1026_v31  ;;  %1850 = vmatpush.msra.mxu3 %v577_v32  ;;  %v579_v31 = vld [vmem:[%s2548_s17 + $0xcb0] sm:$0xff] }
 0x137   : > { %1873 = vmatpush.msra.mxu1 %v993_v33  ;;  %1890 = vmatpush.msra.mxu2 %v578_v34  ;;  %v1027_v32 = vld [vmem:[%s2548_s17 + $0x1ab0] sm:$0xff]  ;;  %v580_v33 = vld [vmem:[%s2548_s17 + $0xcb8] sm:$0xff] }
 0x138   : > { %1913 = vmatpush.msra.mxu0 %v994_v36  ;;  %1851 = vmatpush.msra.mxu3 %v545_v37  ;;  %v1028_v34 = vld [vmem:[%s2548_s17 + $0x1ab8] sm:$0xff]  ;;  %v547_v36 = vld [vmem:[%s2548_s17 + $0xbb0] sm:$0xff] }
 0x139   : > { %1874 = vmatpush.msra.mxu1 %v961_v38  ;;  %1891 = vmatpush.msra.mxu2 %v546_v40  ;;  %v1384_v49 = vpop.f32.mrf.mxu3  ;;  %v995_v37 = vld [vmem:[%s2548_s17 + $0x19b0] sm:$0xff]  ;;  %v548_v38 = vld [vmem:[%s2548_s17 + $0xbb8] sm:$0xff] }
 0x13a   : > { %1914 = vmatpush.msra.mxu0 %v962_v41  ;;  %v1424_v50 = vpop.f32.mrf.mxu2  ;;  %1852 = vmatpush.msra.mxu3 %v513_v43  ;;  %v1385_v53 = vadd.f32 %v1384_v49, %v2943_v42  ;;  %v996_v40 = vld [vmem:[%s2548_s17 + $0x19b8] sm:$0xff]  ;;  %v515_v41 = vld [vmem:[%s2548_s17 + $0xab0] sm:$0xff] }
 0x13b   : > { %1875 = vmatpush.msra.mxu1 %v929_v44  ;;  %v1425_v54 = vadd.f32 %v1424_v50, %v2943_v42  ;;  %1892 = vmatpush.msra.mxu2 %v514_v45  ;;  %v963_v43 = vld [vmem:[%s2548_s17 + $0x18b0] sm:$0xff]  ;;  %v516_v44 = vld [vmem:[%s2548_s17 + $0xab8] sm:$0xff] }
 0x13c   : > { %1915 = vmatpush.msra.mxu0 %v930_v46  ;;  %1853 = vmatpush.msra.mxu3 %v481_v47  ;;  %v1404_v59 = vpop.f32.mrf.mxu1  ;;  %v964_v45 = vld [vmem:[%s2548_s17 + $0x18b8] sm:$0xff]  ;;  %v931_v49 = vld [vmem:[%s2548_s17 + $0x17b0] sm:$0xff] }
 0x13d   : > { %1876 = vmatpush.msra.mxu1 %v897_v48  ;;  %v1444_v60 = vpop.f32.mrf.mxu0  ;;  %1893 = vmatpush.msra.mxu2 %v482_v51  ;;  %v1405_v63 = vadd.f32 %v1404_v59, %v1385_v53  ;;  %v483_v48 = vld [vmem:[%s2548_s17 + $0x9b0] sm:$0xff] }
 0x13e   : > { %1916 = vmatpush.msra.mxu0 %v898_v52  ;;  %v1445_v0 = vadd.f32 %v1444_v60, %v1425_v54  ;;  %1854 = vmatpush.msra.mxu3 %v449_v55  ;;  %v484_v54 = vld [vmem:[%s2548_s17 + $0x9b8] sm:$0xff] }
 0x13f   : > { %1877 = vmatpush.msra.mxu1 %v865_v56  ;;  %1894 = vmatpush.msra.mxu2 %v450_v57  ;;  %v2335_v6 = vmax.f32 %v1405_v63, 0.0  ;;  %v932_v55 = vld [vmem:[%s2548_s17 + $0x17b8] sm:$0xff]  ;;  %v451_v56 = vld [vmem:[%s2548_s17 + $0x8b0] sm:$0xff] }
 0x140   : > { %1917 = vmatpush.msra.mxu0 %v866_v58  ;;  %v2336_v7 = vmax.f32 %v1445_v0, 0.0  ;;  %1855 = vmatpush.msra.mxu3 %v417_v61  ;;  %v899_v57 = vld [vmem:[%s2548_s17 + $0x16b0] sm:$0xff]  ;;  %v452_v60 = vld [vmem:[%s2548_s17 + $0x8b8] sm:$0xff] }
 0x141   : > { %1878 = vmatpush.msra.mxu1 %v833_v62  ;;  %1895 = vmatpush.msra.mxu2 %v418_v1  ;;  %2367 = vst [vmem:[%s2959_s27 + $0x40] sm:$0xff] %v2335_v6  ;;  %v900_v61 = vld [vmem:[%s2548_s17 + $0x16b8] sm:$0xff]  ;;  %v419_v62 = vld [vmem:[%s2548_s17 + $0x7b0] sm:$0xff] }
 0x142   : > { %1918 = vmatpush.msra.mxu0 %v834_v2  ;;  %1856 = vmatpush.msra.mxu3 %v385_v3  ;;  %2368 = vst [vmem:[%s2959_s27 + $0x48] sm:$0xff] %v2336_v7  ;;  %v867_v63 = vld [vmem:[%s2548_s17 + $0x15b0] sm:$0xff]  ;;  %v420_v2 = vld [vmem:[%s2548_s17 + $0x7b8] sm:$0xff] }
 0x143   : > { %1879 = vmatpush.msra.mxu1 %v801_v4  ;;  %1896 = vmatpush.msra.mxu2 %v386_v8  ;;  %v868_v3 = vld [vmem:[%s2548_s17 + $0x15b8] sm:$0xff]  ;;  %v387_v4 = vld [vmem:[%s2548_s17 + $0x6b0] sm:$0xff] }
 0x144   : > { %1919 = vmatpush.msra.mxu0 %v802_v9  ;;  %1857 = vmatpush.msra.mxu3 %v353_v10  ;;  %v835_v6 = vld [vmem:[%s2548_s17 + $0x14b0] sm:$0xff]  ;;  %v388_v7 = vld [vmem:[%s2548_s17 + $0x6b8] sm:$0xff] }
 0x145   : > { %1880 = vmatpush.msra.mxu1 %v769_v11  ;;  %1897 = vmatpush.msra.mxu2 %v354_v12  ;;  %v836_v8 = vld [vmem:[%s2548_s17 + $0x14b8] sm:$0xff]  ;;  %v355_v9 = vld [vmem:[%s2548_s17 + $0x5b0] sm:$0xff] }
 0x146   : > { %1920 = vmatpush.msra.mxu0 %v770_v35  ;;  %2472 = vmatmul.msk.f32.vlgmr.msrb.gmra.mxu3 %vm1043_vm0, %v2976_v5  ;;  %v803_v10 = vld [vmem:[%s2548_s17 + $0x13b0] sm:$0xff]  ;;  %v356_v11 = vld [vmem:[%s2548_s17 + $0x5b8] sm:$0xff] }
 0x147   : > { %2473 = vmatmul.msk.f32.vlgmr.msrb.gmra.mxu2 %vm1043_vm0, %v2976_v5  ;;  %1858 = vmatpush.msra.mxu3 %v321_v14  ;;  %v257_v5 = vld [vmem:[%s2548_s17 + $0x2a0] sm:$0xff]  ;;  %v804_v12 = vld [vmem:[%s2548_s17 + $0x13b8] sm:$0xff]  ;;  %v323_v35 = vld [vmem:[%s2548_s17 + $0x4b0] sm:$0xff] }
 0x148   : > { %1881 = vmatpush.msra.mxu1 %v737_v15  ;;  %1898 = vmatpush.msra.mxu2 %v322_v16  ;;  %v771_v14 = vld [vmem:[%s2548_s17 + $0x12b0] sm:$0xff]  ;;  %v324_v15 = vld [vmem:[%s2548_s17 + $0x4b8] sm:$0xff] }
 0x149   : > { %1921 = vmatpush.msra.mxu0 %v738_v17  ;;  %1859 = vmatpush.msra.mxu3 %v289_v18  ;;  %v772_v16 = vld [vmem:[%s2548_s17 + $0x12b8] sm:$0xff]  ;;  %v291_v17 = vld [vmem:[%s2548_s17 + $0x3b0] sm:$0xff] }
 0x14a   : > { %1882 = vmatpush.msra.mxu1 %v705_v19  ;;  %1899 = vmatpush.msra.mxu2 %v290_v20  ;;  %v739_v18 = vld [vmem:[%s2548_s17 + $0x11b0] sm:$0xff]  ;;  %v292_v19 = vld [vmem:[%s2548_s17 + $0x3b8] sm:$0xff] }
 0x14b   : > { %1922 = vmatpush.msra.mxu0 %v706_v21  ;;  %1783 = vmatmul.f32.vlgmr.msrb.gmra.mxu1 %v2993_v13  ;;  %v740_v20 = vld [vmem:[%s2548_s17 + $0x11b8] sm:$0xff]  ;;  %v3308_v21 = vld [vmem:[%s3620_s1] sm:$0xff] }
 0x14c   : > { %1823 = vmatmul.f32.vlgmr.msrb.gmra.mxu0 %v2993_v13  ;;  %1927 = vmatpush.msrb.mxu1 %v675_v22  ;;  %v194_v13 = vld [vmem:[%s2548_s17 + $0xa8] sm:$0xff]  ;;  %v259_v22 = vld [vmem:[%s2548_s17 + $0x2b0] sm:$0xff] }
 0x14d   : > { %1967 = vmatpush.msrb.mxu0 %v676_v23  ;;  %1860 = vmatpush.msra.mxu3 %v257_v5  ;;  %v707_v23 = vld [vmem:[%s2548_s17 + $0x10b0] sm:$0xff]  ;;  %v260_v5 = vld [vmem:[%s2548_s17 + $0x2b8] sm:$0xff] }
 0x14e   : > { %1900 = vmatpush.msra.mxu2 %v258_v24  ;;  %1928 = vmatpush.msrb.mxu1 %v643_v25  ;;  %v708_v24 = vld [vmem:[%s2548_s17 + $0x10b8] sm:$0xff]  ;;  %v677_v25 = vld [vmem:[%s2548_s17 + $0xfc0] sm:$0xff] }
 0x14f   : > { %1968 = vmatpush.msrb.mxu0 %v644_v26  ;;  %1861 = vmatpush.msra.mxu3 %v225_v27  ;;  %v678_v26 = vld [vmem:[%s2548_s17 + $0xfc8] sm:$0xff]  ;;  %v227_v27 = vld [vmem:[%s2548_s17 + $0x1b0] sm:$0xff] }
 0x150   : > { %1901 = vmatpush.msra.mxu2 %v226_v39  ;;  %1929 = vmatpush.msrb.mxu1 %v611_v28  ;;  %v228_v39 = vld [vmem:[%s2548_s17 + $0x1b8] sm:$0xff]  ;;  %v645_v28 = vld [vmem:[%s2548_s17 + $0xec0] sm:$0xff] }
 0x151   : > { %1969 = vmatpush.msrb.mxu0 %v612_v29  ;;  %1862 = vmatpush.msra.mxu3 %v193_v30  ;;  %v646_v29 = vld [vmem:[%s2548_s17 + $0xec8] sm:$0xff]  ;;  %v195_v30 = vld [vmem:[%s2548_s17 + $0xb0] sm:$0xff] }
 0x152   : > { %1902 = vmatpush.msra.mxu2 %v194_v13  ;;  %1930 = vmatpush.msrb.mxu1 %v579_v31  ;;  %v196_v13 = vld [vmem:[%s2548_s17 + $0xb8] sm:$0xff]  ;;  %v613_v31 = vld [vmem:[%s2548_s17 + $0xdc0] sm:$0xff] }
 0x153   : > { %1952 = vmatpush.msrb.mxu3 %v1027_v32  ;;  %1970 = vmatpush.msrb.mxu0 %v580_v33  ;;  %v1029_v32 = vld [vmem:[%s2548_s17 + $0x1ac0] sm:$0xff]  ;;  %v614_v33 = vld [vmem:[%s2548_s17 + $0xdc8] sm:$0xff] }
 0x154   : > { %1992 = vmatpush.msrb.mxu2 %v1028_v34  ;;  %1931 = vmatpush.msrb.mxu1 %v547_v36  ;;  %v1464_v46 = vpop.f32.mrf.mxu1  ;;  %v1030_v34 = vld [vmem:[%s2548_s17 + $0x1ac8] sm:$0xff] }
 0x155   : > { %1953 = vmatpush.msrb.mxu3 %v995_v37  ;;  %v1504_v47 = vpop.f32.mrf.mxu0  ;;  %1971 = vmatpush.msrb.mxu0 %v548_v38  ;;  %v1465_v50 = vadd.f32 %v1464_v46, %v2943_v42  ;;  %v1484_v52 = vpop.f32.mrf.mxu3  ;;  %v3331_v36 = vld [vmem:[%s3620_s1 + $0x8] sm:$0xff]  ;;  %v581_v37 = vld [vmem:[%s2548_s17 + $0xcc0] sm:$0xff] }
 0x156   : > { %1993 = vmatpush.msrb.mxu2 %v996_v40  ;;  %v1505_v51 = vadd.f32 %v1504_v47, %v2943_v42  ;;  %v1524_v53 = vpop.f32.mrf.mxu2  ;;  %1932 = vmatpush.msrb.mxu1 %v515_v41  ;;  %v997_v38 = vld [vmem:[%s2548_s17 + $0x19c0] sm:$0xff]  ;;  %v582_v40 = vld [vmem:[%s2548_s17 + $0xcc8] sm:$0xff] }
 0x157   : > { %1954 = vmatpush.msrb.mxu3 %v963_v43  ;;  %1972 = vmatpush.msrb.mxu0 %v516_v44  ;;  %v1485_v58 = vadd.f32 %v1484_v52, %v1465_v50  ;;  %v998_v41 = vld [vmem:[%s2548_s17 + $0x19c8] sm:$0xff]  ;;  %v549_v43 = vld [vmem:[%s2548_s17 + $0xbc0] sm:$0xff] }
 0x158   : > { %1994 = vmatpush.msrb.mxu2 %v964_v45  ;;  %v1525_v59 = vadd.f32 %v1524_v53, %v1505_v51  ;;  %1933 = vmatpush.msrb.mxu1 %v483_v48  ;;  %v965_v44 = vld [vmem:[%s2548_s17 + $0x18c0] sm:$0xff]  ;;  %v550_v45 = vld [vmem:[%s2548_s17 + $0xbc8] sm:$0xff] }
 0x159   : > { %1955 = vmatpush.msrb.mxu3 %v931_v49  ;;  %1973 = vmatpush.msrb.mxu0 %v484_v54  ;;  %v2337_v0 = vmax.f32 %v1485_v58, 0.0  ;;  %v966_v46 = vld [vmem:[%s2548_s17 + $0x18c8] sm:$0xff]  ;;  %v517_v47 = vld [vmem:[%s2548_s17 + $0xac0] sm:$0xff] }
 0x15a   : > { %1995 = vmatpush.msrb.mxu2 %v932_v55  ;;  %v2338_v1 = vmax.f32 %v1525_v59, 0.0  ;;  %1934 = vmatpush.msrb.mxu1 %v451_v56  ;;  %v933_v48 = vld [vmem:[%s2548_s17 + $0x17c0] sm:$0xff]  ;;  %v518_v49 = vld [vmem:[%s2548_s17 + $0xac8] sm:$0xff] }
 0x15b   : > { %1956 = vmatpush.msrb.mxu3 %v899_v57  ;;  %1974 = vmatpush.msrb.mxu0 %v452_v60  ;;  %2369 = vst [vmem:[%s2959_s27 + $0x50] sm:$0xff] %v2337_v0  ;;  %v934_v50 = vld [vmem:[%s2548_s17 + $0x17c8] sm:$0xff]  ;;  %v485_v51 = vld [vmem:[%s2548_s17 + $0x9c0] sm:$0xff] }
 0x15c   : > { %1996 = vmatpush.msrb.mxu2 %v900_v61  ;;  %1935 = vmatpush.msrb.mxu1 %v419_v62  ;;  %2370 = vst [vmem:[%s2959_s27 + $0x58] sm:$0xff] %v2338_v1  ;;  %v901_v52 = vld [vmem:[%s2548_s17 + $0x16c0] sm:$0xff]  ;;  %v486_v55 = vld [vmem:[%s2548_s17 + $0x9c8] sm:$0xff] }
 0x15d   : > { %1957 = vmatpush.msrb.mxu3 %v867_v63  ;;  %1975 = vmatpush.msrb.mxu0 %v420_v2  ;;  %v902_v56 = vld [vmem:[%s2548_s17 + $0x16c8] sm:$0xff]  ;;  %v453_v59 = vld [vmem:[%s2548_s17 + $0x8c0] sm:$0xff] }
 0x15e   : > { %1997 = vmatpush.msrb.mxu2 %v868_v3  ;;  %1936 = vmatpush.msrb.mxu1 %v387_v4  ;;  %v869_v60 = vld [vmem:[%s2548_s17 + $0x15c0] sm:$0xff]  ;;  %v454_v61 = vld [vmem:[%s2548_s17 + $0x8c8] sm:$0xff] }
 0x15f   : > { %1958 = vmatpush.msrb.mxu3 %v835_v6  ;;  %1976 = vmatpush.msrb.mxu0 %v388_v7  ;;  %v870_v62 = vld [vmem:[%s2548_s17 + $0x15c8] sm:$0xff]  ;;  %v421_v1 = vld [vmem:[%s2548_s17 + $0x7c0] sm:$0xff] }
 0x160   : > { %1998 = vmatpush.msrb.mxu2 %v836_v8  ;;  %1937 = vmatpush.msrb.mxu1 %v355_v9  ;;  %v837_v2 = vld [vmem:[%s2548_s17 + $0x14c0] sm:$0xff]  ;;  %v422_v6 = vld [vmem:[%s2548_s17 + $0x7c8] sm:$0xff] }
 0x161   : > { %1959 = vmatpush.msrb.mxu3 %v803_v10  ;;  %1977 = vmatpush.msrb.mxu0 %v356_v11  ;;  %v838_v7 = vld [vmem:[%s2548_s17 + $0x14c8] sm:$0xff]  ;;  %v389_v8 = vld [vmem:[%s2548_s17 + $0x6c0] sm:$0xff] }
 0x162   : > { %1999 = vmatpush.msrb.mxu2 %v804_v12  ;;  %1938 = vmatpush.msrb.mxu1 %v323_v35  ;;  %v805_v9 = vld [vmem:[%s2548_s17 + $0x13c0] sm:$0xff]  ;;  %v390_v12 = vld [vmem:[%s2548_s17 + $0x6c8] sm:$0xff] }
 0x163   : > { %1960 = vmatpush.msrb.mxu3 %v771_v14  ;;  %1978 = vmatpush.msrb.mxu0 %v324_v15  ;;  %v806_v35 = vld [vmem:[%s2548_s17 + $0x13c8] sm:$0xff]  ;;  %v357_v14 = vld [vmem:[%s2548_s17 + $0x5c0] sm:$0xff] }
 0x164   : > { %2000 = vmatpush.msrb.mxu2 %v772_v16  ;;  %1863 = vmatmul.f32.vlgmr.msra.gmra.mxu3 %v3308_v21  ;;  %v773_v15 = vld [vmem:[%s2548_s17 + $0x12c0] sm:$0xff]  ;;  %v358_v16 = vld [vmem:[%s2548_s17 + $0x5c8] sm:$0xff] }
 0x165   : > { %1903 = vmatmul.f32.vlgmr.msra.gmra.mxu2 %v3308_v21  ;;  %1939 = vmatpush.msrb.mxu1 %v291_v17  ;;  %v774_v17 = vld [vmem:[%s2548_s17 + $0x12c8] sm:$0xff] }
 0x166   : > { %1961 = vmatpush.msrb.mxu3 %v739_v18  ;;  %1979 = vmatpush.msrb.mxu0 %v292_v19  ;;  %v325_v18 = vld [vmem:[%s2548_s17 + $0x4c0] sm:$0xff] }
 0x167   : > { %2001 = vmatpush.msrb.mxu2 %v740_v20  ;;  %1940 = vmatpush.msrb.mxu1 %v259_v22  ;;  %v741_v19 = vld [vmem:[%s2548_s17 + $0x11c0] sm:$0xff]  ;;  %v326_v20 = vld [vmem:[%s2548_s17 + $0x4c8] sm:$0xff] }
 0x168   : > { %1962 = vmatpush.msrb.mxu3 %v707_v23  ;;  %1980 = vmatpush.msrb.mxu0 %v260_v5  ;;  %v742_v22 = vld [vmem:[%s2548_s17 + $0x11c8] sm:$0xff]  ;;  %v293_v23 = vld [vmem:[%s2548_s17 + $0x3c0] sm:$0xff] }
 0x169   : > { %2002 = vmatpush.msrb.mxu2 %v708_v24  ;;  %1941 = vmatpush.msrb.mxu1 %v227_v27  ;;  %v709_v5 = vld [vmem:[%s2548_s17 + $0x10c0] sm:$0xff]  ;;  %v294_v24 = vld [vmem:[%s2548_s17 + $0x3c8] sm:$0xff]  ;;  %v680_v27 = vld [vmem:[%s2548_s17 + $0xfd8] sm:$0xff] }
 0x16a   : > { %2007 = vmatpush.msra.mxu3 %v677_v25  ;;  %1981 = vmatpush.msrb.mxu0 %v228_v39  ;;  %v710_v25 = vld [vmem:[%s2548_s17 + $0x10c8] sm:$0xff]  ;;  %v261_v39 = vld [vmem:[%s2548_s17 + $0x2c0] sm:$0xff] }
 0x16b   : > { %2047 = vmatpush.msra.mxu2 %v678_v26  ;;  %1942 = vmatpush.msrb.mxu1 %v195_v30  ;;  %v679_v26 = vld [vmem:[%s2548_s17 + $0xfd0] sm:$0xff]  ;;  %v648_v30 = vld [vmem:[%s2548_s17 + $0xed8] sm:$0xff] }
 0x16c   : > { %2008 = vmatpush.msra.mxu3 %v645_v28  ;;  %1982 = vmatpush.msrb.mxu0 %v196_v13  ;;  %v262_v28 = vld [vmem:[%s2548_s17 + $0x2c8] sm:$0xff]  ;;  %v229_v13 = vld [vmem:[%s2548_s17 + $0x1c0] sm:$0xff] }
 0x16d   : > { %2048 = vmatpush.msra.mxu2 %v646_v29  ;;  %2474 = vmatmul.msk.f32.vlgmr.msra.gmra.mxu1 %vm1043_vm0, %v3331_v36  ;;  %v647_v29 = vld [vmem:[%s2548_s17 + $0xed0] sm:$0xff] }
 0x16e   : > { %2475 = vmatmul.msk.f32.vlgmr.msra.gmra.mxu0 %vm1043_vm0, %v3331_v36  ;;  %2009 = vmatpush.msra.mxu3 %v613_v31  ;;  %v230_v31 = vld [vmem:[%s2548_s17 + $0x1c8] sm:$0xff] }
 0x16f   : > { %2032 = vmatpush.msra.mxu1 %v1029_v32  ;;  %2049 = vmatpush.msra.mxu2 %v614_v33  ;;  %v615_v32 = vld [vmem:[%s2548_s17 + $0xdd0] sm:$0xff]  ;;  %v616_v33 = vld [vmem:[%s2548_s17 + $0xdd8] sm:$0xff] }
 0x170   : > { %2072 = vmatpush.msra.mxu0 %v1030_v34  ;;  %2010 = vmatpush.msra.mxu3 %v581_v37  ;;  %v197_v34 = vld [vmem:[%s2548_s17 + $0xc0] sm:$0xff]  ;;  %v198_v37 = vld [vmem:[%s2548_s17 + $0xc8] sm:$0xff] }
 0x171   : > { %2033 = vmatpush.msra.mxu1 %v997_v38  ;;  %2050 = vmatpush.msra.mxu2 %v582_v40  ;;  %v583_v38 = vld [vmem:[%s2548_s17 + $0xcd0] sm:$0xff] }
 0x172   : > { %2073 = vmatpush.msra.mxu0 %v998_v41  ;;  %2011 = vmatpush.msra.mxu3 %v549_v43  ;;  %v1031_v40 = vld [vmem:[%s2548_s17 + $0x1ad0] sm:$0xff]  ;;  %v584_v41 = vld [vmem:[%s2548_s17 + $0xcd8] sm:$0xff] }
 0x173   : > { %2034 = vmatpush.msra.mxu1 %v965_v44  ;;  %2051 = vmatpush.msra.mxu2 %v550_v45  ;;  %v1544_v53 = vpop.f32.mrf.mxu3  ;;  %v1032_v43 = vld [vmem:[%s2548_s17 + $0x1ad8] sm:$0xff]  ;;  %v551_v44 = vld [vmem:[%s2548_s17 + $0xbd0] sm:$0xff] }
 0x174   : > { %2074 = vmatpush.msra.mxu0 %v966_v46  ;;  %v1584_v54 = vpop.f32.mrf.mxu2  ;;  %2012 = vmatpush.msra.mxu3 %v517_v47  ;;  %v1545_v57 = vadd.f32 %v1544_v53, %v2943_v42  ;;  %v999_v45 = vld [vmem:[%s2548_s17 + $0x19d0] sm:$0xff]  ;;  %v552_v46 = vld [vmem:[%s2548_s17 + $0xbd8] sm:$0xff] }
 0x175   : > { %2035 = vmatpush.msra.mxu1 %v933_v48  ;;  %v1585_v58 = vadd.f32 %v1584_v54, %v2943_v42  ;;  %2052 = vmatpush.msra.mxu2 %v518_v49  ;;  %v1000_v47 = vld [vmem:[%s2548_s17 + $0x19d8] sm:$0xff]  ;;  %v519_v48 = vld [vmem:[%s2548_s17 + $0xad0] sm:$0xff] }
 0x176   : > { %2075 = vmatpush.msra.mxu0 %v934_v50  ;;  %2013 = vmatpush.msra.mxu3 %v485_v51  ;;  %v1564_v63 = vpop.f32.mrf.mxu1  ;;  %v967_v49 = vld [vmem:[%s2548_s17 + $0x18d0] sm:$0xff]  ;;  %v520_v50 = vld [vmem:[%s2548_s17 + $0xad8] sm:$0xff] }
 0x177   : > { %2036 = vmatpush.msra.mxu1 %v901_v52  ;;  %v1604_v0 = vpop.f32.mrf.mxu0  ;;  %2053 = vmatpush.msra.mxu2 %v486_v55  ;;  %v1565_v3 = vadd.f32 %v1564_v63, %v1545_v57  ;;  %v968_v51 = vld [vmem:[%s2548_s17 + $0x18d8] sm:$0xff]  ;;  %v487_v54 = vld [vmem:[%s2548_s17 + $0x9d0] sm:$0xff] }
 0x178   : > { %2076 = vmatpush.msra.mxu0 %v902_v56  ;;  %v1605_v4 = vadd.f32 %v1604_v0, %v1585_v58  ;;  %2014 = vmatpush.msra.mxu3 %v453_v59  ;;  %v935_v55 = vld [vmem:[%s2548_s17 + $0x17d0] sm:$0xff] }
 0x179   : > { %2037 = vmatpush.msra.mxu1 %v869_v60  ;;  %2054 = vmatpush.msra.mxu2 %v454_v61  ;;  %v2339_v10 = vmax.f32 %v1565_v3, 0.0  ;;  %v488_v60 = vld [vmem:[%s2548_s17 + $0x9d8] sm:$0xff]  ;;  %v903_v63 = vld [vmem:[%s2548_s17 + $0x16d0] sm:$0xff] }
 0x17a   : > { %2077 = vmatpush.msra.mxu0 %v870_v62  ;;  %v2340_v11 = vmax.f32 %v1605_v4, 0.0  ;;  %2015 = vmatpush.msra.mxu3 %v421_v1  ;;  %v936_v61 = vld [vmem:[%s2548_s17 + $0x17d8] sm:$0xff]  ;;  %v455_v62 = vld [vmem:[%s2548_s17 + $0x8d0] sm:$0xff] }
 0x17b   : > { %2038 = vmatpush.msra.mxu1 %v837_v2  ;;  %2055 = vmatpush.msra.mxu2 %v422_v6  ;;  %2371 = vst [vmem:[%s2959_s27 + $0x60] sm:$0xff] %v2339_v10  ;;  %v456_v2 = vld [vmem:[%s2548_s17 + $0x8d8] sm:$0xff]  ;;  %v423_v4 = vld [vmem:[%s2548_s17 + $0x7d0] sm:$0xff] }
 0x17c   : > { %2078 = vmatpush.msra.mxu0 %v838_v7  ;;  %2016 = vmatpush.msra.mxu3 %v389_v8  ;;  %2372 = vst [vmem:[%s2959_s27 + $0x68] sm:$0xff] %v2340_v11  ;;  %v904_v3 = vld [vmem:[%s2548_s17 + $0x16d8] sm:$0xff]  ;;  %v871_v6 = vld [vmem:[%s2548_s17 + $0x15d0] sm:$0xff] }
 0x17d   : > { %2039 = vmatpush.msra.mxu1 %v805_v9  ;;  %2056 = vmatpush.msra.mxu2 %v390_v12  ;;  %v424_v9 = vld [vmem:[%s2548_s17 + $0x7d8] sm:$0xff]  ;;  %v391_v11 = vld [vmem:[%s2548_s17 + $0x6d0] sm:$0xff] }
 0x17e   : > { %2079 = vmatpush.msra.mxu0 %v806_v35  ;;  %2017 = vmatpush.msra.mxu3 %v357_v14  ;;  %v872_v10 = vld [vmem:[%s2548_s17 + $0x15d8] sm:$0xff]  ;;  %v839_v12 = vld [vmem:[%s2548_s17 + $0x14d0] sm:$0xff] }
 0x17f   : > { %2040 = vmatpush.msra.mxu1 %v773_v15  ;;  %2057 = vmatpush.msra.mxu2 %v358_v16  ;;  %v392_v35 = vld [vmem:[%s2548_s17 + $0x6d8] sm:$0xff]  ;;  %v359_v15 = vld [vmem:[%s2548_s17 + $0x5d0] sm:$0xff] }
 0x180   : > { %2080 = vmatpush.msra.mxu0 %v774_v17  ;;  %2476 = vmatmul.msk.f32.vlgmr.msrb.gmra.mxu3 %vm1043_vm0, %v3331_v36  ;;  %v840_v14 = vld [vmem:[%s2548_s17 + $0x14d8] sm:$0xff]  ;;  %v807_v16 = vld [vmem:[%s2548_s17 + $0x13d0] sm:$0xff] }
 0x181   : > { %2477 = vmatmul.msk.f32.vlgmr.msrb.gmra.mxu2 %vm1043_vm0, %v3331_v36  ;;  %2018 = vmatpush.msra.mxu3 %v325_v18  ;;  %v360_v17 = vld [vmem:[%s2548_s17 + $0x5d8] sm:$0xff] }
 0x182   : > { %2041 = vmatpush.msra.mxu1 %v741_v19  ;;  %2058 = vmatpush.msra.mxu2 %v326_v20  ;;  %v808_v18 = vld [vmem:[%s2548_s17 + $0x13d8] sm:$0xff]  ;;  %v327_v19 = vld [vmem:[%s2548_s17 + $0x4d0] sm:$0xff] }
 0x183   : > { %2081 = vmatpush.msra.mxu0 %v742_v22  ;;  %2019 = vmatpush.msra.mxu3 %v293_v23  ;;  %v775_v20 = vld [vmem:[%s2548_s17 + $0x12d0] sm:$0xff]  ;;  %v328_v22 = vld [vmem:[%s2548_s17 + $0x4d8] sm:$0xff] }
 0x184   : > { %2042 = vmatpush.msra.mxu1 %v709_v5  ;;  %2059 = vmatpush.msra.mxu2 %v294_v24  ;;  %v776_v23 = vld [vmem:[%s2548_s17 + $0x12d8] sm:$0xff]  ;;  %v295_v5 = vld [vmem:[%s2548_s17 + $0x3d0] sm:$0xff] }
 0x185   : > { %2082 = vmatpush.msra.mxu0 %v710_v25  ;;  %1943 = vmatmul.f32.vlgmr.msrb.gmra.mxu1 %v3308_v21  ;;  %v743_v24 = vld [vmem:[%s2548_s17 + $0x11d0] sm:$0xff]  ;;  %v296_v25 = vld [vmem:[%s2548_s17 + $0x3d8] sm:$0xff] }
 0x186   : > { %1983 = vmatmul.f32.vlgmr.msrb.gmra.mxu0 %v3308_v21  ;;  %2087 = vmatpush.msrb.mxu1 %v679_v26  ;;  %v744_v26 = vld [vmem:[%s2548_s17 + $0x11d8] sm:$0xff] }
 0x187   : > { %2127 = vmatpush.msrb.mxu0 %v680_v27  ;;  %2020 = vmatpush.msra.mxu3 %v261_v39  ;;  %v263_v27 = vld [vmem:[%s2548_s17 + $0x2d0] sm:$0xff] }
 0x188   : > { %2060 = vmatpush.msra.mxu2 %v262_v28  ;;  %2088 = vmatpush.msrb.mxu1 %v647_v29  ;;  %v711_v39 = vld [vmem:[%s2548_s17 + $0x10d0] sm:$0xff]  ;;  %v264_v28 = vld [vmem:[%s2548_s17 + $0x2d8] sm:$0xff] }
 0x189   : > { %2128 = vmatpush.msrb.mxu0 %v648_v30  ;;  %2021 = vmatpush.msra.mxu3 %v229_v13  ;;  %v712_v29 = vld [vmem:[%s2548_s17 + $0x10d8] sm:$0xff]  ;;  %v681_v30 = vld [vmem:[%s2548_s17 + $0xfe0] sm:$0xff]  ;;  %v682_v13 = vld [vmem:[%s2548_s17 + $0xfe8] sm:$0xff] }
 0x18a   : > { %2061 = vmatpush.msra.mxu2 %v230_v31  ;;  %2089 = vmatpush.msrb.mxu1 %v615_v32  ;;  %v231_v31 = vld [vmem:[%s2548_s17 + $0x1d0] sm:$0xff]  ;;  %v232_v32 = vld [vmem:[%s2548_s17 + $0x1d8] sm:$0xff] }
 0x18b   : > { %2129 = vmatpush.msrb.mxu0 %v616_v33  ;;  %2022 = vmatpush.msra.mxu3 %v197_v34  ;;  %v649_v33 = vld [vmem:[%s2548_s17 + $0xee0] sm:$0xff]  ;;  %v650_v34 = vld [vmem:[%s2548_s17 + $0xee8] sm:$0xff] }
 0x18c   : > { %2062 = vmatpush.msra.mxu2 %v198_v37  ;;  %2090 = vmatpush.msrb.mxu1 %v583_v38  ;;  %v199_v37 = vld [vmem:[%s2548_s17 + $0xd0] sm:$0xff]  ;;  %v200_v38 = vld [vmem:[%s2548_s17 + $0xd8] sm:$0xff] }
 0x18d   : > { %2112 = vmatpush.msrb.mxu3 %v1031_v40  ;;  %2130 = vmatpush.msrb.mxu0 %v584_v41  ;;  %v617_v40 = vld [vmem:[%s2548_s17 + $0xde0] sm:$0xff] }
 0x18e   : > { %2152 = vmatpush.msrb.mxu2 %v1032_v43  ;;  %2091 = vmatpush.msrb.mxu1 %v551_v44  ;;  %v1624_v52 = vpop.f32.mrf.mxu1  ;;  %v1033_v41 = vld [vmem:[%s2548_s17 + $0x1ae0] sm:$0xff]  ;;  %v618_v43 = vld [vmem:[%s2548_s17 + $0xde8] sm:$0xff] }
 0x18f   : > { %2113 = vmatpush.msrb.mxu3 %v999_v45  ;;  %v1664_v53 = vpop.f32.mrf.mxu0  ;;  %2131 = vmatpush.msrb.mxu0 %v552_v46  ;;  %v1625_v56 = vadd.f32 %v1624_v52, %v2943_v42  ;;  %v1644_v58 = vpop.f32.mrf.mxu3  ;;  %v1034_v44 = vld [vmem:[%s2548_s17 + $0x1ae8] sm:$0xff]  ;;  %v585_v45 = vld [vmem:[%s2548_s17 + $0xce0] sm:$0xff] }
 0x190   : > { %2153 = vmatpush.msrb.mxu2 %v1000_v47  ;;  %v1665_v57 = vadd.f32 %v1664_v53, %v2943_v42  ;;  %v1684_v59 = vpop.f32.mrf.mxu2  ;;  %2092 = vmatpush.msrb.mxu1 %v519_v48  ;;  %v1001_v46 = vld [vmem:[%s2548_s17 + $0x19e0] sm:$0xff]  ;;  %v586_v47 = vld [vmem:[%s2548_s17 + $0xce8] sm:$0xff] }
 0x191   : > { %2114 = vmatpush.msrb.mxu3 %v967_v49  ;;  %2132 = vmatpush.msrb.mxu0 %v520_v50  ;;  %v1645_v0 = vadd.f32 %v1644_v58, %v1625_v56  ;;  %v1002_v48 = vld [vmem:[%s2548_s17 + $0x19e8] sm:$0xff]  ;;  %v553_v49 = vld [vmem:[%s2548_s17 + $0xbe0] sm:$0xff] }
 0x192   : > { %2154 = vmatpush.msrb.mxu2 %v968_v51  ;;  %v1685_v1 = vadd.f32 %v1684_v59, %v1665_v57  ;;  %2093 = vmatpush.msrb.mxu1 %v487_v54  ;;  %v969_v50 = vld [vmem:[%s2548_s17 + $0x18e0] sm:$0xff]  ;;  %v554_v51 = vld [vmem:[%s2548_s17 + $0xbe8] sm:$0xff] }
 0x193   : > { %2115 = vmatpush.msrb.mxu3 %v935_v55  ;;  %2133 = vmatpush.msrb.mxu0 %v488_v60  ;;  %v2341_v7 = vmax.f32 %v1645_v0, 0.0  ;;  %v970_v52 = vld [vmem:[%s2548_s17 + $0x18e8] sm:$0xff]  ;;  %v521_v53 = vld [vmem:[%s2548_s17 + $0xae0] sm:$0xff] }
 0x194   : > { %2155 = vmatpush.msrb.mxu2 %v936_v61  ;;  %v2342_v8 = vmax.f32 %v1685_v1, 0.0  ;;  %2094 = vmatpush.msrb.mxu1 %v455_v62  ;;  %v937_v54 = vld [vmem:[%s2548_s17 + $0x17e0] sm:$0xff]  ;;  %v522_v55 = vld [vmem:[%s2548_s17 + $0xae8] sm:$0xff] }
 0x195   : > { %2116 = vmatpush.msrb.mxu3 %v903_v63  ;;  %2134 = vmatpush.msrb.mxu0 %v456_v2  ;;  %2373 = vst [vmem:[%s2959_s27 + $0x70] sm:$0xff] %v2341_v7  ;;  %v938_v56 = vld [vmem:[%s2548_s17 + $0x17e8] sm:$0xff]  ;;  %v489_v57 = vld [vmem:[%s2548_s17 + $0x9e0] sm:$0xff] }
 0x196   : > { %2156 = vmatpush.msrb.mxu2 %v904_v3  ;;  %2095 = vmatpush.msrb.mxu1 %v423_v4  ;;  %2374 = vst [vmem:[%s2959_s27 + $0x78] sm:$0xff] %v2342_v8  ;;  %v905_v58 = vld [vmem:[%s2548_s17 + $0x16e0] sm:$0xff]  ;;  %v490_v61 = vld [vmem:[%s2548_s17 + $0x9e8] sm:$0xff] }
 0x197   : > { %2117 = vmatpush.msrb.mxu3 %v871_v6  ;;  %2135 = vmatpush.msrb.mxu0 %v424_v9  ;;  %v906_v62 = vld [vmem:[%s2548_s17 + $0x16e8] sm:$0xff]  ;;  %v457_v1 = vld [vmem:[%s2548_s17 + $0x8e0] sm:$0xff] }
 0x198   : > { %2157 = vmatpush.msrb.mxu2 %v872_v10  ;;  %2096 = vmatpush.msrb.mxu1 %v391_v11  ;;  %v873_v2 = vld [vmem:[%s2548_s17 + $0x15e0] sm:$0xff]  ;;  %v458_v3 = vld [vmem:[%s2548_s17 + $0x8e8] sm:$0xff] }
 0x199   : > { %2118 = vmatpush.msrb.mxu3 %v839_v12  ;;  %2136 = vmatpush.msrb.mxu0 %v392_v35  ;;  %v874_v4 = vld [vmem:[%s2548_s17 + $0x15e8] sm:$0xff]  ;;  %v425_v8 = vld [vmem:[%s2548_s17 + $0x7e0] sm:$0xff] }
 0x19a   : > { %2158 = vmatpush.msrb.mxu2 %v840_v14  ;;  %2097 = vmatpush.msrb.mxu1 %v359_v15  ;;  %v841_v9 = vld [vmem:[%s2548_s17 + $0x14e0] sm:$0xff]  ;;  %v426_v12 = vld [vmem:[%s2548_s17 + $0x7e8] sm:$0xff] }
 0x19b   : > { %2119 = vmatpush.msrb.mxu3 %v807_v16  ;;  %2137 = vmatpush.msrb.mxu0 %v360_v17  ;;  %v842_v35 = vld [vmem:[%s2548_s17 + $0x14e8] sm:$0xff]  ;;  %v393_v14 = vld [vmem:[%s2548_s17 + $0x6e0] sm:$0xff] }
 0x19c   : > { %2159 = vmatpush.msrb.mxu2 %v808_v18  ;;  %2098 = vmatpush.msrb.mxu1 %v327_v19  ;;  %v809_v15 = vld [vmem:[%s2548_s17 + $0x13e0] sm:$0xff]  ;;  %v394_v18 = vld [vmem:[%s2548_s17 + $0x6e8] sm:$0xff] }
 0x19d   : > { %2120 = vmatpush.msrb.mxu3 %v775_v20  ;;  %2138 = vmatpush.msrb.mxu0 %v328_v22  ;;  %v810_v19 = vld [vmem:[%s2548_s17 + $0x13e8] sm:$0xff]  ;;  %v361_v20 = vld [vmem:[%s2548_s17 + $0x5e0] sm:$0xff] }
 0x19e   : > { %2160 = vmatpush.msrb.mxu2 %v776_v23  ;;  %2023 = vmatmul.f32.vlgmr.msra.gmra.mxu3 %v3308_v21  ;;  %v777_v22 = vld [vmem:[%s2548_s17 + $0x12e0] sm:$0xff]  ;;  %v362_v23 = vld [vmem:[%s2548_s17 + $0x5e8] sm:$0xff] }
 0x19f   : > { %2063 = vmatmul.f32.vlgmr.msra.gmra.mxu2 %v3308_v21  ;;  %2099 = vmatpush.msrb.mxu1 %v295_v5  ;;  %v778_v5 = vld [vmem:[%s2548_s17 + $0x12e8] sm:$0xff] }
 0x1a0   : > { %2121 = vmatpush.msrb.mxu3 %v743_v24  ;;  %2139 = vmatpush.msrb.mxu0 %v296_v25  ;;  %v329_v24 = vld [vmem:[%s2548_s17 + $0x4e0] sm:$0xff] }
 0x1a1   : > { %2161 = vmatpush.msrb.mxu2 %v744_v26  ;;  %2100 = vmatpush.msrb.mxu1 %v263_v27  ;;  %v745_v25 = vld [vmem:[%s2548_s17 + $0x11e0] sm:$0xff]  ;;  %v330_v26 = vld [vmem:[%s2548_s17 + $0x4e8] sm:$0xff] }
 0x1a2   : > { %2122 = vmatpush.msrb.mxu3 %v711_v39  ;;  %2140 = vmatpush.msrb.mxu0 %v264_v28  ;;  %v746_v27 = vld [vmem:[%s2548_s17 + $0x11e8] sm:$0xff]  ;;  %v297_v39 = vld [vmem:[%s2548_s17 + $0x3e0] sm:$0xff] }
 0x1a3   : > { %2162 = vmatpush.msrb.mxu2 %v712_v29  ;;  %2101 = vmatpush.msrb.mxu1 %v231_v31  ;;  %v713_v28 = vld [vmem:[%s2548_s17 + $0x10e0] sm:$0xff]  ;;  %v298_v29 = vld [vmem:[%s2548_s17 + $0x3e8] sm:$0xff]  ;;  %v684_v31 = vld [vmem:[%s2548_s17 + $0xff8] sm:$0xff] }
 0x1a4   : > { %2167 = vmatpush.msra.mxu3 %v681_v30  ;;  %2141 = vmatpush.msrb.mxu0 %v232_v32  ;;  %v714_v30 = vld [vmem:[%s2548_s17 + $0x10e8] sm:$0xff]  ;;  %v265_v32 = vld [vmem:[%s2548_s17 + $0x2e0] sm:$0xff] }
 0x1a5   : > { %2207 = vmatpush.msra.mxu2 %v682_v13  ;;  %2102 = vmatpush.msrb.mxu1 %v199_v37  ;;  %v683_v13 = vld [vmem:[%s2548_s17 + $0xff0] sm:$0xff]  ;;  %v652_v37 = vld [vmem:[%s2548_s17 + $0xef8] sm:$0xff] }
 0x1a6   : > { %2168 = vmatpush.msra.mxu3 %v649_v33  ;;  %2142 = vmatpush.msrb.mxu0 %v200_v38  ;;  %v266_v33 = vld [vmem:[%s2548_s17 + $0x2e8] sm:$0xff]  ;;  %v233_v38 = vld [vmem:[%s2548_s17 + $0x1e0] sm:$0xff] }
 0x1a7   : > { %2208 = vmatpush.msra.mxu2 %v650_v34  ;;  %2478 = vmatmul.msk.f32.vlgmr.msra.gmra.mxu1 %vm1043_vm0, %v3331_v36  ;;  %v651_v34 = vld [vmem:[%s2548_s17 + $0xef0] sm:$0xff] }
 0x1a8   : > { %2479 = vmatmul.msk.f32.vlgmr.msra.gmra.mxu0 %vm1043_vm0, %v3331_v36  ;;  %2169 = vmatpush.msra.mxu3 %v617_v40  ;;  %v234_v40 = vld [vmem:[%s2548_s17 + $0x1e8] sm:$0xff] }
 0x1a9   : > { %2192 = vmatpush.msra.mxu1 %v1033_v41  ;;  %2209 = vmatpush.msra.mxu2 %v618_v43  ;;  %v619_v41 = vld [vmem:[%s2548_s17 + $0xdf0] sm:$0xff]  ;;  %v620_v43 = vld [vmem:[%s2548_s17 + $0xdf8] sm:$0xff] }
 0x1aa   : > { %2232 = vmatpush.msra.mxu0 %v1034_v44  ;;  %2170 = vmatpush.msra.mxu3 %v585_v45  ;;  %v201_v44 = vld [vmem:[%s2548_s17 + $0xe0] sm:$0xff]  ;;  %v202_v45 = vld [vmem:[%s2548_s17 + $0xe8] sm:$0xff] }
 0x1ab   : > { %2193 = vmatpush.msra.mxu1 %v1001_v46  ;;  %2210 = vmatpush.msra.mxu2 %v586_v47  ;;  %v587_v46 = vld [vmem:[%s2548_s17 + $0xcf0] sm:$0xff] }
 0x1ac   : > { %2233 = vmatpush.msra.mxu0 %v1002_v48  ;;  %2171 = vmatpush.msra.mxu3 %v553_v49  ;;  %v1035_v47 = vld [vmem:[%s2548_s17 + $0x1af0] sm:$0xff]  ;;  %v588_v48 = vld [vmem:[%s2548_s17 + $0xcf8] sm:$0xff] }
 0x1ad   : > { %2194 = vmatpush.msra.mxu1 %v969_v50  ;;  %2211 = vmatpush.msra.mxu2 %v554_v51  ;;  %v1704_v59 = vpop.f32.mrf.mxu3  ;;  %v1036_v49 = vld [vmem:[%s2548_s17 + $0x1af8] sm:$0xff]  ;;  %v555_v50 = vld [vmem:[%s2548_s17 + $0xbf0] sm:$0xff] }
 0x1ae   : > { %2234 = vmatpush.msra.mxu0 %v970_v52  ;;  %v1744_v60 = vpop.f32.mrf.mxu2  ;;  %2172 = vmatpush.msra.mxu3 %v521_v53  ;;  %v1705_v63 = vadd.f32 %v1704_v59, %v2943_v42  ;;  %v1003_v51 = vld [vmem:[%s2548_s17 + $0x19f0] sm:$0xff]  ;;  %v556_v52 = vld [vmem:[%s2548_s17 + $0xbf8] sm:$0xff] }
 0x1af   : > { %2195 = vmatpush.msra.mxu1 %v937_v54  ;;  %v1745_v0 = vadd.f32 %v1744_v60, %v2943_v42  ;;  %2212 = vmatpush.msra.mxu2 %v522_v55  ;;  %v1004_v53 = vld [vmem:[%s2548_s17 + $0x19f8] sm:$0xff]  ;;  %v523_v54 = vld [vmem:[%s2548_s17 + $0xaf0] sm:$0xff] }
 0x1b0   : > { %2235 = vmatpush.msra.mxu0 %v938_v56  ;;  %2173 = vmatpush.msra.mxu3 %v489_v57  ;;  %v1724_v6 = vpop.f32.mrf.mxu1  ;;  %v971_v55 = vld [vmem:[%s2548_s17 + $0x18f0] sm:$0xff]  ;;  %v524_v56 = vld [vmem:[%s2548_s17 + $0xaf8] sm:$0xff] }
 0x1b1   : > { %2196 = vmatpush.msra.mxu1 %v905_v58  ;;  %v1764_v7 = vpop.f32.mrf.mxu0  ;;  %2213 = vmatpush.msra.mxu2 %v490_v61  ;;  %v1725_v10 = vadd.f32 %v1724_v6, %v1705_v63  ;;  %v972_v57 = vld [vmem:[%s2548_s17 + $0x18f8] sm:$0xff]  ;;  %v491_v60 = vld [vmem:[%s2548_s17 + $0x9f0] sm:$0xff] }
 0x1b2   : > { %2236 = vmatpush.msra.mxu0 %v906_v62  ;;  %v1765_v11 = vadd.f32 %v1764_v7, %v1745_v0  ;;  %2174 = vmatpush.msra.mxu3 %v457_v1  ;;  %v939_v61 = vld [vmem:[%s2548_s17 + $0x17f0] sm:$0xff] }
 0x1b3   : > { %2197 = vmatpush.msra.mxu1 %v873_v2  ;;  %2214 = vmatpush.msra.mxu2 %v458_v3  ;;  %v2343_v16 = vmax.f32 %v1725_v10, 0.0  ;;  %v492_v2 = vld [vmem:[%s2548_s17 + $0x9f8] sm:$0xff]  ;;  %v907_v6 = vld [vmem:[%s2548_s17 + $0x16f0] sm:$0xff] }
 0x1b4   : > { %2237 = vmatpush.msra.mxu0 %v874_v4  ;;  %v2344_v17 = vmax.f32 %v1765_v11, 0.0  ;;  %2175 = vmatpush.msra.mxu3 %v425_v8  ;;  %v940_v3 = vld [vmem:[%s2548_s17 + $0x17f8] sm:$0xff]  ;;  %v459_v4 = vld [vmem:[%s2548_s17 + $0x8f0] sm:$0xff] }
 0x1b5   : > { %2198 = vmatpush.msra.mxu1 %v841_v9  ;;  %2215 = vmatpush.msra.mxu2 %v426_v12  ;;  %2375 = vst [vmem:[%s2959_s27 + $0x80] sm:$0xff] %v2343_v16  ;;  %v460_v9 = vld [vmem:[%s2548_s17 + $0x8f8] sm:$0xff] }
 0x1b6   : > { %2238 = vmatpush.msra.mxu0 %v842_v35  ;;  %2176 = vmatpush.msra.mxu3 %v393_v14  ;;  %2376 = vst [vmem:[%s2959_s27 + $0x88] sm:$0xff] %v2344_v17  ;;  %v908_v10 = vld [vmem:[%s2548_s17 + $0x16f8] sm:$0xff]  ;;  %v427_v35 = vld [vmem:[%s2548_s17 + $0x7f0] sm:$0xff] }
 0x1b7   : > { %2199 = vmatpush.msra.mxu1 %v809_v15  ;;  %2216 = vmatpush.msra.mxu2 %v394_v18  ;;  %v875_v14 = vld [vmem:[%s2548_s17 + $0x15f0] sm:$0xff]  ;;  %v428_v15 = vld [vmem:[%s2548_s17 + $0x7f8] sm:$0xff] }
 0x1b8   : > { %2239 = vmatpush.msra.mxu0 %v810_v19  ;;  %2177 = vmatpush.msra.mxu3 %v361_v20  ;;  %v876_v16 = vld [vmem:[%s2548_s17 + $0x15f8] sm:$0xff]  ;;  %v395_v17 = vld [vmem:[%s2548_s17 + $0x6f0] sm:$0xff] }
 0x1b9   : > { %2200 = vmatpush.msra.mxu1 %v777_v22  ;;  %2217 = vmatpush.msra.mxu2 %v362_v23  ;;  %v843_v18 = vld [vmem:[%s2548_s17 + $0x14f0] sm:$0xff]  ;;  %v396_v19 = vld [vmem:[%s2548_s17 + $0x6f8] sm:$0xff] }
 0x1ba   : > { %2240 = vmatpush.msra.mxu0 %v778_v5  ;;  %2480 = vmatmul.msk.f32.vlgmr.msrb.gmra.mxu3 %vm1043_vm0, %v3331_v36  ;;  %v844_v20 = vld [vmem:[%s2548_s17 + $0x14f8] sm:$0xff]  ;;  %v363_v22 = vld [vmem:[%s2548_s17 + $0x5f0] sm:$0xff] }
 0x1bb   : > { %2481 = vmatmul.msk.f32.vlgmr.msrb.gmra.mxu2 %vm1043_vm0, %v3331_v36  ;;  %2178 = vmatpush.msra.mxu3 %v329_v24  ;;  %v811_v23 = vld [vmem:[%s2548_s17 + $0x13f0] sm:$0xff]  ;;  %v812_v5 = vld [vmem:[%s2548_s17 + $0x13f8] sm:$0xff] }
 0x1bc   : > { %2201 = vmatpush.msra.mxu1 %v745_v25  ;;  %2218 = vmatpush.msra.mxu2 %v330_v26  ;;  %v331_v24 = vld [vmem:[%s2548_s17 + $0x4f0] sm:$0xff]  ;;  %v332_v26 = vld [vmem:[%s2548_s17 + $0x4f8] sm:$0xff] }
 0x1bd   : > { %2241 = vmatpush.msra.mxu0 %v746_v27  ;;  %2179 = vmatpush.msra.mxu3 %v297_v39  ;;  %v779_v25 = vld [vmem:[%s2548_s17 + $0x12f0] sm:$0xff]  ;;  %v780_v27 = vld [vmem:[%s2548_s17 + $0x12f8] sm:$0xff] }
 0x1be   : > { %2202 = vmatpush.msra.mxu1 %v713_v28  ;;  %2219 = vmatpush.msra.mxu2 %v298_v29  ;;  %v299_v39 = vld [vmem:[%s2548_s17 + $0x3f0] sm:$0xff]  ;;  %v300_v29 = vld [vmem:[%s2548_s17 + $0x3f8] sm:$0xff] }
 0x1bf   : > { %2242 = vmatpush.msra.mxu0 %v714_v30  ;;  %2103 = vmatmul.f32.vlgmr.msrb.gmra.mxu1 %v3308_v21  ;;  %v747_v28 = vld [vmem:[%s2548_s17 + $0x11f0] sm:$0xff]  ;;  %v748_v30 = vld [vmem:[%s2548_s17 + $0x11f8] sm:$0xff] }
 0x1c0   : > { %2143 = vmatmul.f32.vlgmr.msrb.gmra.mxu0 %v3308_v21  ;;  %2247 = vmatpush.msrb.mxu1 %v683_v13  ;;  %v267_v13 = vld [vmem:[%s2548_s17 + $0x2f0] sm:$0xff] }
 0x1c1   : > { %2287 = vmatpush.msrb.mxu0 %v684_v31  ;;  %2180 = vmatpush.msra.mxu3 %v265_v32  ;;  %v715_v31 = vld [vmem:[%s2548_s17 + $0x10f0] sm:$0xff]  ;;  %v268_v32 = vld [vmem:[%s2548_s17 + $0x2f8] sm:$0xff] }
 0x1c2   : > { %2220 = vmatpush.msra.mxu2 %v266_v33  ;;  %2248 = vmatpush.msrb.mxu1 %v651_v34  ;;  %v716_v33 = vld [vmem:[%s2548_s17 + $0x10f8] sm:$0xff]  ;;  %v235_v34 = vld [vmem:[%s2548_s17 + $0x1f0] sm:$0xff] }
 0x1c3   : > { %2288 = vmatpush.msrb.mxu0 %v652_v37  ;;  %2181 = vmatpush.msra.mxu3 %v233_v38  ;;  %v236_v37 = vld [vmem:[%s2548_s17 + $0x1f8] sm:$0xff]  ;;  %v203_v38 = vld [vmem:[%s2548_s17 + $0xf0] sm:$0xff] }
 0x1c4   : > { %2221 = vmatpush.msra.mxu2 %v234_v40  ;;  %2249 = vmatpush.msrb.mxu1 %v619_v41  ;;  %v204_v40 = vld [vmem:[%s2548_s17 + $0xf8] sm:$0xff]  ;;  %v2504_v41 = vld [vmem:[%s3620_s1] sm:$0xff] }
 0x1c5   : > { %2289 = vmatpush.msrb.mxu0 %v620_v43  ;;  %2182 = vmatpush.msra.mxu3 %v201_v44 }
 0x1c6   : > { %2222 = vmatpush.msra.mxu2 %v202_v45  ;;  %2250 = vmatpush.msrb.mxu1 %v587_v46 }
 0x1c7   : > { %2272 = vmatpush.msrb.mxu3 %v1035_v47  ;;  %2290 = vmatpush.msrb.mxu0 %v588_v48 }
 0x1c8   : > { %2312 = vmatpush.msrb.mxu2 %v1036_v49  ;;  %2251 = vmatpush.msrb.mxu1 %v555_v50  ;;  %v1784_v58 = vpop.f32.mrf.mxu1 }
 0x1c9   : > { %2273 = vmatpush.msrb.mxu3 %v1003_v51  ;;  %v1824_v59 = vpop.f32.mrf.mxu0  ;;  %2291 = vmatpush.msrb.mxu0 %v556_v52  ;;  %v1785_v62 = vadd.f32 %v1784_v58, %v2943_v42  ;;  %v1804_v0 = vpop.f32.mrf.mxu3 }
 0x1ca   : > { %2313 = vmatpush.msrb.mxu2 %v1004_v53  ;;  %v1825_v63 = vadd.f32 %v1824_v59, %v2943_v42  ;;  %v1844_v1 = vpop.f32.mrf.mxu2  ;;  %2252 = vmatpush.msrb.mxu1 %v523_v54 }
 0x1cb   : > { %2274 = vmatpush.msrb.mxu3 %v971_v55  ;;  %2292 = vmatpush.msrb.mxu0 %v524_v56  ;;  %v1805_v7 = vadd.f32 %v1804_v0, %v1785_v62 }
 0x1cc   : > { %2314 = vmatpush.msrb.mxu2 %v972_v57  ;;  %v1845_v8 = vadd.f32 %v1844_v1, %v1825_v63  ;;  %2253 = vmatpush.msrb.mxu1 %v491_v60 }
 0x1cd   : > { %2275 = vmatpush.msrb.mxu3 %v939_v61  ;;  %2293 = vmatpush.msrb.mxu0 %v492_v2  ;;  %v2345_v11 = vmax.f32 %v1805_v7, 0.0 }
 0x1ce   : > { %2315 = vmatpush.msrb.mxu2 %v940_v3  ;;  %v2346_v12 = vmax.f32 %v1845_v8, 0.0  ;;  %2254 = vmatpush.msrb.mxu1 %v459_v4 }
 0x1cf   : > { %2276 = vmatpush.msrb.mxu3 %v907_v6  ;;  %2294 = vmatpush.msrb.mxu0 %v460_v9  ;;  %2377 = vst [vmem:[%s2959_s27 + $0x90] sm:$0xff] %v2345_v11 }
 0x1d0   : > { %2316 = vmatpush.msrb.mxu2 %v908_v10  ;;  %2183 = vmatmul.f32.vlgmr.msra.gmra.mxu3 %v3308_v21  ;;  %2378 = vst [vmem:[%s2959_s27 + $0x98] sm:$0xff] %v2346_v12 }
 0x1d1   : > { %2223 = vmatmul.f32.vlgmr.msra.gmra.mxu2 %v3308_v21  ;;  %2255 = vmatpush.msrb.mxu1 %v427_v35  ;;  %v364_v21 = vld [vmem:[%s2548_s17 + $0x5f8] sm:$0xff] }
 0x1d2   : > { %2277 = vmatpush.msrb.mxu3 %v875_v14  ;;  %2295 = vmatpush.msrb.mxu0 %v428_v15 }
 0x1d3   : > { %2317 = vmatpush.msrb.mxu2 %v876_v16  ;;  %2256 = vmatpush.msrb.mxu1 %v395_v17 }
 0x1d4   : > { %2278 = vmatpush.msrb.mxu3 %v843_v18  ;;  %2296 = vmatpush.msrb.mxu0 %v396_v19 }
 0x1d5   : > { %2318 = vmatpush.msrb.mxu2 %v844_v20  ;;  %2257 = vmatpush.msrb.mxu1 %v363_v22 }
 0x1d6   : > { %2279 = vmatpush.msrb.mxu3 %v811_v23  ;;  %2297 = vmatpush.msrb.mxu0 %v364_v21 }
 0x1d7   : > { %2319 = vmatpush.msrb.mxu2 %v812_v5  ;;  %2258 = vmatpush.msrb.mxu1 %v331_v24 }
 0x1d8   : > { %2280 = vmatpush.msrb.mxu3 %v779_v25  ;;  %2298 = vmatpush.msrb.mxu0 %v332_v26 }
 0x1d9   : > { %2320 = vmatpush.msrb.mxu2 %v780_v27  ;;  %2482 = vmatmul.msk.f32.vlgmr.msra.gmra.mxu1 %vm1043_vm0, %v3331_v36 }
 0x1da   : > { %2483 = vmatmul.msk.f32.vlgmr.msra.gmra.mxu0 %vm1043_vm0, %v3331_v36  ;;  %2259 = vmatpush.msrb.mxu1 %v299_v39 }
 0x1db   : > { %2281 = vmatpush.msrb.mxu3 %v747_v28  ;;  %2299 = vmatpush.msrb.mxu0 %v300_v29 }
 0x1dc   : > { %2321 = vmatpush.msrb.mxu2 %v748_v30  ;;  %2260 = vmatpush.msrb.mxu1 %v267_v13 }
 0x1dd   : > { %2282 = vmatpush.msrb.mxu3 %v715_v31  ;;  %2300 = vmatpush.msrb.mxu0 %v268_v32 }
 0x1de   : > { %2322 = vmatpush.msrb.mxu2 %v716_v33  ;;  %2484 = vmatmul.msk.f32.vlgmr.msrb.gmra.mxu3 %vm1043_vm0, %v3331_v36 }
 0x1df   : > { %2485 = vmatmul.msk.f32.vlgmr.msrb.gmra.mxu2 %vm1043_vm0, %v3331_v36  ;;  %2261 = vmatpush.msrb.mxu1 %v235_v34 }
 0x1e0   : > { %2301 = vmatpush.msrb.mxu0 %v236_v37 }
 0x1e1   : > { %2262 = vmatpush.msrb.mxu1 %v203_v38 }
 0x1e2   : > { %2302 = vmatpush.msrb.mxu0 %v204_v40  ;;  %2263 = vmatmul.f32.vlgmr.msrb.gmra.mxu1 %v2504_v41 }
 0x1e3   : > { %2303 = vmatmul.f32.vlgmr.msrb.gmra.mxu0 %v2504_v41 }
 0x1e7   : > { %v1864_v43 = vpop.f32.mrf.mxu3 }
 0x1e8   : > { %v1904_v44 = vpop.f32.mrf.mxu2  ;;  %v1865_v45 = vadd.f32 %v1864_v43, %v2943_v42 }
 0x1e9   : > { %v1905_v36 = vadd.f32 %v1904_v44, %v2943_v42 }
 0x1ea   : > { %v1884_v46 = vpop.f32.mrf.mxu1 }
 0x1eb   : > { %v1924_v47 = vpop.f32.mrf.mxu0  ;;  %v1885_v48 = vadd.f32 %v1884_v46, %v1865_v45 }
 0x1ec   : > { %v1925_v49 = vadd.f32 %v1924_v47, %v1905_v36 }
 0x1ed   : > { %v2347_v50 = vmax.f32 %v1885_v48, 0.0 }
 0x1ee   : > { %v2348_v51 = vmax.f32 %v1925_v49, 0.0 }
 0x1ef   : > { %2379 = vst [vmem:[%s2959_s27 + $0xa0] sm:$0xff] %v2347_v50 }
 0x1f0   : > { %2380 = vst [vmem:[%s2959_s27 + $0xa8] sm:$0xff] %v2348_v51 }
 0x202   : > { %v1944_v52 = vpop.f32.mrf.mxu1 }
 0x203   : > { %v1984_v53 = vpop.f32.mrf.mxu0  ;;  %v1945_v54 = vadd.f32 %v1944_v52, %v2943_v42  ;;  %v1964_v56 = vpop.f32.mrf.mxu3 }
 0x204   : > { %v1985_v55 = vadd.f32 %v1984_v53, %v2943_v42  ;;  %v2004_v57 = vpop.f32.mrf.mxu2 }
 0x205   : > { %v1965_v58 = vadd.f32 %v1964_v56, %v1945_v54 }
 0x206   : > { %v2005_v59 = vadd.f32 %v2004_v57, %v1985_v55 }
 0x207   : > { %v2349_v60 = vmax.f32 %v1965_v58, 0.0 }
 0x208   : > { %v2350_v61 = vmax.f32 %v2005_v59, 0.0 }
 0x209   : > { %2381 = vst [vmem:[%s2959_s27 + $0xb0] sm:$0xff] %v2349_v60 }
 0x20a   : > { %2382 = vst [vmem:[%s2959_s27 + $0xb8] sm:$0xff] %v2350_v61 }
 0x221   : > { %v2024_v62 = vpop.f32.mrf.mxu3 }
 0x222   : > { %v2064_v63 = vpop.f32.mrf.mxu2  ;;  %v2025_v0 = vadd.f32 %v2024_v62, %v2943_v42 }
 0x223   : > { %v2065_v1 = vadd.f32 %v2064_v63, %v2943_v42 }
 0x224   : > { %v2044_v2 = vpop.f32.mrf.mxu1 }
 0x225   : > { %v2084_v3 = vpop.f32.mrf.mxu0  ;;  %v2045_v4 = vadd.f32 %v2044_v2, %v2025_v0 }
 0x226   : > { %v2085_v6 = vadd.f32 %v2084_v3, %v2065_v1 }
 0x227   : > { %v2351_v7 = vmax.f32 %v2045_v4, 0.0 }
 0x228   : > { %v2352_v8 = vmax.f32 %v2085_v6, 0.0 }
 0x229   : > { %2383 = vst [vmem:[%s2959_s27 + $0xc0] sm:$0xff] %v2351_v7 }
 0x22a   : > { %2384 = vst [vmem:[%s2959_s27 + $0xc8] sm:$0xff] %v2352_v8 }
 0x23c   : > { %v2104_v9 = vpop.f32.mrf.mxu1 }
 0x23d   : > { %v2144_v10 = vpop.f32.mrf.mxu0  ;;  %v2105_v11 = vadd.f32 %v2104_v9, %v2943_v42  ;;  %v2124_v35 = vpop.f32.mrf.mxu3 }
 0x23e   : > { %v2145_v12 = vadd.f32 %v2144_v10, %v2943_v42  ;;  %v2164_v14 = vpop.f32.mrf.mxu2 }
 0x23f   : > { %v2125_v15 = vadd.f32 %v2124_v35, %v2105_v11 }
 0x240   : > { %v2165_v16 = vadd.f32 %v2164_v14, %v2145_v12 }
 0x241   : > { %v2353_v17 = vmax.f32 %v2125_v15, 0.0 }
 0x242   : > { %v2354_v18 = vmax.f32 %v2165_v16, 0.0 }
 0x243   : > { %2385 = vst [vmem:[%s2959_s27 + $0xd0] sm:$0xff] %v2353_v17 }
 0x244   : > { %2386 = vst [vmem:[%s2959_s27 + $0xd8] sm:$0xff] %v2354_v18 }
 0x253   : > { %v2184_v19 = vpop.f32.mrf.mxu3 }
 0x254   : > { %v2224_v20 = vpop.f32.mrf.mxu2  ;;  %v2185_v22 = vadd.f32 %v2184_v19, %v2943_v42 }
 0x255   : > { %v2225_v23 = vadd.f32 %v2224_v20, %v2943_v42 }
 0x256   : > { %v2204_v21 = vpop.f32.mrf.mxu1 }
 0x257   : > { %v2244_v5 = vpop.f32.mrf.mxu0  ;;  %v2205_v24 = vadd.f32 %v2204_v21, %v2185_v22 }
 0x258   : > { %v2245_v25 = vadd.f32 %v2244_v5, %v2225_v23 }
 0x259   : > { %v2355_v26 = vmax.f32 %v2205_v24, 0.0 }
 0x25a   : > { %v2356_v27 = vmax.f32 %v2245_v25, 0.0 }
 0x25b   : > { %2387 = vst [vmem:[%s2959_s27 + $0xe0] sm:$0xff] %v2355_v26 }
 0x25c   : > { %2388 = vst [vmem:[%s2959_s27 + $0xe8] sm:$0xff] %v2356_v27 }
 0x25f   : > { %v2264_v39 = vpop.f32.mrf.mxu1 }
 0x260   : > { %v2304_v28 = vpop.f32.mrf.mxu0  ;;  %v2265_v29 = vadd.f32 %v2264_v39, %v2943_v42 }
 0x261   : > { %v2305_v30 = vadd.f32 %v2304_v28, %v2943_v42  ;;  %v2284_v13 = vpop.f32.mrf.mxu3 }
 0x262   : > { %v2324_v31 = vpop.f32.mrf.mxu2  ;;  %v2285_v32 = vadd.f32 %v2284_v13, %v2265_v29 }
 0x263   : > { %v2325_v33 = vadd.f32 %v2324_v31, %v2305_v30 }
 0x264   : > { %v2357_v34 = vmax.f32 %v2285_v32, 0.0 }
 0x265   : > { %v2358_v37 = vmax.f32 %v2325_v33, 0.0 }
 0x266   : > { %2389 = vst [vmem:[%s2959_s27 + $0xf0] sm:$0xff] %v2357_v34 }
 0x267   : > { %2390 = vst [vmem:[%s2959_s27 + $0xf8] sm:$0xff] %v2358_v37 }
 0x268 PF: > { %s13_s12 = sadd.s32 1, %s2511_s12  }
 0x269   : > { %p10_p4 = scmp.ge.s32.totalorder %s13_s12, 4  }
 0x26b   :  { %12 = sbr.rel (!%p10_p4) target bundleno = 1 (0x1), region = 62 }

</bundles_post_ra>
